<compile_context>
chip_gen: v7x
topology: tpu7x:2x2x1
jax: 0.10.0
libtpu: 0.0.40
codegen_flags: <defaults>
</compile_context>

<pallas_src>
import functools
import math

import jax
import jax.numpy as jnp
import numpy as np
from jax import lax
from jax.experimental import pallas as pl
from jax.experimental.pallas import tpu as pltpu


def hft_kernel(x_ref, fwf_ref, fhf_ref, fhi_ref, fwr_ref, fwi_ref, o_ref,
               *, use_bf16_mxu=False):
    """High-pass filter of K real (H, W) planes via a low-rank DFT correction."""
    K, H, W = x_ref.shape
    R2 = fwf_ref.shape[1]              # 2 * Rp (cos|sin concatenated, zero-padded)
    Rp = R2 // 2
    f32 = jnp.float32
    mxu_dt = jnp.bfloat16 if use_bf16_mxu else f32

    def mm(a, b):                      # (m, c) @ (c, n) on the MXU, f32 accumulate
        return lax.dot_general(a.astype(mxu_dt), b.astype(mxu_dt),
                               (((1,), (0,)), ((), ())),
                               preferred_element_type=f32)

    x = x_ref[...].astype(f32)                     # (K, H, W)
    xf = x.reshape(K * H, W)                       # free relayout when H % 8 == 0

    fwf = fwf_ref[...]                             # (W, 2Rp)  [cw^T | sw^T] / sqrt(HW)
    fhf = fhf_ref[...]                             # (2Rp, H)  [ch ; sh]
    fhi = fhi_ref[...]                             # (2H, 2Rp) [[cht, -sht]; [sht, cht]]
    fwr = fwr_ref[...]                             # (2Rp, W)  [cw ; -sw] / sqrt(HW)
    fwi = fwi_ref[...]                             # (2Rp, W)  [sw ;  cw] / sqrt(HW)

    # ---- forward DFT along W: ONE fused cos|sin matmul over the whole block ----
    t = mm(xf, fwf)                                # (K*H, 2Rp): [x@cw^T | x@sw^T]
    t3 = t.reshape(K, H, R2)

    # ---- forward + inverse DFT along H (tiny vs the W stages; per plane) -------
    rows = []
    for k in range(K):                             # K is static -> unrolled
        pk = mm(fhf, t3[k])                        # (2Rp, 2Rp): [[c@u, c@v], [s@u, s@v]]
        cu = pk[:Rp, :Rp]
        cv = pk[:Rp, Rp:]
        su = pk[Rp:, :Rp]
        sv = pk[Rp:, Rp:]
        sk = jnp.concatenate([cu - sv, -(su + cv)], axis=0)   # (2Rp, Rp) = [Re S; Im S]
        tk = mm(fhi, sk)                           # (2H, Rp) = [Re T; Im T]
        rows.append(jnp.concatenate([tk[:H], tk[H:]], axis=-1))   # (H, 2Rp)
    L = jnp.concatenate(rows, axis=0)              # (K*H, 2Rp) = [Re T | Im T]

    # ---- inverse DFT along W: TWO fused complex matmuls (2Rp-deep contraction) -
    re_c = mm(L, fwr)                              # (K*H, W)  Re(lowpass)
    im_c = mm(L, fwi)                              # (K*H, W)  Im(lowpass)

    # high-pass = x - lowpass (complex); the module returns its magnitude
    d = xf - re_c
    o_ref[...] = jnp.sqrt(d * d + im_c * im_c).reshape(K, H, W).astype(o_ref.dtype)


def _low_freq_dft_factors(n, r, rp):
    """cos/sin of the 2r 'low' DFT frequencies (-r..r-1), zero-padded to rp rows.

    Built with numpy int64 so the phase (k*idx mod n) stays exact for any n."""
    k = np.arange(-r, r, dtype=np.int64)
    idx = np.arange(n, dtype=np.int64)
    ang = (2.0 * np.pi / n) * np.mod(k[:, None] * idx[None, :], n).astype(np.float64)
    c = np.zeros((rp, n), np.float32)
    s = np.zeros((rp, n), np.float32)
    c[: 2 * r] = np.cos(ang)
    s[: 2 * r] = np.sin(ang)
    return c, s


def _vmem_limit_bytes():
    """Generation-aware scoped-VMEM limit (v7x has only 64 MiB per TensorCore)."""
    cap = 128 * 1024 * 1024
    try:
        info = pltpu.get_tpu_info()
        cap = int(getattr(info, "vmem_capacity_bytes", cap) or cap)
    except Exception:
        pass
    return min(64 * 1024 * 1024, int(cap * 0.72))


def _pick_block_planes(bc, h, w, vmem_limit):
    """Planes per grid step: fill VMEM / feed the MXU, but keep >= 4 grid steps
    (2 per v7x TensorCore, >= 2 per core so the BlockSpec pipeline can overlap
    DMA with compute) only when a step still keeps >= ~1024 matmul rows."""
    plane_f32 = h * w * 4
    # ~10 live f32 plane-sized buffers: double-buffered in/out blocks + temporaries.
    k_vmem = max(1, int(vmem_limit * 0.55) // (10 * plane_f32))
    k = min(bc, k_vmem, 32)            # 32 also caps the unrolled per-plane H stage
    rows_min_k = -(-1024 // h)         # planes needed for >= 1024 matmul rows / step
    if bc >= 4 * rows_min_k:
        k = min(k, max(rows_min_k, bc // 4))
    return max(1, k)


def high_fourier_transform(x, mask_range=20, block_planes=None, use_bf16_mxu=False):
    """Pallas TPU equivalent of HighFourierTransform.forward; x is (B, C, H, W)."""
    B, C, H, W = x.shape
    out_dtype = x.dtype if jnp.issubdtype(x.dtype, jnp.floating) else jnp.float32
    r = min(mask_range, min(H // 2, W // 2))
    if r <= 0:                                   # degenerate: mask is all ones
        return jnp.abs(x).astype(out_dtype)

    R = 2 * r
    Rp = -(-R // 64) * 64                        # zero-pad so 2*Rp is a multiple of 128

    ch, sh = _low_freq_dft_factors(H, r, Rp)     # (Rp, H)
    cw, sw = _low_freq_dft_factors(W, r, Rp)     # (Rp, W)
    s = 1.0 / math.sqrt(H * W)                   # split the 1/(H*W) iFFT scale
    fw_fwd = np.concatenate([cw.T, sw.T], axis=1) * s          # (W, 2Rp)
    fh_fwd = np.concatenate([ch, sh], axis=0)                  # (2Rp, H)
    fh_inv = np.block([[ch.T, -sh.T], [sh.T, ch.T]])           # (2H, 2Rp)
    fw_re = np.concatenate([cw, -sw], axis=0) * s              # (2Rp, W)
    fw_im = np.concatenate([sw, cw], axis=0) * s               # (2Rp, W)

    BC = B * C
    x2 = x.reshape(BC, H, W)                     # native dtype; cast happens in-kernel

    vmem_limit = _vmem_limit_bytes()
    K = block_planes or _pick_block_planes(BC, H, W, vmem_limit)
    # Use the largest divisor of BC <= K: no zero-pad concat / out[:BC] slice.
    K = max(d for d in range(1, min(K, BC) + 1) if BC % d == 0)
    G = BC // K

    consts = [jnp.asarray(a, jnp.float32)
              for a in (fw_fwd, fh_fwd, fh_inv, fw_re, fw_im)]

    def const_spec(shape):
        return pl.BlockSpec(shape, lambda i: (0, 0))

    out = pl.pallas_call(
        functools.partial(hft_kernel, use_bf16_mxu=use_bf16_mxu),
        out_shape=jax.ShapeDtypeStruct((BC, H, W), out_dtype),
        grid_spec=pltpu.PrefetchScalarGridSpec(
            num_scalar_prefetch=0,
            grid=(G,),
            in_specs=[
                pl.BlockSpec((K, H, W), lambda i: (i, 0, 0)),
                const_spec((W, 2 * Rp)),       # fw_fwd
                const_spec((2 * Rp, H)),       # fh_fwd
                const_spec((2 * H, 2 * Rp)),   # fh_inv
                const_spec((2 * Rp, W)),       # fw_re
                const_spec((2 * Rp, W)),       # fw_im
            ],
            out_specs=pl.BlockSpec((K, H, W), lambda i: (i, 0, 0)),
        ),
        compiler_params=pltpu.CompilerParams(
            dimension_semantics=("parallel",),
            vmem_limit_bytes=vmem_limit,
        ),
    )(x2, *consts)
    return out.reshape(B, C, H, W)


def _reference(x, mask_range):
    """Pure-JAX reference mirroring the PyTorch forward."""
    B, C, H, W = x.shape
    crow, ccol = H // 2, W // 2
    r = min(mask_range, min(crow, ccol))
    mask = jnp.ones((H, W), jnp.float32)
    if r > 0:
        mask = mask.at[crow - r:crow + r, ccol - r:ccol + r].set(0.0)
    dft = jnp.fft.fft2(x.astype(jnp.float32))
    fshift = jnp.fft.fftshift(dft, axes=(-2, -1)) * mask[None, None]
    z = jnp.fft.ifft2(jnp.fft.ifftshift(fshift, axes=(-2, -1)))
    return jnp.abs(z)


if __name__ == "__main__":
    key = jax.random.PRNGKey(0)
    B, C, H, W = 2, 4, 16, 16
    x = jax.random.normal(key, (B, C, H, W), dtype=jnp.float32)

    # Non-degenerate mask for 16x16 planes (r = 4 < H//2).
    y = jax.block_until_ready(high_fourier_transform(x, mask_range=4))
    err = float(jnp.max(jnp.abs(y - _reference(x, 4))))
    assert y.shape == (B, C, H, W)
    # Tolerance covers a possible bf16-demoted MXU pass; typically ~1e-5.
    assert err < 3e-2, f"max abs error {err}"

    # Module default (mask_range=20 covers the whole 16x16 spectrum -> output ~ 0).
    y2 = jax.block_until_ready(high_fourier_transform(x, mask_range=20))
    err2 = float(jnp.max(jnp.abs(y2 - _reference(x, 20))))
    assert err2 < 3e-2, f"max abs error (default mask_range) {err2}"

    # Opt-in bf16-MXU perf path -- looser tolerance (~1e-2 relative expected).
    y3 = jax.block_until_ready(
        high_fourier_transform(x, mask_range=4, use_bf16_mxu=True))
    err3 = float(jnp.max(jnp.abs(y3 - _reference(x, 4))))
    assert err3 < 1e-1, f"max abs error (bf16 MXU) {err3}"

    print("KERNEL_OK")
</pallas_src>

<mosaic_0001>
module attributes {stable_mosaic.version = 11 : i64} {
  func.func @hft_kernel(%arg0: i32, %arg1: memref<8x16x16xf32, #tpu.memory_space<vmem>>, %arg2: memref<16x128xf32, #tpu.memory_space<vmem>>, %arg3: memref<128x16xf32, #tpu.memory_space<vmem>>, %arg4: memref<32x128xf32, #tpu.memory_space<vmem>>, %arg5: memref<128x16xf32, #tpu.memory_space<vmem>>, %arg6: memref<128x16xf32, #tpu.memory_space<vmem>>, %arg7: memref<8x16x16xf32, #tpu.memory_space<vmem>>) attributes {dimension_semantics = [#tpu.dimension_semantics<parallel>], iteration_bounds = array<i64: 1>, scalar_prefetch = 0 : i64, scratch_operands = 0 : i64, tpu.core_type = #tpu.core_type<tc>, window_params = [{transform_indices = @transform_0, window_bounds = array<i64: 8, 16, 16>}, {pipeline_mode = #tpu.pipeline_mode<synchronous>, transform_indices = @transform_1, window_bounds = array<i64: 16, 128>}, {pipeline_mode = #tpu.pipeline_mode<synchronous>, transform_indices = @transform_2, window_bounds = array<i64: 128, 16>}, {pipeline_mode = #tpu.pipeline_mode<synchronous>, transform_indices = @transform_3, window_bounds = array<i64: 32, 128>}, {pipeline_mode = #tpu.pipeline_mode<synchronous>, transform_indices = @transform_4, window_bounds = array<i64: 128, 16>}, {pipeline_mode = #tpu.pipeline_mode<synchronous>, transform_indices = @transform_5, window_bounds = array<i64: 128, 16>}, {transform_indices = @transform_6, window_bounds = array<i64: 8, 16, 16>}]} {
    %c0 = arith.constant 0 : index
    %c0_0 = arith.constant 0 : index
    %c0_1 = arith.constant 0 : index
    %0 = vector.load %arg1[%c0, %c0_0, %c0_1] : memref<8x16x16xf32, #tpu.memory_space<vmem>>, vector<8x16x16xf32>
    %1 = vector.shape_cast %0 : vector<8x16x16xf32> to vector<128x16xf32>
    %c0_2 = arith.constant 0 : index
    %c0_3 = arith.constant 0 : index
    %2 = vector.load %arg2[%c0_2, %c0_3] : memref<16x128xf32, #tpu.memory_space<vmem>>, vector<16x128xf32>
    %c0_4 = arith.constant 0 : index
    %c0_5 = arith.constant 0 : index
    %3 = vector.load %arg3[%c0_4, %c0_5] : memref<128x16xf32, #tpu.memory_space<vmem>>, vector<128x16xf32>
    %c0_6 = arith.constant 0 : index
    %c0_7 = arith.constant 0 : index
    %4 = vector.load %arg4[%c0_6, %c0_7] : memref<32x128xf32, #tpu.memory_space<vmem>>, vector<32x128xf32>
    %c0_8 = arith.constant 0 : index
    %c0_9 = arith.constant 0 : index
    %5 = vector.load %arg5[%c0_8, %c0_9] : memref<128x16xf32, #tpu.memory_space<vmem>>, vector<128x16xf32>
    %c0_10 = arith.constant 0 : index
    %c0_11 = arith.constant 0 : index
    %6 = vector.load %arg6[%c0_10, %c0_11] : memref<128x16xf32, #tpu.memory_space<vmem>>, vector<128x16xf32>
    %cst = arith.constant dense<0.000000e+00> : vector<128x128xf32>
    %7 = tpu.matmul %1, %2, %cst {dimension_numbers = #tpu.dot_dimension_numbers<[1], [0], [0], [1], [0, 0, 1, 1], [], []>} : vector<128x16xf32>, vector<16x128xf32>, vector<128x128xf32> -> vector<128x128xf32>
    %8 = vector.shape_cast %7 : vector<128x128xf32> to vector<8x16x128xf32>
    %9 = vector.extract_strided_slice %8 {offsets = [0, 0, 0], sizes = [1, 16, 128], strides = [1, 1, 1]} : vector<8x16x128xf32> to vector<1x16x128xf32>
    %10 = vector.shape_cast %9 : vector<1x16x128xf32> to vector<16x128xf32>
    %cst_12 = arith.constant dense<0.000000e+00> : vector<128x128xf32>
    %11 = tpu.matmul %3, %10, %cst_12 {dimension_numbers = #tpu.dot_dimension_numbers<[1], [0], [0], [1], [0, 0, 1, 1], [], []>} : vector<128x16xf32>, vector<16x128xf32>, vector<128x128xf32> -> vector<128x128xf32>
    %12 = vector.extract_strided_slice %11 {offsets = [0, 0], sizes = [64, 64], strides = [1, 1]} : vector<128x128xf32> to vector<64x64xf32>
    %13 = vector.extract_strided_slice %11 {offsets = [0, 64], sizes = [64, 64], strides = [1, 1]} : vector<128x128xf32> to vector<64x64xf32>
    %14 = vector.extract_strided_slice %11 {offsets = [64, 0], sizes = [64, 64], strides = [1, 1]} : vector<128x128xf32> to vector<64x64xf32>
    %15 = vector.extract_strided_slice %11 {offsets = [64, 64], sizes = [64, 64], strides = [1, 1]} : vector<128x128xf32> to vector<64x64xf32>
    %16 = arith.subf %12, %15 : vector<64x64xf32>
    %17 = arith.addf %14, %13 : vector<64x64xf32>
    %cst_13 = arith.constant 0.000000e+00 : f32
    %18 = vector.broadcast %cst_13 : f32 to vector<64x64xf32>
    %19 = arith.subf %18, %17 : vector<64x64xf32>
    %20 = tpu.concatenate %16, %19 in 0 : vector<64x64xf32>, vector<64x64xf32> -> vector<128x64xf32>
    %cst_14 = arith.constant dense<0.000000e+00> : vector<32x64xf32>
    %21 = tpu.matmul %4, %20, %cst_14 {dimension_numbers = #tpu.dot_dimension_numbers<[1], [0], [0], [1], [0, 0, 1, 1], [], []>} : vector<32x128xf32>, vector<128x64xf32>, vector<32x64xf32> -> vector<32x64xf32>
    %22 = vector.extract_strided_slice %21 {offsets = [0, 0], sizes = [16, 64], strides = [1, 1]} : vector<32x64xf32> to vector<16x64xf32>
    %23 = vector.extract_strided_slice %21 {offsets = [16, 0], sizes = [16, 64], strides = [1, 1]} : vector<32x64xf32> to vector<16x64xf32>
    %24 = tpu.concatenate %22, %23 in 1 : vector<16x64xf32>, vector<16x64xf32> -> vector<16x128xf32>
    %25 = vector.extract_strided_slice %8 {offsets = [1, 0, 0], sizes = [1, 16, 128], strides = [1, 1, 1]} : vector<8x16x128xf32> to vector<1x16x128xf32>
    %26 = vector.shape_cast %25 : vector<1x16x128xf32> to vector<16x128xf32>
    %cst_15 = arith.constant dense<0.000000e+00> : vector<128x128xf32>
    %27 = tpu.matmul %3, %26, %cst_15 {dimension_numbers = #tpu.dot_dimension_numbers<[1], [0], [0], [1], [0, 0, 1, 1], [], []>} : vector<128x16xf32>, vector<16x128xf32>, vector<128x128xf32> -> vector<128x128xf32>
    %28 = vector.extract_strided_slice %27 {offsets = [0, 0], sizes = [64, 64], strides = [1, 1]} : vector<128x128xf32> to vector<64x64xf32>
    %29 = vector.extract_strided_slice %27 {offsets = [0, 64], sizes = [64, 64], strides = [1, 1]} : vector<128x128xf32> to vector<64x64xf32>
    %30 = vector.extract_strided_slice %27 {offsets = [64, 0], sizes = [64, 64], strides = [1, 1]} : vector<128x128xf32> to vector<64x64xf32>
    %31 = vector.extract_strided_slice %27 {offsets = [64, 64], sizes = [64, 64], strides = [1, 1]} : vector<128x128xf32> to vector<64x64xf32>
    %32 = arith.subf %28, %31 : vector<64x64xf32>
    %33 = arith.addf %30, %29 : vector<64x64xf32>
    %cst_16 = arith.constant 0.000000e+00 : f32
    %34 = vector.broadcast %cst_16 : f32 to vector<64x64xf32>
    %35 = arith.subf %34, %33 : vector<64x64xf32>
    %36 = tpu.concatenate %32, %35 in 0 : vector<64x64xf32>, vector<64x64xf32> -> vector<128x64xf32>
    %cst_17 = arith.constant dense<0.000000e+00> : vector<32x64xf32>
    %37 = tpu.matmul %4, %36, %cst_17 {dimension_numbers = #tpu.dot_dimension_numbers<[1], [0], [0], [1], [0, 0, 1, 1], [], []>} : vector<32x128xf32>, vector<128x64xf32>, vector<32x64xf32> -> vector<32x64xf32>
    %38 = vector.extract_strided_slice %37 {offsets = [0, 0], sizes = [16, 64], strides = [1, 1]} : vector<32x64xf32> to vector<16x64xf32>
    %39 = vector.extract_strided_slice %37 {offsets = [16, 0], sizes = [16, 64], strides = [1, 1]} : vector<32x64xf32> to vector<16x64xf32>
    %40 = tpu.concatenate %38, %39 in 1 : vector<16x64xf32>, vector<16x64xf32> -> vector<16x128xf32>
    %41 = vector.extract_strided_slice %8 {offsets = [2, 0, 0], sizes = [1, 16, 128], strides = [1, 1, 1]} : vector<8x16x128xf32> to vector<1x16x128xf32>
    %42 = vector.shape_cast %41 : vector<1x16x128xf32> to vector<16x128xf32>
    %cst_18 = arith.constant dense<0.000000e+00> : vector<128x128xf32>
    %43 = tpu.matmul %3, %42, %cst_18 {dimension_numbers = #tpu.dot_dimension_numbers<[1], [0], [0], [1], [0, 0, 1, 1], [], []>} : vector<128x16xf32>, vector<16x128xf32>, vector<128x128xf32> -> vector<128x128xf32>
    %44 = vector.extract_strided_slice %43 {offsets = [0, 0], sizes = [64, 64], strides = [1, 1]} : vector<128x128xf32> to vector<64x64xf32>
    %45 = vector.extract_strided_slice %43 {offsets = [0, 64], sizes = [64, 64], strides = [1, 1]} : vector<128x128xf32> to vector<64x64xf32>
    %46 = vector.extract_strided_slice %43 {offsets = [64, 0], sizes = [64, 64], strides = [1, 1]} : vector<128x128xf32> to vector<64x64xf32>
    %47 = vector.extract_strided_slice %43 {offsets = [64, 64], sizes = [64, 64], strides = [1, 1]} : vector<128x128xf32> to vector<64x64xf32>
    %48 = arith.subf %44, %47 : vector<64x64xf32>
    %49 = arith.addf %46, %45 : vector<64x64xf32>
    %cst_19 = arith.constant 0.000000e+00 : f32
    %50 = vector.broadcast %cst_19 : f32 to vector<64x64xf32>
    %51 = arith.subf %50, %49 : vector<64x64xf32>
    %52 = tpu.concatenate %48, %51 in 0 : vector<64x64xf32>, vector<64x64xf32> -> vector<128x64xf32>
    %cst_20 = arith.constant dense<0.000000e+00> : vector<32x64xf32>
    %53 = tpu.matmul %4, %52, %cst_20 {dimension_numbers = #tpu.dot_dimension_numbers<[1], [0], [0], [1], [0, 0, 1, 1], [], []>} : vector<32x128xf32>, vector<128x64xf32>, vector<32x64xf32> -> vector<32x64xf32>
    %54 = vector.extract_strided_slice %53 {offsets = [0, 0], sizes = [16, 64], strides = [1, 1]} : vector<32x64xf32> to vector<16x64xf32>
    %55 = vector.extract_strided_slice %53 {offsets = [16, 0], sizes = [16, 64], strides = [1, 1]} : vector<32x64xf32> to vector<16x64xf32>
    %56 = tpu.concatenate %54, %55 in 1 : vector<16x64xf32>, vector<16x64xf32> -> vector<16x128xf32>
    %57 = vector.extract_strided_slice %8 {offsets = [3, 0, 0], sizes = [1, 16, 128], strides = [1, 1, 1]} : vector<8x16x128xf32> to vector<1x16x128xf32>
    %58 = vector.shape_cast %57 : vector<1x16x128xf32> to vector<16x128xf32>
    %cst_21 = arith.constant dense<0.000000e+00> : vector<128x128xf32>
    %59 = tpu.matmul %3, %58, %cst_21 {dimension_numbers = #tpu.dot_dimension_numbers<[1], [0], [0], [1], [0, 0, 1, 1], [], []>} : vector<128x16xf32>, vector<16x128xf32>, vector<128x128xf32> -> vector<128x128xf32>
    %60 = vector.extract_strided_slice %59 {offsets = [0, 0], sizes = [64, 64], strides = [1, 1]} : vector<128x128xf32> to vector<64x64xf32>
    %61 = vector.extract_strided_slice %59 {offsets = [0, 64], sizes = [64, 64], strides = [1, 1]} : vector<128x128xf32> to vector<64x64xf32>
    %62 = vector.extract_strided_slice %59 {offsets = [64, 0], sizes = [64, 64], strides = [1, 1]} : vector<128x128xf32> to vector<64x64xf32>
    %63 = vector.extract_strided_slice %59 {offsets = [64, 64], sizes = [64, 64], strides = [1, 1]} : vector<128x128xf32> to vector<64x64xf32>
    %64 = arith.subf %60, %63 : vector<64x64xf32>
    %65 = arith.addf %62, %61 : vector<64x64xf32>
    %cst_22 = arith.constant 0.000000e+00 : f32
    %66 = vector.broadcast %cst_22 : f32 to vector<64x64xf32>
    %67 = arith.subf %66, %65 : vector<64x64xf32>
    %68 = tpu.concatenate %64, %67 in 0 : vector<64x64xf32>, vector<64x64xf32> -> vector<128x64xf32>
    %cst_23 = arith.constant dense<0.000000e+00> : vector<32x64xf32>
    %69 = tpu.matmul %4, %68, %cst_23 {dimension_numbers = #tpu.dot_dimension_numbers<[1], [0], [0], [1], [0, 0, 1, 1], [], []>} : vector<32x128xf32>, vector<128x64xf32>, vector<32x64xf32> -> vector<32x64xf32>
    %70 = vector.extract_strided_slice %69 {offsets = [0, 0], sizes = [16, 64], strides = [1, 1]} : vector<32x64xf32> to vector<16x64xf32>
    %71 = vector.extract_strided_slice %69 {offsets = [16, 0], sizes = [16, 64], strides = [1, 1]} : vector<32x64xf32> to vector<16x64xf32>
    %72 = tpu.concatenate %70, %71 in 1 : vector<16x64xf32>, vector<16x64xf32> -> vector<16x128xf32>
    %73 = vector.extract_strided_slice %8 {offsets = [4, 0, 0], sizes = [1, 16, 128], strides = [1, 1, 1]} : vector<8x16x128xf32> to vector<1x16x128xf32>
    %74 = vector.shape_cast %73 : vector<1x16x128xf32> to vector<16x128xf32>
    %cst_24 = arith.constant dense<0.000000e+00> : vector<128x128xf32>
    %75 = tpu.matmul %3, %74, %cst_24 {dimension_numbers = #tpu.dot_dimension_numbers<[1], [0], [0], [1], [0, 0, 1, 1], [], []>} : vector<128x16xf32>, vector<16x128xf32>, vector<128x128xf32> -> vector<128x128xf32>
    %76 = vector.extract_strided_slice %75 {offsets = [0, 0], sizes = [64, 64], strides = [1, 1]} : vector<128x128xf32> to vector<64x64xf32>
    %77 = vector.extract_strided_slice %75 {offsets = [0, 64], sizes = [64, 64], strides = [1, 1]} : vector<128x128xf32> to vector<64x64xf32>
    %78 = vector.extract_strided_slice %75 {offsets = [64, 0], sizes = [64, 64], strides = [1, 1]} : vector<128x128xf32> to vector<64x64xf32>
    %79 = vector.extract_strided_slice %75 {offsets = [64, 64], sizes = [64, 64], strides = [1, 1]} : vector<128x128xf32> to vector<64x64xf32>
    %80 = arith.subf %76, %79 : vector<64x64xf32>
    %81 = arith.addf %78, %77 : vector<64x64xf32>
    %cst_25 = arith.constant 0.000000e+00 : f32
    %82 = vector.broadcast %cst_25 : f32 to vector<64x64xf32>
    %83 = arith.subf %82, %81 : vector<64x64xf32>
    %84 = tpu.concatenate %80, %83 in 0 : vector<64x64xf32>, vector<64x64xf32> -> vector<128x64xf32>
    %cst_26 = arith.constant dense<0.000000e+00> : vector<32x64xf32>
    %85 = tpu.matmul %4, %84, %cst_26 {dimension_numbers = #tpu.dot_dimension_numbers<[1], [0], [0], [1], [0, 0, 1, 1], [], []>} : vector<32x128xf32>, vector<128x64xf32>, vector<32x64xf32> -> vector<32x64xf32>
    %86 = vector.extract_strided_slice %85 {offsets = [0, 0], sizes = [16, 64], strides = [1, 1]} : vector<32x64xf32> to vector<16x64xf32>
    %87 = vector.extract_strided_slice %85 {offsets = [16, 0], sizes = [16, 64], strides = [1, 1]} : vector<32x64xf32> to vector<16x64xf32>
    %88 = tpu.concatenate %86, %87 in 1 : vector<16x64xf32>, vector<16x64xf32> -> vector<16x128xf32>
    %89 = vector.extract_strided_slice %8 {offsets = [5, 0, 0], sizes = [1, 16, 128], strides = [1, 1, 1]} : vector<8x16x128xf32> to vector<1x16x128xf32>
    %90 = vector.shape_cast %89 : vector<1x16x128xf32> to vector<16x128xf32>
    %cst_27 = arith.constant dense<0.000000e+00> : vector<128x128xf32>
    %91 = tpu.matmul %3, %90, %cst_27 {dimension_numbers = #tpu.dot_dimension_numbers<[1], [0], [0], [1], [0, 0, 1, 1], [], []>} : vector<128x16xf32>, vector<16x128xf32>, vector<128x128xf32> -> vector<128x128xf32>
    %92 = vector.extract_strided_slice %91 {offsets = [0, 0], sizes = [64, 64], strides = [1, 1]} : vector<128x128xf32> to vector<64x64xf32>
    %93 = vector.extract_strided_slice %91 {offsets = [0, 64], sizes = [64, 64], strides = [1, 1]} : vector<128x128xf32> to vector<64x64xf32>
    %94 = vector.extract_strided_slice %91 {offsets = [64, 0], sizes = [64, 64], strides = [1, 1]} : vector<128x128xf32> to vector<64x64xf32>
    %95 = vector.extract_strided_slice %91 {offsets = [64, 64], sizes = [64, 64], strides = [1, 1]} : vector<128x128xf32> to vector<64x64xf32>
    %96 = arith.subf %92, %95 : vector<64x64xf32>
    %97 = arith.addf %94, %93 : vector<64x64xf32>
    %cst_28 = arith.constant 0.000000e+00 : f32
    %98 = vector.broadcast %cst_28 : f32 to vector<64x64xf32>
    %99 = arith.subf %98, %97 : vector<64x64xf32>
    %100 = tpu.concatenate %96, %99 in 0 : vector<64x64xf32>, vector<64x64xf32> -> vector<128x64xf32>
    %cst_29 = arith.constant dense<0.000000e+00> : vector<32x64xf32>
    %101 = tpu.matmul %4, %100, %cst_29 {dimension_numbers = #tpu.dot_dimension_numbers<[1], [0], [0], [1], [0, 0, 1, 1], [], []>} : vector<32x128xf32>, vector<128x64xf32>, vector<32x64xf32> -> vector<32x64xf32>
    %102 = vector.extract_strided_slice %101 {offsets = [0, 0], sizes = [16, 64], strides = [1, 1]} : vector<32x64xf32> to vector<16x64xf32>
    %103 = vector.extract_strided_slice %101 {offsets = [16, 0], sizes = [16, 64], strides = [1, 1]} : vector<32x64xf32> to vector<16x64xf32>
    %104 = tpu.concatenate %102, %103 in 1 : vector<16x64xf32>, vector<16x64xf32> -> vector<16x128xf32>
    %105 = vector.extract_strided_slice %8 {offsets = [6, 0, 0], sizes = [1, 16, 128], strides = [1, 1, 1]} : vector<8x16x128xf32> to vector<1x16x128xf32>
    %106 = vector.shape_cast %105 : vector<1x16x128xf32> to vector<16x128xf32>
    %cst_30 = arith.constant dense<0.000000e+00> : vector<128x128xf32>
    %107 = tpu.matmul %3, %106, %cst_30 {dimension_numbers = #tpu.dot_dimension_numbers<[1], [0], [0], [1], [0, 0, 1, 1], [], []>} : vector<128x16xf32>, vector<16x128xf32>, vector<128x128xf32> -> vector<128x128xf32>
    %108 = vector.extract_strided_slice %107 {offsets = [0, 0], sizes = [64, 64], strides = [1, 1]} : vector<128x128xf32> to vector<64x64xf32>
    %109 = vector.extract_strided_slice %107 {offsets = [0, 64], sizes = [64, 64], strides = [1, 1]} : vector<128x128xf32> to vector<64x64xf32>
    %110 = vector.extract_strided_slice %107 {offsets = [64, 0], sizes = [64, 64], strides = [1, 1]} : vector<128x128xf32> to vector<64x64xf32>
    %111 = vector.extract_strided_slice %107 {offsets = [64, 64], sizes = [64, 64], strides = [1, 1]} : vector<128x128xf32> to vector<64x64xf32>
    %112 = arith.subf %108, %111 : vector<64x64xf32>
    %113 = arith.addf %110, %109 : vector<64x64xf32>
    %cst_31 = arith.constant 0.000000e+00 : f32
    %114 = vector.broadcast %cst_31 : f32 to vector<64x64xf32>
    %115 = arith.subf %114, %113 : vector<64x64xf32>
    %116 = tpu.concatenate %112, %115 in 0 : vector<64x64xf32>, vector<64x64xf32> -> vector<128x64xf32>
    %cst_32 = arith.constant dense<0.000000e+00> : vector<32x64xf32>
    %117 = tpu.matmul %4, %116, %cst_32 {dimension_numbers = #tpu.dot_dimension_numbers<[1], [0], [0], [1], [0, 0, 1, 1], [], []>} : vector<32x128xf32>, vector<128x64xf32>, vector<32x64xf32> -> vector<32x64xf32>
    %118 = vector.extract_strided_slice %117 {offsets = [0, 0], sizes = [16, 64], strides = [1, 1]} : vector<32x64xf32> to vector<16x64xf32>
    %119 = vector.extract_strided_slice %117 {offsets = [16, 0], sizes = [16, 64], strides = [1, 1]} : vector<32x64xf32> to vector<16x64xf32>
    %120 = tpu.concatenate %118, %119 in 1 : vector<16x64xf32>, vector<16x64xf32> -> vector<16x128xf32>
    %121 = vector.extract_strided_slice %8 {offsets = [7, 0, 0], sizes = [1, 16, 128], strides = [1, 1, 1]} : vector<8x16x128xf32> to vector<1x16x128xf32>
    %122 = vector.shape_cast %121 : vector<1x16x128xf32> to vector<16x128xf32>
    %cst_33 = arith.constant dense<0.000000e+00> : vector<128x128xf32>
    %123 = tpu.matmul %3, %122, %cst_33 {dimension_numbers = #tpu.dot_dimension_numbers<[1], [0], [0], [1], [0, 0, 1, 1], [], []>} : vector<128x16xf32>, vector<16x128xf32>, vector<128x128xf32> -> vector<128x128xf32>
    %124 = vector.extract_strided_slice %123 {offsets = [0, 0], sizes = [64, 64], strides = [1, 1]} : vector<128x128xf32> to vector<64x64xf32>
    %125 = vector.extract_strided_slice %123 {offsets = [0, 64], sizes = [64, 64], strides = [1, 1]} : vector<128x128xf32> to vector<64x64xf32>
    %126 = vector.extract_strided_slice %123 {offsets = [64, 0], sizes = [64, 64], strides = [1, 1]} : vector<128x128xf32> to vector<64x64xf32>
    %127 = vector.extract_strided_slice %123 {offsets = [64, 64], sizes = [64, 64], strides = [1, 1]} : vector<128x128xf32> to vector<64x64xf32>
    %128 = arith.subf %124, %127 : vector<64x64xf32>
    %129 = arith.addf %126, %125 : vector<64x64xf32>
    %cst_34 = arith.constant 0.000000e+00 : f32
    %130 = vector.broadcast %cst_34 : f32 to vector<64x64xf32>
    %131 = arith.subf %130, %129 : vector<64x64xf32>
    %132 = tpu.concatenate %128, %131 in 0 : vector<64x64xf32>, vector<64x64xf32> -> vector<128x64xf32>
    %cst_35 = arith.constant dense<0.000000e+00> : vector<32x64xf32>
    %133 = tpu.matmul %4, %132, %cst_35 {dimension_numbers = #tpu.dot_dimension_numbers<[1], [0], [0], [1], [0, 0, 1, 1], [], []>} : vector<32x128xf32>, vector<128x64xf32>, vector<32x64xf32> -> vector<32x64xf32>
    %134 = vector.extract_strided_slice %133 {offsets = [0, 0], sizes = [16, 64], strides = [1, 1]} : vector<32x64xf32> to vector<16x64xf32>
    %135 = vector.extract_strided_slice %133 {offsets = [16, 0], sizes = [16, 64], strides = [1, 1]} : vector<32x64xf32> to vector<16x64xf32>
    %136 = tpu.concatenate %134, %135 in 1 : vector<16x64xf32>, vector<16x64xf32> -> vector<16x128xf32>
    %137 = tpu.concatenate %24, %40, %56, %72, %88, %104, %120, %136 in 0 : vector<16x128xf32>, vector<16x128xf32>, vector<16x128xf32>, vector<16x128xf32>, vector<16x128xf32>, vector<16x128xf32>, vector<16x128xf32>, vector<16x128xf32> -> vector<128x128xf32>
    %cst_36 = arith.constant dense<0.000000e+00> : vector<128x16xf32>
    %138 = tpu.matmul %137, %5, %cst_36 {dimension_numbers = #tpu.dot_dimension_numbers<[1], [0], [0], [1], [0, 0, 1, 1], [], []>} : vector<128x128xf32>, vector<128x16xf32>, vector<128x16xf32> -> vector<128x16xf32>
    %cst_37 = arith.constant dense<0.000000e+00> : vector<128x16xf32>
    %139 = tpu.matmul %137, %6, %cst_37 {dimension_numbers = #tpu.dot_dimension_numbers<[1], [0], [0], [1], [0, 0, 1, 1], [], []>} : vector<128x128xf32>, vector<128x16xf32>, vector<128x16xf32> -> vector<128x16xf32>
    %140 = arith.subf %1, %138 : vector<128x16xf32>
    %141 = arith.mulf %140, %140 : vector<128x16xf32>
    %142 = arith.mulf %139, %139 : vector<128x16xf32>
    %143 = arith.addf %141, %142 : vector<128x16xf32>
    %144 = math.sqrt %143 : vector<128x16xf32>
    %145 = vector.shape_cast %144 : vector<128x16xf32> to vector<8x16x16xf32>
    %c0_38 = arith.constant 0 : index
    %c0_39 = arith.constant 0 : index
    %c0_40 = arith.constant 0 : index
    %146 = vector.load %arg7[%c0_38, %c0_39, %c0_40] : memref<8x16x16xf32, #tpu.memory_space<vmem>>, vector<8x16x16xf32>
    tpu.vector_store %arg7[%c0_38, %c0_39, %c0_40], %145 {strides = array<i32>} : memref<8x16x16xf32, #tpu.memory_space<vmem>>, vector<8x16x16xf32>,
    return
  }
  func.func @transform_0(%arg0: i32) -> (i32, i32, i32) {
    %c0_i32 = arith.constant 0 : i32
    %c0_i32_0 = arith.constant 0 : i32
    %c0_i32_1 = arith.constant 0 : i32
    return %arg0, %c0_i32, %c0_i32_0 : i32, i32, i32
  }
  func.func @transform_1(%arg0: i32) -> (i32, i32) {
    %c0_i32 = arith.constant 0 : i32
    %c0_i32_0 = arith.constant 0 : i32
    %c0_i32_1 = arith.constant 0 : i32
    return %c0_i32, %c0_i32_0 : i32, i32
  }
  func.func @transform_2(%arg0: i32) -> (i32, i32) {
    %c0_i32 = arith.constant 0 : i32
    %c0_i32_0 = arith.constant 0 : i32
    %c0_i32_1 = arith.constant 0 : i32
    return %c0_i32, %c0_i32_0 : i32, i32
  }
  func.func @transform_3(%arg0: i32) -> (i32, i32) {
    %c0_i32 = arith.constant 0 : i32
    %c0_i32_0 = arith.constant 0 : i32
    %c0_i32_1 = arith.constant 0 : i32
    return %c0_i32, %c0_i32_0 : i32, i32
  }
  func.func @transform_4(%arg0: i32) -> (i32, i32) {
    %c0_i32 = arith.constant 0 : i32
    %c0_i32_0 = arith.constant 0 : i32
    %c0_i32_1 = arith.constant 0 : i32
    return %c0_i32, %c0_i32_0 : i32, i32
  }
  func.func @transform_5(%arg0: i32) -> (i32, i32) {
    %c0_i32 = arith.constant 0 : i32
    %c0_i32_0 = arith.constant 0 : i32
    %c0_i32_1 = arith.constant 0 : i32
    return %c0_i32, %c0_i32_0 : i32, i32
  }
  func.func @transform_6(%arg0: i32) -> (i32, i32, i32) {
    %c0_i32 = arith.constant 0 : i32
    %c0_i32_0 = arith.constant 0 : i32
    %c0_i32_1 = arith.constant 0 : i32
    return %arg0, %c0_i32, %c0_i32_0 : i32, i32, i32
  }
}

</mosaic_0001>

<bundles_post_ra>
// kernel: tpu_custom_call.1
= control target key start
LH: loop header
LB: loop body
LE: loop exit
PB: predicated region body
PF: predicated region fallthrough
CT: control target
= control target key end

     0   :  { %11 = vsyncpa [#allocation3], 0  ;;  %s6613_s0 = inlined_call_operand.hbm [shape: f32[8,16,16], index: 0, kind: input, shape index: {}]   ;;  %s6614_s1 = inlined_call_operand.hbm [shape: f32[16,128], index: 1, kind: input, shape index: {}]   ;;  %s6615_s2 = inlined_call_operand.hbm [shape: f32[128,16], index: 2, kind: input, shape index: {}]   ;;  %s6616_s3 = inlined_call_operand.hbm [shape: f32[32,128], index: 3, kind: input, shape index: {}]   ;;  %s6617_s4 = inlined_call_operand.hbm [shape: f32[128,16], index: 4, kind: input, shape index: {}]   ;;  %s6618_s5 = inlined_call_operand.hbm [shape: f32[128,16], index: 5, kind: input, shape index: {}]   ;;  %s6619_s6 = inlined_call_operand.hbm [shape: f32[8,16,16], index: 6, kind: output, shape index: {}]  }
   0x1   :  { %12 = vsyncpa [#allocation6], 0 }
   0x2   :  { %13 = vsyncpa [#allocation9], 0 }
   0x3   :  { %14 = vsyncpa [#allocation12], 0 }
   0x4   :  { %15 = vsyncpa [#allocation4], 0  ;;  %s5365_s21 = smov [#allocation5]   ;;  %s5366_s23 = smov [#allocation8]  }
   0x5   :  { %s33_s22 = sshll.u32 %s5365_s21, 4  ;;  %s57_s24 = sshll.u32 %s5366_s23, 4  ;;  %s34_s22 = int_to_ptr.vmem [resolvable:$true] %s33_s22  ;;  %s5410_s24 = int_to_ptr.vmem [resolvable:$true] %s57_s24 }
   0x6   :  { %s5201_s27 = scalar_lea.hbm %s6614_s1, 256 }
   0x7   :  { %p5202_p0 = scmp.ne.s32.totalorder %s6614_s1, %s5201_s27  ;;  %p5205_p1 = scmp.lt.u32.totalorder %s5201_s27, %s6614_s1 }
   0x9   :  { %p5207_p2 = pnand %p5205_p1, %p5202_p0 }
   0xb   :  { %5210 = shalt.err (!%p5207_p2)
}
   0xc   :  { %s5211_s8 = scalar_lea.vmem %s34_s22, 256  ;;  %p5216_p4 = scmp.lt.s32.totalorder %s34_s22, %s34_s22 }
   0xd   :  { %p5212_p3 = scmp.ne.s32.totalorder %s34_s22, %s5211_s8  ;;  %p5217_p5 = scmp.lt.s32.totalorder %s5211_s8, %s5211_s8 }
   0xf   :  { %p5218_p6 = por %p5217_p5, %p5216_p4 }
  0x11   :  { %p5219_p7 = pnand %p5218_p6, %p5212_p3 }
  0x13   :  { %5222 = shalt.err (!%p5219_p7)
}
  0x14   :  { %s5367_s9 = smov 128   ;;  %s5368_s10 = smov 8  }
  0x15   :  { %39 = dma.hbm_to_vmem [thread:$0]  %s6614_s1, 256, %s34_s22, [#allocation6], %s5367_s9, %s5367_s9, %s5368_s10  }
  0x16   :  { %s5223_s15 = scalar_lea.hbm %s6616_s3, 512 }
  0x17   :  { %p5224_p8 = scmp.ne.s32.totalorder %s6616_s3, %s5223_s15  ;;  %p5227_p9 = scmp.lt.u32.totalorder %s5223_s15, %s6616_s3 }
  0x19   :  { %p5229_p10 = pnand %p5227_p9, %p5224_p8 }
  0x1b   :  { %5232 = shalt.err (!%p5229_p10)
}
  0x1c   :  { %s5233_s20 = scalar_lea.vmem %s5410_s24, 512  ;;  %p5238_p12 = scmp.lt.s32.totalorder %s5410_s24, %s5410_s24 }
  0x1d   :  { %p5234_p11 = scmp.ne.s32.totalorder %s5410_s24, %s5233_s20  ;;  %p5239_p13 = scmp.lt.s32.totalorder %s5233_s20, %s5233_s20 }
  0x1f   :  { %p5240_p0 = por %p5239_p13, %p5238_p12 }
  0x21   :  { %p5241_p1 = pnand %p5240_p0, %p5234_p11 }
  0x23   :  { %5244 = shalt.err (!%p5241_p1)
}
  0x24   :  { %63 = dma.hbm_to_vmem [thread:$0]  %s6616_s3, 512, %s5410_s24, [#allocation9], %s5367_s9, %s5367_s9, %s5368_s10  }
  0x25   :  { %s5369_s22 = smov [#allocation2]   ;;  %s5370_s25 = smov [#allocation7]  }
  0x26   :  { %s21_s23 = sshll.u32 %s5369_s22, 4  ;;  %s45_s26 = sshll.u32 %s5370_s25, 4  ;;  %s22_s23 = int_to_ptr.vmem [resolvable:$true] %s21_s23  ;;  %s5447_s26 = int_to_ptr.vmem [resolvable:$true] %s45_s26 }
  0x27   :  { %s5245_s29 = scalar_lea.hbm %s6613_s0, 2048 }
  0x28   :  { %p5246_p2 = scmp.ne.s32.totalorder %s6613_s0, %s5245_s29  ;;  %p5249_p3 = scmp.lt.u32.totalorder %s5245_s29, %s6613_s0 }
  0x2a   :  { %p5251_p4 = pnand %p5249_p3, %p5246_p2 }
  0x2c   :  { %5254 = shalt.err (!%p5251_p4)
}
  0x2d   :  { %s5255_s3 = scalar_lea.vmem %s22_s23, 2048  ;;  %p5260_p6 = scmp.lt.s32.totalorder %s22_s23, %s22_s23 }
  0x2e   :  { %p5256_p5 = scmp.ne.s32.totalorder %s22_s23, %s5255_s3  ;;  %p5261_p7 = scmp.lt.s32.totalorder %s5255_s3, %s5255_s3 }
  0x30   :  { %p5262_p8 = por %p5261_p7, %p5260_p6 }
  0x32   :  { %p5263_p9 = pnand %p5262_p8, %p5256_p5 }
  0x34   :  { %5266 = shalt.err (!%p5263_p9)
}
  0x35   :  { %27 = dma.hbm_to_vmem [thread:$0]  %s6613_s0, 2048, %s22_s23, [#allocation3], %s5367_s9, %s5367_s9, %s5368_s10  }
  0x36   :  { %s5267_s15 = scalar_lea.hbm %s6615_s2, 2048 }
  0x37   :  { %p5268_p10 = scmp.ne.s32.totalorder %s6615_s2, %s5267_s15  ;;  %p5271_p11 = scmp.lt.u32.totalorder %s5267_s15, %s6615_s2 }
  0x39   :  { %p5273_p12 = pnand %p5271_p11, %p5268_p10 }
  0x3b   :  { %5276 = shalt.err (!%p5273_p12)
}
  0x3c   :  { %s5277_s20 = scalar_lea.vmem %s5447_s26, 2048  ;;  %p5282_p0 = scmp.lt.s32.totalorder %s5447_s26, %s5447_s26 }
  0x3d   :  { %p5278_p13 = scmp.ne.s32.totalorder %s5447_s26, %s5277_s20  ;;  %p5283_p1 = scmp.lt.s32.totalorder %s5277_s20, %s5277_s20 }
  0x3f   :  { %p5284_p2 = por %p5283_p1, %p5282_p0 }
  0x41   :  { %p5285_p3 = pnand %p5284_p2, %p5278_p13 }
  0x43   :  { %5288 = shalt.err (!%p5285_p3)
}
  0x44   :  { %51 = dma.hbm_to_vmem [thread:$0]  %s6615_s2, 2048, %s5447_s26, [#allocation6], %s5367_s9, %s5367_s9, %s5368_s10  }
  0x45   :  { %s5371_s21 = smov [#allocation10]   ;;  %s5372_s23 = smov [#allocation11]  }
  0x46   :  { %s69_s22 = sshll.u32 %s5371_s21, 4  ;;  %s81_s25 = sshll.u32 %s5372_s23, 4  ;;  %s70_s22 = int_to_ptr.vmem [resolvable:$true] %s69_s22  ;;  %s5484_s25 = int_to_ptr.vmem [resolvable:$true] %s81_s25 }
  0x47   :  { %s5289_s29 = scalar_lea.hbm %s6617_s4, 2048 }
  0x48   :  { %p5290_p4 = scmp.ne.s32.totalorder %s6617_s4, %s5289_s29  ;;  %p5293_p5 = scmp.lt.u32.totalorder %s5289_s29, %s6617_s4 }
  0x4a   :  { %p5295_p6 = pnand %p5293_p5, %p5290_p4 }
  0x4c   :  { %5298 = shalt.err (!%p5295_p6)
}
  0x4d   :  { %s5299_s2 = scalar_lea.vmem %s70_s22, 2048  ;;  %p5304_p8 = scmp.lt.s32.totalorder %s70_s22, %s70_s22 }
  0x4e   :  { %p5300_p7 = scmp.ne.s32.totalorder %s70_s22, %s5299_s2  ;;  %p5305_p9 = scmp.lt.s32.totalorder %s5299_s2, %s5299_s2 }
  0x50   :  { %p5306_p10 = por %p5305_p9, %p5304_p8 }
  0x52   :  { %p5307_p11 = pnand %p5306_p10, %p5300_p7 }
  0x54   :  { %5310 = shalt.err (!%p5307_p11)
}
  0x55   :  { %75 = dma.hbm_to_vmem [thread:$0]  %s6617_s4, 2048, %s70_s22, [#allocation9], %s5367_s9, %s5367_s9, %s5368_s10  }
  0x56   :  { %s5311_s13 = scalar_lea.hbm %s6618_s5, 2048 }
  0x57   :  { %p5312_p12 = scmp.ne.s32.totalorder %s6618_s5, %s5311_s13  ;;  %p5315_p13 = scmp.lt.u32.totalorder %s5311_s13, %s6618_s5 }
  0x59   :  { %p5317_p0 = pnand %p5315_p13, %p5312_p12 }
  0x5b   :  { %5320 = shalt.err (!%p5317_p0)
}
  0x5c   :  { %s5321_s18 = scalar_lea.vmem %s5484_s25, 2048  ;;  %p5326_p2 = scmp.lt.s32.totalorder %s5484_s25, %s5484_s25 }
  0x5d   :  { %p5322_p1 = scmp.ne.s32.totalorder %s5484_s25, %s5321_s18  ;;  %p5327_p3 = scmp.lt.s32.totalorder %s5321_s18, %s5321_s18 }
  0x5f   :  { %p5328_p4 = por %p5327_p3, %p5326_p2 }
  0x61   :  { %p5329_p5 = pnand %p5328_p4, %p5322_p1 }
  0x63   :  { %5332 = shalt.err (!%p5329_p5)
}
  0x64   :  { %87 = dma.hbm_to_vmem [thread:$0]  %s6618_s5, 2048, %s5484_s25, [#allocation12], %s5367_s9, %s5367_s9, %s5368_s10  }
  0x65   :  { %5355 = dma.done.wait [#allocation3], 2048  }
  0x66   :  { %5356 = vsyncadd [#allocation3], 4294965248 }
  0x67   :  { %5357 = dma.done.wait [#allocation6], 2304  }
  0x68   :  { %5358 = vsyncadd [#allocation6], 4294964992 }
  0x69   :  { %5359 = dma.done.wait [#allocation9], 2560  }
  0x6a   :  { %5360 = vsyncadd [#allocation9], 4294964736 }
  0x6b   :  { %5361 = dma.done.wait [#allocation12], 2048  }
  0x6c   :  { %5362 = vsyncadd [#allocation12], 4294965248  ;;  %vm176_vm0 = vcmask 130048   ;;  %v122_v0 = vld [vmem:[#allocation5] sm:$0xff]  ;;  %v123_v1 = vld [vmem:[#allocation5 + $0x8] sm:$0xff]  ;;  %s5373_s5 = smov 64  }
  0x6d   :  { %v106_v2 = vld [vmem:[#allocation2] sm:$0xff]  ;;  %v4743_v3 = vpack.c.bf16 %v123_v1, %v122_v0  ;;  %v107_v4 = vld [vmem:[#allocation2 + $0x8] sm:$0xff]  ;;  %v5523_v5 = vld [vmem:[#allocation7] sm:$0xff]  ;;  %vm744_vm1 = vcmask 523264   ;;  %s5374_s20 = smov [#allocation13]  }
  0x6e   :  { %4079 = vmatprep.mubr.msk.f32.mxu0 %vm176_vm0, %v106_v2  ;;  %4107 = vmatprep.mubr.msk.f32.mxu1 %vm176_vm0, %v5523_v5  ;;  %v108_v6 = vld [vmem:[#allocation2 + $0x10] sm:$0xff]  ;;  %v109_v7 = vld [vmem:[#allocation2 + $0x18] sm:$0xff]  ;;  %v110_v8 = vld [vmem:[#allocation2 + $0x20] sm:$0xff]  ;;  %s3530_s0 = sshll.u32 %s5374_s20, 4  ;;  %s3531_s0 = int_to_ptr.vmem [resolvable:$true] %s3530_s0 }
  0x6f   :  { %4744 = vmatprep.subr.bf16.mxu0 %v4743_v3  ;;  %v111_v9 = vld [vmem:[#allocation2 + $0x28] sm:$0xff]  ;;  %v112_v10 = vld [vmem:[#allocation2 + $0x30] sm:$0xff]  ;;  %v113_v11 = vld [vmem:[#allocation2 + $0x38] sm:$0xff]  ;;  %s5333_s1 = scalar_lea.vmem %s3531_s0, 2048  ;;  %p5338_p7 = scmp.lt.s32.totalorder %s3531_s0, %s3531_s0 }
  0x70   :  { %4746 = vmatpush3.bf16.msra.mxu0 %v4743_v3  ;;  %v5533_v15 = vld [vmem:[#allocation7 + $0x8] sm:$0xff]  ;;  %v5535_v16 = vld [vmem:[#allocation7 + $0x10] sm:$0xff]  ;;  %v5541_v17 = vld [vmem:[#allocation7 + $0x18] sm:$0xff]  ;;  %p5334_p6 = scmp.ne.s32.totalorder %s3531_s0, %s5333_s1  ;;  %p5339_p8 = scmp.lt.s32.totalorder %s5333_s1, %s5333_s1 }
  0x71   :  { %v5543_v18 = vld [vmem:[#allocation7 + $0x20] sm:$0xff]  ;;  %v5549_v19 = vld [vmem:[#allocation7 + $0x28] sm:$0xff]  ;;  %v5551_v20 = vld [vmem:[#allocation7 + $0x30] sm:$0xff] }
  0x72   :  { %v5557_v21 = vld [vmem:[#allocation7 + $0x38] sm:$0xff]  ;;  %v5559_v22 = vld [vmem:[#allocation7 + $0x40] sm:$0xff]  ;;  %v5565_v23 = vld [vmem:[#allocation7 + $0x48] sm:$0xff]  ;;  %p5340_p9 = por %p5339_p8, %p5338_p7 }
  0x73   :  { %4080 = vmatmul.mubr.msk.f32.vlgmr.msra.gmra.mrb[0].mxu0 %vm176_vm0, %v107_v4  ;;  %v5567_v24 = vld [vmem:[#allocation7 + $0x50] sm:$0xff]  ;;  %v5573_v25 = vld [vmem:[#allocation7 + $0x58] sm:$0xff]  ;;  %v5575_v26 = vld [vmem:[#allocation7 + $0x60] sm:$0xff] }
  0x74   :  { %4082 = vmatprep.mubr.msk.f32.mxu0 %vm176_vm0, %v108_v6  ;;  %v5581_v27 = vld [vmem:[#allocation7 + $0x68] sm:$0xff]  ;;  %v5583_v28 = vld [vmem:[#allocation7 + $0x70] sm:$0xff]  ;;  %v5589_v29 = vld [vmem:[#allocation7 + $0x78] sm:$0xff]  ;;  %p5341_p10 = pnand %p5340_p9, %p5334_p6 }
  0x75   :  { %v114_v30 = vld [vmem:[#allocation2 + $0x40] sm:$0xff]  ;;  %v115_v31 = vld [vmem:[#allocation2 + $0x48] sm:$0xff]  ;;  %v116_v32 = vld [vmem:[#allocation2 + $0x50] sm:$0xff] }
  0x76   :  { %v117_v33 = vld [vmem:[#allocation2 + $0x58] sm:$0xff]  ;;  %v118_v34 = vld [vmem:[#allocation2 + $0x60] sm:$0xff]  ;;  %v119_v35 = vld [vmem:[#allocation2 + $0x68] sm:$0xff] }
  0x77   :  { %4083 = vmatmul.mubr.msk.f32.gmra.mrb[2].mxu0 %vm176_vm0, %v109_v7  ;;  %v120_v36 = vld [vmem:[#allocation2 + $0x70] sm:$0xff]  ;;  %v121_v37 = vld [vmem:[#allocation2 + $0x78] sm:$0xff] }
  0x78   :  { %4085 = vmatprep.mubr.msk.f32.mxu0 %vm176_vm0, %v110_v8  ;;  %v5649_v57 = vld [vmem:[#allocation8] sm:$0xff] }
  0x7b   :  { %4086 = vmatmul.mubr.msk.f32.gmra.mrb[4].mxu0 %vm176_vm0, %v111_v9 }
  0x7c   :  { %4088 = vmatprep.mubr.msk.f32.mxu0 %vm176_vm0, %v112_v10 }
  0x7f   :  { %4089 = vmatmul.mubr.msk.f32.gmra.mrb[6].mxu0 %vm176_vm0, %v113_v11 }
  0x80   :  { %4091 = vmatprep.mubr.msk.f32.mxu0 %vm176_vm0, %v114_v30 }
  0x83   :  { %4092 = vmatmul.mubr.msk.f32.gmra.mrb[8].mxu0 %vm176_vm0, %v115_v31 }
  0x84   :  { %4094 = vmatprep.mubr.msk.f32.mxu0 %vm176_vm0, %v116_v32 }
  0x87   :  { %4095 = vmatmul.mubr.msk.f32.gmra.mrb[10].mxu0 %vm176_vm0, %v117_v33 }
  0x88   :  { %4097 = vmatprep.mubr.msk.f32.mxu0 %vm176_vm0, %v118_v34 }
  0x8b   :  { %4098 = vmatmul.mubr.msk.f32.gmra.mrb[12].mxu0 %vm176_vm0, %v119_v35 }
  0x8c   :  { %4100 = vmatprep.mubr.msk.f32.mxu0 %vm176_vm0, %v120_v36 }
  0x8f   :  { %4101 = vmatmul.mubr.msk.f32.gmra.mrb[14].mxu0 %vm176_vm0, %v121_v37 }
  0x90   :  { %4229 = vmatprep.mubr.f32.mxu0 %v5649_v57 }
 0x146   :  { %v4081_v12 = vpop.f32.mrb[0].mxu0 }
 0x147   :  { %v291_v13 = vpop.f32.mrb[1].mxu0 }
 0x148   :  { %v4747_v14 = vpack.c.bf16 %v4081_v12, %v291_v13 }
 0x14a   :  { %4748 = vmatprep.subr.bf16.mxu1 %v4747_v14  ;;  %v4084_v54 = vpop.f32.mrb[2].mxu0 }
 0x14b   :  { %4750 = vmatpush3.bf16.msra.mxu1 %v4747_v14  ;;  %v301_v55 = vpop.f32.mrb[3].mxu0 }
 0x14c   :  { %v5645_v56 = vpack.c.bf16 %v4084_v54, %v301_v55 }
 0x14e   :  { %4108 = vmatmul.mubr.msk.f32.vlgmr.msra.gmra.mrb[0].mxu1 %vm176_vm0, %v5533_v15  ;;  %v4087_v58 = vpop.f32.mrb[4].mxu0 }
 0x14f   :  { %4110 = vmatprep.mubr.msk.f32.mxu1 %vm176_vm0, %v5535_v16  ;;  %v311_v59 = vpop.f32.mrb[5].mxu0 }
 0x150   :  { %v5659_v60 = vpack.c.bf16 %v4087_v58, %v311_v59 }
 0x152   :  { %4111 = vmatmul.mubr.msk.f32.gmra.mrb[2].mxu1 %vm176_vm0, %v5541_v17  ;;  %v4090_v61 = vpop.f32.mrb[6].mxu0 }
 0x153   :  { %4113 = vmatprep.mubr.msk.f32.mxu1 %vm176_vm0, %v5543_v18  ;;  %v321_v62 = vpop.f32.mrb[7].mxu0 }
 0x154   :  { %v5661_v63 = vpack.c.bf16 %v4090_v61, %v321_v62 }
 0x156   :  { %4114 = vmatmul.mubr.msk.f32.gmra.mrb[4].mxu1 %vm176_vm0, %v5549_v19  ;;  %v4093_v0 = vpop.f32.mrb[8].mxu0 }
 0x157   :  { %4116 = vmatprep.mubr.msk.f32.mxu1 %vm176_vm0, %v5551_v20  ;;  %v331_v1 = vpop.f32.mrb[9].mxu0 }
 0x158   :  { %v5663_v2 = vpack.c.bf16 %v4093_v0, %v331_v1 }
 0x15a   :  { %4117 = vmatmul.mubr.msk.f32.gmra.mrb[6].mxu1 %vm176_vm0, %v5557_v21  ;;  %v4096_v30 = vpop.f32.mrb[10].mxu0 }
 0x15b   :  { %4119 = vmatprep.mubr.msk.f32.mxu1 %vm176_vm0, %v5559_v22  ;;  %v341_v32 = vpop.f32.mrb[11].mxu0 }
 0x15c   :  { %v5667_v36 = vpack.c.bf16 %v4096_v30, %v341_v32  ;;  %v5682_v30 = vld [vmem:[#allocation8 + $0x10] sm:$0xff] }
 0x15e   :  { %4120 = vmatmul.mubr.msk.f32.gmra.mrb[8].mxu1 %vm176_vm0, %v5565_v23 }
 0x15f   :  { %4122 = vmatprep.mubr.msk.f32.mxu1 %vm176_vm0, %v5567_v24 }
 0x162   :  { %4123 = vmatmul.mubr.msk.f32.gmra.mrb[10].mxu1 %vm176_vm0, %v5573_v25 }
 0x163   :  { %4125 = vmatprep.mubr.msk.f32.mxu1 %vm176_vm0, %v5575_v26 }
 0x166   :  { %4126 = vmatmul.mubr.msk.f32.gmra.mrb[12].mxu1 %vm176_vm0, %v5581_v27 }
 0x167   :  { %4128 = vmatprep.mubr.msk.f32.mxu1 %vm176_vm0, %v5583_v28 }
 0x16a   :  { %4129 = vmatmul.mubr.msk.f32.gmra.mrb[14].mxu1 %vm176_vm0, %v5589_v29 }
 0x16b   :  { %4163 = vmatprep.mubr.f32.mxu1 %v5649_v57 }
 0x221   :  { %v4109_v38 = vpop.f32.mrb[0].mxu1 }
 0x222   :  { %v484_v39 = vpop.f32.mrb[1].mxu1 }
 0x225   :  { %v4112_v40 = vpop.f32.mrb[2].mxu1 }
 0x226   :  { %v494_v41 = vpop.f32.mrb[3].mxu1 }
 0x229   :  { %v5601_v42 = vpop.f32.mrb[4].mxu1 }
 0x22a   :  { %v5603_v43 = vpop.f32.mrb[5].mxu1 }
 0x22d   :  { %v5605_v44 = vpop.f32.mrb[6].mxu1 }
 0x22e   :  { %v5607_v45 = vpop.f32.mrb[7].mxu1 }
 0x231   :  { %v5609_v46 = vpop.f32.mrb[8].mxu1 }
 0x232   :  { %v5611_v47 = vpop.f32.mrb[9].mxu1 }
 0x233   :  { %571 = vrot.lane.b32.xlu0 %v5611_v47, %s5373_s5 }
 0x235   :  { %v5615_v48 = vpop.f32.mrb[10].mxu1 }
 0x236   :  { %577 = vrot.lane.b32.xlu1 %v5615_v48, %s5373_s5  ;;  %v5619_v49 = vpop.f32.mrb[11].mxu1 }
 0x237   :  { %573 = vrot.lane.b32.xlu0 %v5609_v46, %s5373_s5 }
 0x239   :  { %v5623_v50 = vpop.f32.mrb[12].mxu1 }
 0x23a   :  { %575 = vrot.lane.b32.xlu1 %v5619_v49, %s5373_s5  ;;  %v5627_v51 = vpop.f32.mrb[13].mxu1 }
 0x23b   :  { %579 = vrot.lane.b32.xlu0 %v5627_v51, %s5373_s5 }
 0x23d   :  { %v5631_v52 = vpop.f32.mrb[14].mxu1 }
 0x23e   :  { %581 = vrot.lane.b32.xlu1 %v5623_v50, %s5373_s5  ;;  %v5635_v53 = vpop.f32.mrb[15].mxu1 }
 0x23f   :  { %583 = vrot.lane.b32.xlu0 %v5635_v53, %s5373_s5 }
 0x242   :  { %585 = vrot.lane.b32.xlu1 %v5631_v52, %s5373_s5 }
 0x243   :  { %611 = vrot.lane.b32.xlu0 %v484_v39, %s5373_s5 }
 0x246   :  { %613 = vrot.lane.b32.xlu1 %v4109_v38, %s5373_s5 }
 0x247   :  { %615 = vrot.lane.b32.xlu0 %v494_v41, %s5373_s5 }
 0x24a   :  { %617 = vrot.lane.b32.xlu1 %v4112_v40, %s5373_s5 }
 0x24b   :  { %619 = vrot.lane.b32.xlu0 %v5603_v43, %s5373_s5 }
 0x24e   :  { %621 = vrot.lane.b32.xlu1 %v5601_v42, %s5373_s5 }
 0x24f   :  { %623 = vrot.lane.b32.xlu0 %v5607_v45, %s5373_s5 }
 0x252   :  { %625 = vrot.lane.b32.xlu1 %v5605_v44, %s5373_s5 }
 0x2a5   :  { %v572_v3 = vpop.permute.xlu0 %571 }
 0x2a6   :  { %v595_v7 = vsub.f32 %v484_v39, %v572_v3 }
 0x2a8   :  { %v578_v4 = vpop.permute.xlu1 %577 }
 0x2a9   :  { %v574_v6 = vpop.permute.xlu0 %573  ;;  %v598_v11 = vsub.f32 %v4112_v40, %v578_v4 }
 0x2aa   :  { %v596_v8 = vsub.f32 %v4109_v38, %v574_v6 }
 0x2ac   :  { %v4751_v9 = vpack.c.bf16 %v596_v8, %v595_v7  ;;  %v576_v10 = vpop.permute.xlu1 %575 }
 0x2ad   :  { %v597_v12 = vsub.f32 %v494_v41, %v576_v10  ;;  %v580_v13 = vpop.permute.xlu0 %579 }
 0x2ae   :  { %4752 = vmatprep.subr.bf16.mxu1 %v4751_v9  ;;  %v599_v33 = vsub.f32 %v5603_v43, %v580_v13 }
 0x2af   :  { %v4755_v14 = vpack.c.bf16 %v598_v11, %v597_v12  ;;  %4754 = vmatpush3.bf16.msra.mxu1 %v4751_v9 }
 0x2b0   :  { %v582_v31 = vpop.permute.xlu1 %581 }
 0x2b1   :  { %v600_v34 = vsub.f32 %v5601_v42, %v582_v31  ;;  %4756 = vmatprep.subr.bf16.mxu1 %v4755_v14  ;;  %v584_v35 = vpop.permute.xlu0 %583 }
 0x2b2   :  { %v601_v39 = vsub.f32 %v5607_v45, %v584_v35 }
 0x2b3   :  { %v4759_v37 = vpack.c.bf16 %v600_v34, %v599_v33  ;;  %4758 = vmatpush3.bf16.msra.mxu1 %v4755_v14 }
 0x2b4   :  { %v586_v38 = vpop.permute.xlu1 %585 }
 0x2b5   :  { %v602_v40 = vsub.f32 %v5605_v44, %v586_v38  ;;  %4760 = vmatprep.subr.bf16.mxu1 %v4759_v37  ;;  %v612_v41 = vpop.permute.xlu0 %611 }
 0x2b6   :  { %v635_v55 = vadd.f32 %v612_v41, %v5611_v47 }
 0x2b7   :  { %v4763_v54 = vpack.c.bf16 %v602_v40, %v601_v39  ;;  %4762 = vmatpush3.bf16.msra.mxu1 %v4759_v37 }
 0x2b8   :  { %v614_v43 = vpop.permute.xlu1 %613  ;;  %v643_v59 = vsub.f32 0.0, %v635_v55 }
 0x2b9   :  { %v636_v42 = vadd.f32 %v5609_v46, %v614_v43  ;;  %4764 = vmatprep.subr.bf16.mxu1 %v4763_v54  ;;  %v616_v58 = vpop.permute.xlu0 %615 }
 0x2ba   :  { %v637_v62 = vadd.f32 %v616_v58, %v5619_v49 }
 0x2bb   :  { %v644_v61 = vsub.f32 0.0, %v636_v42  ;;  %4766 = vmatpush3.bf16.msra.mxu1 %v4763_v54 }
 0x2bc   :  { %v618_v0 = vpop.permute.xlu1 %617  ;;  %v645_v3 = vsub.f32 0.0, %v637_v62 }
 0x2bd   :  { %v638_v45 = vadd.f32 %v5615_v48, %v618_v0  ;;  %v620_v44 = vpop.permute.xlu0 %619  ;;  %v4767_v1 = vpack.c.bf16 %v644_v61, %v643_v59 }
 0x2be   :  { %v639_v47 = vadd.f32 %v620_v44, %v5627_v51 }
 0x2bf   :  { %v646_v4 = vsub.f32 0.0, %v638_v45  ;;  %4768 = vmatprep.subr.bf16.mxu1 %v4767_v1 }
 0x2c0   :  { %v622_v6 = vpop.permute.xlu1 %621  ;;  %4770 = vmatpush3.bf16.msra.mxu1 %v4767_v1  ;;  %v647_v9 = vsub.f32 0.0, %v639_v47 }
 0x2c1   :  { %v640_v46 = vadd.f32 %v5623_v50, %v622_v6  ;;  %v624_v7 = vpop.permute.xlu0 %623  ;;  %v4771_v8 = vpack.c.bf16 %v646_v4, %v645_v3  ;;  %v5679_v50 = vld [vmem:[#allocation8 + $0x8] sm:$0xff] }
 0x2c2   :  { %v641_v49 = vadd.f32 %v624_v7, %v5635_v53  ;;  %v4099_v53 = vpop.f32.mrb[12].mxu0 }
 0x2c3   :  { %v648_v10 = vsub.f32 0.0, %v640_v46  ;;  %4772 = vmatprep.subr.bf16.mxu1 %v4771_v8  ;;  %v351_v31 = vpop.f32.mrb[13].mxu0 }
 0x2c4   :  { %v626_v11 = vpop.permute.xlu1 %625  ;;  %4774 = vmatpush3.bf16.msra.mxu1 %v4771_v8  ;;  %v649_v13 = vsub.f32 0.0, %v641_v49  ;;  %v5690_v32 = vpack.c.bf16 %v4099_v53, %v351_v31 }
 0x2c5   :  { %v642_v48 = vadd.f32 %v5631_v52, %v626_v11  ;;  %v4775_v12 = vpack.c.bf16 %v648_v10, %v647_v9  ;;  %v5687_v52 = vld [vmem:[#allocation8 + $0x18] sm:$0xff] }
 0x2c7   :  { %v650_v14 = vsub.f32 0.0, %v642_v48  ;;  %4776 = vmatprep.subr.bf16.mxu1 %v4775_v12 }
 0x2c8   :  { %4778 = vmatpush3.bf16.msra.mxu1 %v4775_v12 }
 0x2c9   :  { %v4779_v51 = vpack.c.bf16 %v650_v14, %v649_v13 }
 0x2cb   :  { %4780 = vmatprep.subr.bf16.mxu1 %v4779_v51 }
 0x2cc   :  { %4782 = vmatpush3.bf16.msra.mxu1 %v4779_v51 }
 0x2cd   :  { %4784 = vmatprep.subr.bf16.mxu1 %v5645_v56 }
 0x2cf   :  { %4164 = vmatmul.mubr.f32.vlgmr.msra.gmra.mrb[16].mxu1 %v5679_v50 }
 0x2d0   :  { %4786 = vmatpush3.bf16.msra.mxu1 %v5645_v56  ;;  %4166 = vmatprep.mubr.f32.mxu1 %v5682_v30  ;;  %v4102_v56 = vpop.f32.mrb[14].mxu0 }
 0x2d1   :  { %4820 = vmatprep.subr.bf16.mxu1 %v5659_v60 }
 0x2d3   :  { %4167 = vmatmul.mubr.f32.gmra.mrb[18].mxu1 %v5687_v52 }
 0x2d4   :  { %4173 = vmatprep.mubr.msk.f32.mxu1 %vm176_vm0, %v5523_v5 }
 0x2d7   :  { %4174 = vmatmul.mubr.msk.f32.vlgmr.msra.gmra.mrb[20].mxu1 %vm176_vm0, %v5533_v15 }
 0x2d8   :  { %4822 = vmatpush3.bf16.msra.mxu1 %v5659_v60  ;;  %4176 = vmatprep.mubr.msk.f32.mxu1 %vm176_vm0, %v5535_v16  ;;  %v361_v60 = vpop.f32.mrb[15].mxu0 }
 0x2d9   :  { %4856 = vmatprep.subr.bf16.mxu1 %v5661_v63  ;;  %v5725_v33 = vpack.c.bf16 %v4102_v56, %v361_v60 }
 0x2db   :  { %4177 = vmatmul.mubr.msk.f32.gmra.mrb[22].mxu1 %vm176_vm0, %v5541_v17 }
 0x2dc   :  { %4179 = vmatprep.mubr.msk.f32.mxu1 %vm176_vm0, %v5543_v18 }
 0x2df   :  { %4180 = vmatmul.mubr.msk.f32.gmra.mrb[24].mxu1 %vm176_vm0, %v5549_v19 }
 0x2e0   :  { %4182 = vmatprep.mubr.msk.f32.mxu1 %vm176_vm0, %v5551_v20 }
 0x2e3   :  { %4183 = vmatmul.mubr.msk.f32.gmra.mrb[26].mxu1 %vm176_vm0, %v5557_v21 }
 0x2e4   :  { %4185 = vmatprep.mubr.msk.f32.mxu1 %vm176_vm0, %v5559_v22 }
 0x2e7   :  { %4186 = vmatmul.mubr.msk.f32.gmra.mrb[28].mxu1 %vm176_vm0, %v5565_v23 }
 0x2e8   :  { %4188 = vmatprep.mubr.msk.f32.mxu1 %vm176_vm0, %v5567_v24 }
 0x2eb   :  { %4189 = vmatmul.mubr.msk.f32.gmra.mrb[30].mxu1 %vm176_vm0, %v5573_v25 }
 0x2ec   :  { %4191 = vmatprep.mubr.msk.f32.mxu1 %vm176_vm0, %v5575_v26 }
 0x2ef   :  { %4192 = vmatmul.mubr.msk.f32.gmra.mrb[32].mxu1 %vm176_vm0, %v5581_v27 }
 0x2f0   :  { %4194 = vmatprep.mubr.msk.f32.mxu1 %vm176_vm0, %v5583_v28 }
 0x2f3   :  { %4195 = vmatmul.mubr.msk.f32.gmra.mrb[34].mxu1 %vm176_vm0, %v5589_v29 }
 0x2f4   :  { %4239 = vmatprep.mubr.msk.f32.mxu1 %vm176_vm0, %v5523_v5 }
 0x2f7   :  { %4240 = vmatmul.mubr.msk.f32.vlgmr.msra.gmra.mrb[36].mxu1 %vm176_vm0, %v5533_v15 }
 0x2f8   :  { %4858 = vmatpush3.bf16.msra.mxu1 %v5661_v63  ;;  %4242 = vmatprep.mubr.msk.f32.mxu1 %vm176_vm0, %v5535_v16 }
 0x2f9   :  { %4892 = vmatprep.subr.bf16.mxu1 %v5663_v2 }
 0x2fb   :  { %4243 = vmatmul.mubr.msk.f32.gmra.mrb[38].mxu1 %vm176_vm0, %v5541_v17 }
 0x2fc   :  { %4245 = vmatprep.mubr.msk.f32.mxu1 %vm176_vm0, %v5543_v18 }
 0x2ff   :  { %4246 = vmatmul.mubr.msk.f32.gmra.mrb[40].mxu1 %vm176_vm0, %v5549_v19 }
 0x300   :  { %4248 = vmatprep.mubr.msk.f32.mxu1 %vm176_vm0, %v5551_v20 }
 0x303   :  { %4249 = vmatmul.mubr.msk.f32.gmra.mrb[42].mxu1 %vm176_vm0, %v5557_v21 }
 0x304   :  { %4251 = vmatprep.mubr.msk.f32.mxu1 %vm176_vm0, %v5559_v22 }
 0x307   :  { %4252 = vmatmul.mubr.msk.f32.gmra.mrb[44].mxu1 %vm176_vm0, %v5565_v23 }
 0x308   :  { %4254 = vmatprep.mubr.msk.f32.mxu1 %vm176_vm0, %v5567_v24 }
 0x30b   :  { %4255 = vmatmul.mubr.msk.f32.gmra.mrb[46].mxu1 %vm176_vm0, %v5573_v25 }
 0x30c   :  { %4257 = vmatprep.mubr.msk.f32.mxu1 %vm176_vm0, %v5575_v26 }
 0x30f   :  { %4258 = vmatmul.mubr.msk.f32.gmra.mrb[48].mxu1 %vm176_vm0, %v5581_v27 }
 0x310   :  { %4260 = vmatprep.mubr.msk.f32.mxu1 %vm176_vm0, %v5583_v28 }
 0x313   :  { %4261 = vmatmul.mubr.msk.f32.gmra.mrb[50].mxu1 %vm176_vm0, %v5589_v29 }
 0x314   :  { %4305 = vmatprep.mubr.msk.f32.mxu1 %vm176_vm0, %v5523_v5 }
 0x317   :  { %4306 = vmatmul.mubr.msk.f32.vlgmr.msra.gmra.mrb[52].mxu1 %vm176_vm0, %v5533_v15 }
 0x318   :  { %4894 = vmatpush3.bf16.msra.mxu1 %v5663_v2  ;;  %4308 = vmatprep.mubr.msk.f32.mxu1 %vm176_vm0, %v5535_v16 }
 0x319   :  { %4928 = vmatprep.subr.bf16.mxu1 %v5667_v36 }
 0x31b   :  { %4309 = vmatmul.mubr.msk.f32.gmra.mrb[54].mxu1 %vm176_vm0, %v5541_v17 }
 0x31c   :  { %4311 = vmatprep.mubr.msk.f32.mxu1 %vm176_vm0, %v5543_v18 }
 0x31f   :  { %4312 = vmatmul.mubr.msk.f32.gmra.mrb[56].mxu1 %vm176_vm0, %v5549_v19 }
 0x320   :  { %4314 = vmatprep.mubr.msk.f32.mxu1 %vm176_vm0, %v5551_v20 }
 0x323   :  { %4315 = vmatmul.mubr.msk.f32.gmra.mrb[58].mxu1 %vm176_vm0, %v5557_v21 }
 0x324   :  { %4317 = vmatprep.mubr.msk.f32.mxu1 %vm176_vm0, %v5559_v22 }
 0x327   :  { %4318 = vmatmul.mubr.msk.f32.gmra.mrb[60].mxu1 %vm176_vm0, %v5565_v23 }
 0x328   :  { %4320 = vmatprep.mubr.msk.f32.mxu1 %vm176_vm0, %v5567_v24 }
 0x32b   :  { %4321 = vmatmul.mubr.msk.f32.gmra.mrb[62].mxu1 %vm176_vm0, %v5573_v25 }
 0x32c   :  { %4323 = vmatprep.mubr.msk.f32.mxu1 %vm176_vm0, %v5575_v26 }
 0x32f   :  { %4324 = vmatmul.mubr.msk.f32.gmra.mrb[64].mxu1 %vm176_vm0, %v5581_v27 }
 0x330   :  { %4326 = vmatprep.mubr.msk.f32.mxu1 %vm176_vm0, %v5583_v28 }
 0x333   :  { %4327 = vmatmul.mubr.msk.f32.gmra.mrb[66].mxu1 %vm176_vm0, %v5589_v29 }
 0x334   :  { %4371 = vmatprep.mubr.msk.f32.mxu1 %vm176_vm0, %v5523_v5 }
 0x337   :  { %4372 = vmatmul.mubr.msk.f32.vlgmr.msra.gmra.mrb[68].mxu1 %vm176_vm0, %v5533_v15 }
 0x338   :  { %4930 = vmatpush3.bf16.msra.mxu1 %v5667_v36  ;;  %4374 = vmatprep.mubr.msk.f32.mxu1 %vm176_vm0, %v5535_v16 }
 0x339   :  { %4964 = vmatprep.subr.bf16.mxu1 %v5690_v32 }
 0x33b   :  { %4375 = vmatmul.mubr.msk.f32.gmra.mrb[70].mxu1 %vm176_vm0, %v5541_v17 }
 0x33c   :  { %4377 = vmatprep.mubr.msk.f32.mxu1 %vm176_vm0, %v5543_v18 }
 0x33f   :  { %4378 = vmatmul.mubr.msk.f32.gmra.mrb[72].mxu1 %vm176_vm0, %v5549_v19 }
 0x340   :  { %4380 = vmatprep.mubr.msk.f32.mxu1 %vm176_vm0, %v5551_v20 }
 0x343   :  { %4381 = vmatmul.mubr.msk.f32.gmra.mrb[74].mxu1 %vm176_vm0, %v5557_v21 }
 0x344   :  { %4383 = vmatprep.mubr.msk.f32.mxu1 %vm176_vm0, %v5559_v22 }
 0x347   :  { %4384 = vmatmul.mubr.msk.f32.gmra.mrb[76].mxu1 %vm176_vm0, %v5565_v23 }
 0x348   :  { %4386 = vmatprep.mubr.msk.f32.mxu1 %vm176_vm0, %v5567_v24 }
 0x34b   :  { %4387 = vmatmul.mubr.msk.f32.gmra.mrb[78].mxu1 %vm176_vm0, %v5573_v25 }
 0x34c   :  { %4389 = vmatprep.mubr.msk.f32.mxu1 %vm176_vm0, %v5575_v26 }
 0x34f   :  { %4390 = vmatmul.mubr.msk.f32.gmra.mrb[80].mxu1 %vm176_vm0, %v5581_v27 }
 0x350   :  { %4392 = vmatprep.mubr.msk.f32.mxu1 %vm176_vm0, %v5583_v28 }
 0x353   :  { %4393 = vmatmul.mubr.msk.f32.gmra.mrb[82].mxu1 %vm176_vm0, %v5589_v29 }
 0x354   :  { %4437 = vmatprep.mubr.msk.f32.mxu1 %vm176_vm0, %v5523_v5 }
 0x357   :  { %4438 = vmatmul.mubr.msk.f32.vlgmr.msra.gmra.mrb[84].mxu1 %vm176_vm0, %v5533_v15 }
 0x358   :  { %4966 = vmatpush3.bf16.msra.mxu1 %v5690_v32  ;;  %4440 = vmatprep.mubr.msk.f32.mxu1 %vm176_vm0, %v5535_v16 }
 0x359   :  { %5000 = vmatprep.subr.bf16.mxu1 %v5725_v33 }
 0x35b   :  { %4441 = vmatmul.mubr.msk.f32.gmra.mrb[86].mxu1 %vm176_vm0, %v5541_v17 }
 0x35c   :  { %4443 = vmatprep.mubr.msk.f32.mxu1 %vm176_vm0, %v5543_v18 }
 0x35f   :  { %4444 = vmatmul.mubr.msk.f32.gmra.mrb[88].mxu1 %vm176_vm0, %v5549_v19 }
 0x360   :  { %4446 = vmatprep.mubr.msk.f32.mxu1 %vm176_vm0, %v5551_v20 }
 0x363   :  { %4447 = vmatmul.mubr.msk.f32.gmra.mrb[90].mxu1 %vm176_vm0, %v5557_v21 }
 0x364   :  { %4449 = vmatprep.mubr.msk.f32.mxu1 %vm176_vm0, %v5559_v22 }
 0x367   :  { %4450 = vmatmul.mubr.msk.f32.gmra.mrb[92].mxu1 %vm176_vm0, %v5565_v23 }
 0x368   :  { %4452 = vmatprep.mubr.msk.f32.mxu1 %vm176_vm0, %v5567_v24 }
 0x36b   :  { %4453 = vmatmul.mubr.msk.f32.gmra.mrb[94].mxu1 %vm176_vm0, %v5573_v25 }
 0x36c   :  { %4455 = vmatprep.mubr.msk.f32.mxu1 %vm176_vm0, %v5575_v26 }
 0x36f   :  { %4456 = vmatmul.mubr.msk.f32.gmra.mrb[96].mxu1 %vm176_vm0, %v5581_v27 }
 0x370   :  { %4458 = vmatprep.mubr.msk.f32.mxu1 %vm176_vm0, %v5583_v28 }
 0x373   :  { %4459 = vmatmul.mubr.msk.f32.gmra.mrb[98].mxu1 %vm176_vm0, %v5589_v29 }
 0x374   :  { %4503 = vmatprep.mubr.msk.f32.mxu1 %vm176_vm0, %v5523_v5 }
 0x377   :  { %4504 = vmatmul.mubr.msk.f32.vlgmr.msra.gmra.mrb[100].mxu1 %vm176_vm0, %v5533_v15 }
 0x378   :  { %5002 = vmatpush3.bf16.msra.mxu1 %v5725_v33  ;;  %4506 = vmatprep.mubr.msk.f32.mxu1 %vm176_vm0, %v5535_v16 }
 0x37b   :  { %4507 = vmatmul.mubr.msk.f32.gmra.mrb[102].mxu1 %vm176_vm0, %v5541_v17 }
 0x37c   :  { %4509 = vmatprep.mubr.msk.f32.mxu1 %vm176_vm0, %v5543_v18 }
 0x37f   :  { %4510 = vmatmul.mubr.msk.f32.gmra.mrb[104].mxu1 %vm176_vm0, %v5549_v19 }
 0x380   :  { %4512 = vmatprep.mubr.msk.f32.mxu1 %vm176_vm0, %v5551_v20 }
 0x383   :  { %4513 = vmatmul.mubr.msk.f32.gmra.mrb[106].mxu1 %vm176_vm0, %v5557_v21 }
 0x384   :  { %4515 = vmatprep.mubr.msk.f32.mxu1 %vm176_vm0, %v5559_v22 }
 0x387   :  { %4516 = vmatmul.mubr.msk.f32.gmra.mrb[108].mxu1 %vm176_vm0, %v5565_v23 }
 0x388   :  { %4518 = vmatprep.mubr.msk.f32.mxu1 %vm176_vm0, %v5567_v24 }
 0x38b   :  { %4519 = vmatmul.mubr.msk.f32.gmra.mrb[110].mxu1 %vm176_vm0, %v5573_v25 }
 0x38c   :  { %4521 = vmatprep.mubr.msk.f32.mxu1 %vm176_vm0, %v5575_v26 }
 0x38f   :  { %4522 = vmatmul.mubr.msk.f32.gmra.mrb[112].mxu1 %vm176_vm0, %v5581_v27 }
 0x390   :  { %4524 = vmatprep.mubr.msk.f32.mxu1 %vm176_vm0, %v5583_v28 }
 0x393   :  { %4525 = vmatmul.mubr.msk.f32.gmra.mrb[114].mxu1 %vm176_vm0, %v5589_v29 }
 0x394   :  { %4569 = vmatprep.mubr.msk.f32.mxu1 %vm176_vm0, %v5523_v5 }
 0x397   :  { %4570 = vmatmul.mubr.msk.f32.vlgmr.msra.gmra.mrb[116].mxu1 %vm176_vm0, %v5533_v15 }
 0x398   :  { %4572 = vmatprep.mubr.msk.f32.mxu1 %vm176_vm0, %v5535_v16 }
 0x39b   :  { %4573 = vmatmul.mubr.msk.f32.gmra.mrb[118].mxu1 %vm176_vm0, %v5541_v17 }
 0x39c   :  { %4575 = vmatprep.mubr.msk.f32.mxu1 %vm176_vm0, %v5543_v18 }
 0x39f   :  { %4576 = vmatmul.mubr.msk.f32.gmra.mrb[120].mxu1 %vm176_vm0, %v5549_v19 }
 0x3a0   :  { %4578 = vmatprep.mubr.msk.f32.mxu1 %vm176_vm0, %v5551_v20 }
 0x3a2   :  { %v5912_v63 = vpop.f32.mrb[16].mxu1 }
 0x3a3   :  { %6649 = vst [vmem:[#allocation19_spill] sm:$0xff] %v5912_v63  ;;  %v5914_v5 = vpop.f32.mrb[17].mxu1  ;;  %4579 = vmatmul.mubr.msk.f32.gmra.mrb[122].mxu1 %vm176_vm0, %v5557_v21 }
 0x3a4   :  { %6650 = vst [vmem:[#allocation20_spill] sm:$0xff] %v5914_v5  ;;  %4581 = vmatprep.mubr.msk.f32.mxu1 %vm176_vm0, %v5559_v22 }
 0x3a6   :  { %v5920_v15 = vpop.f32.mrb[18].mxu1 }
 0x3a7   :  { %6651 = vst [vmem:[#allocation21_spill] sm:$0xff] %v5920_v15  ;;  %v5922_v16 = vpop.f32.mrb[19].mxu1  ;;  %4582 = vmatmul.mubr.msk.f32.gmra.mrb[124].mxu1 %vm176_vm0, %v5565_v23 }
 0x3a8   :  { %6652 = vst [vmem:[#allocation22_spill] sm:$0xff] %v5922_v16  ;;  %4584 = vmatprep.mubr.msk.f32.mxu1 %vm176_vm0, %v5567_v24 }
 0x3aa   :  { %v5930_v18 = vpop.f32.mrb[20].mxu1 }
 0x3ab   :  { %v5932_v19 = vpop.f32.mrb[21].mxu1  ;;  %4585 = vmatmul.mubr.msk.f32.gmra.mrb[126].mxu1 %vm176_vm0, %v5573_v25 }
 0x3ac   :  { %4587 = vmatprep.mubr.msk.f32.mxu1 %vm176_vm0, %v5575_v26 }
 0x3ae   :  { %v5938_v20 = vpop.f32.mrb[22].mxu1 }
 0x3af   :  { %v5940_v21 = vpop.f32.mrb[23].mxu1  ;;  %4588 = vmatmul.mubr.msk.f32.gmra.mrb[128].mxu1 %vm176_vm0, %v5581_v27 }
 0x3b0   :  { %4590 = vmatprep.mubr.msk.f32.mxu1 %vm176_vm0, %v5583_v28 }
 0x3b2   :  { %v5946_v22 = vpop.f32.mrb[24].mxu1 }
 0x3b3   :  { %v5948_v23 = vpop.f32.mrb[25].mxu1  ;;  %4591 = vmatmul.mubr.msk.f32.gmra.mrb[130].mxu1 %vm176_vm0, %v5589_v29 }
 0x3b6   :  { %v5952_v24 = vpop.f32.mrb[26].mxu1 }
 0x3b7   :  { %v5954_v25 = vpop.f32.mrb[27].mxu1 }
 0x3ba   :  { %v5956_v26 = vpop.f32.mrb[28].mxu1 }
 0x3bb   :  { %902 = vrot.lane.b32.xlu1 %v5956_v26, %s5373_s5  ;;  %v5960_v27 = vpop.f32.mrb[29].mxu1 }
 0x3bc   :  { %900 = vrot.lane.b32.xlu0 %v5960_v27, %s5373_s5 }
 0x3be   :  { %v5964_v28 = vpop.f32.mrb[30].mxu1 }
 0x3bf   :  { %906 = vrot.lane.b32.xlu1 %v5964_v28, %s5373_s5  ;;  %v5968_v29 = vpop.f32.mrb[31].mxu1 }
 0x3c0   :  { %904 = vrot.lane.b32.xlu0 %v5968_v29, %s5373_s5 }
 0x3c2   :  { %v5972_v2 = vpop.f32.mrb[32].mxu1 }
 0x3c3   :  { %910 = vrot.lane.b32.xlu1 %v5972_v2, %s5373_s5  ;;  %v5976_v34 = vpop.f32.mrb[33].mxu1 }
 0x3c4   :  { %908 = vrot.lane.b32.xlu0 %v5976_v34, %s5373_s5 }
 0x3c6   :  { %v5980_v35 = vpop.f32.mrb[34].mxu1 }
 0x3c7   :  { %914 = vrot.lane.b32.xlu1 %v5980_v35, %s5373_s5  ;;  %v5984_v36 = vpop.f32.mrb[35].mxu1 }
 0x3c8   :  { %912 = vrot.lane.b32.xlu0 %v5984_v36, %s5373_s5 }
 0x3ca   :  { %v5988_v37 = vpop.f32.mrb[36].mxu1 }
 0x3cb   :  { %942 = vrot.lane.b32.xlu1 %v5930_v18, %s5373_s5  ;;  %v5992_v38 = vpop.f32.mrb[37].mxu1 }
 0x3cc   :  { %940 = vrot.lane.b32.xlu0 %v5932_v19, %s5373_s5 }
 0x3ce   :  { %v5996_v39 = vpop.f32.mrb[38].mxu1 }
 0x3cf   :  { %946 = vrot.lane.b32.xlu1 %v5938_v20, %s5373_s5  ;;  %v6000_v40 = vpop.f32.mrb[39].mxu1 }
 0x3d0   :  { %944 = vrot.lane.b32.xlu0 %v5940_v21, %s5373_s5 }
 0x3d2   :  { %v6004_v41 = vpop.f32.mrb[40].mxu1 }
 0x3d3   :  { %950 = vrot.lane.b32.xlu1 %v5946_v22, %s5373_s5  ;;  %v6008_v54 = vpop.f32.mrb[41].mxu1 }
 0x3d4   :  { %948 = vrot.lane.b32.xlu0 %v5948_v23, %s5373_s5 }
 0x3d6   :  { %v6012_v55 = vpop.f32.mrb[42].mxu1 }
 0x3d7   :  { %954 = vrot.lane.b32.xlu1 %v5952_v24, %s5373_s5  ;;  %v6016_v43 = vpop.f32.mrb[43].mxu1 }
 0x3d8   :  { %952 = vrot.lane.b32.xlu0 %v5954_v25, %s5373_s5 }
 0x3da   :  { %v6020_v42 = vpop.f32.mrb[44].mxu1 }
 0x3db   :  { %1230 = vrot.lane.b32.xlu1 %v6020_v42, %s5373_s5  ;;  %v6024_v58 = vpop.f32.mrb[45].mxu1 }
 0x3dc   :  { %1228 = vrot.lane.b32.xlu0 %v6024_v58, %s5373_s5 }
 0x3de   :  { %v6028_v59 = vpop.f32.mrb[46].mxu1 }
 0x3df   :  { %1234 = vrot.lane.b32.xlu1 %v6028_v59, %s5373_s5  ;;  %v6032_v61 = vpop.f32.mrb[47].mxu1 }
 0x3e0   :  { %1232 = vrot.lane.b32.xlu0 %v6032_v61, %s5373_s5 }
 0x3e2   :  { %v6036_v62 = vpop.f32.mrb[48].mxu1 }
 0x3e3   :  { %1238 = vrot.lane.b32.xlu1 %v6036_v62, %s5373_s5  ;;  %v6040_v0 = vpop.f32.mrb[49].mxu1 }
 0x3e4   :  { %1236 = vrot.lane.b32.xlu0 %v6040_v0, %s5373_s5 }
 0x3e6   :  { %v6044_v45 = vpop.f32.mrb[50].mxu1 }
 0x3e7   :  { %1242 = vrot.lane.b32.xlu1 %v6044_v45, %s5373_s5  ;;  %v6048_v44 = vpop.f32.mrb[51].mxu1 }
 0x3e8   :  { %1240 = vrot.lane.b32.xlu0 %v6048_v44, %s5373_s5 }
 0x3ea   :  { %v6052_v1 = vpop.f32.mrb[52].mxu1 }
 0x3eb   :  { %1270 = vrot.lane.b32.xlu1 %v5988_v37, %s5373_s5  ;;  %v6056_v3 = vpop.f32.mrb[53].mxu1 }
 0x3ec   :  { %1268 = vrot.lane.b32.xlu0 %v5992_v38, %s5373_s5 }
 0x3ee   :  { %v6060_v4 = vpop.f32.mrb[54].mxu1 }
 0x3ef   :  { %1274 = vrot.lane.b32.xlu1 %v5996_v39, %s5373_s5  ;;  %v6064_v47 = vpop.f32.mrb[55].mxu1 }
 0x3f0   :  { %1272 = vrot.lane.b32.xlu0 %v6000_v40, %s5373_s5 }
 0x3f2   :  { %v6068_v6 = vpop.f32.mrb[56].mxu1 }
 0x3f3   :  { %1278 = vrot.lane.b32.xlu1 %v6004_v41, %s5373_s5  ;;  %v6072_v46 = vpop.f32.mrb[57].mxu1 }
 0x3f4   :  { %1276 = vrot.lane.b32.xlu0 %v6008_v54, %s5373_s5 }
 0x3f6   :  { %v6076_v7 = vpop.f32.mrb[58].mxu1 }
 0x3f7   :  { %1282 = vrot.lane.b32.xlu1 %v6012_v55, %s5373_s5  ;;  %v6080_v8 = vpop.f32.mrb[59].mxu1 }
 0x3f8   :  { %1280 = vrot.lane.b32.xlu0 %v6016_v43, %s5373_s5 }
 0x3fa   :  { %v6084_v9 = vpop.f32.mrb[60].mxu1 }
 0x3fb   :  { %1558 = vrot.lane.b32.xlu1 %v6084_v9, %s5373_s5  ;;  %v6088_v10 = vpop.f32.mrb[61].mxu1 }
 0x3fc   :  { %6653 = vst [vmem:[#allocation23_spill] sm:$0xff] %v6088_v10  ;;  %1556 = vrot.lane.b32.xlu0 %v6088_v10, %s5373_s5 }
 0x3fe   :  { %v6092_v49 = vpop.f32.mrb[62].mxu1 }
 0x3ff   :  { %6654 = vst [vmem:[#allocation24_spill] sm:$0xff] %v6092_v49  ;;  %1562 = vrot.lane.b32.xlu1 %v6092_v49, %s5373_s5  ;;  %v6096_v11 = vpop.f32.mrb[63].mxu1 }
 0x400   :  { %6655 = vst [vmem:[#allocation25_spill] sm:$0xff] %v6096_v11  ;;  %1560 = vrot.lane.b32.xlu0 %v6096_v11, %s5373_s5 }
 0x402   :  { %v6100_v48 = vpop.f32.mrb[64].mxu1 }
 0x403   :  { %6656 = vst [vmem:[#allocation26_spill] sm:$0xff] %v6100_v48  ;;  %1566 = vrot.lane.b32.xlu1 %v6100_v48, %s5373_s5  ;;  %v6104_v12 = vpop.f32.mrb[65].mxu1 }
 0x404   :  { %6657 = vst [vmem:[#allocation27_spill] sm:$0xff] %v6104_v12  ;;  %1564 = vrot.lane.b32.xlu0 %v6104_v12, %s5373_s5 }
 0x406   :  { %v6108_v13 = vpop.f32.mrb[66].mxu1 }
 0x407   :  { %6658 = vst [vmem:[#allocation28_spill] sm:$0xff] %v6108_v13  ;;  %1570 = vrot.lane.b32.xlu1 %v6108_v13, %s5373_s5  ;;  %v6112_v14 = vpop.f32.mrb[67].mxu1 }
 0x408   :  { %6659 = vst [vmem:[#allocation29_spill] sm:$0xff] %v6112_v14  ;;  %1568 = vrot.lane.b32.xlu0 %v6112_v14, %s5373_s5 }
 0x40a   :  { %v6116_v51 = vpop.f32.mrb[68].mxu1 }
 0x40b   :  { %6660 = vst [vmem:[#allocation30_spill] sm:$0xff] %v6116_v51  ;;  %1598 = vrot.lane.b32.xlu1 %v6052_v1, %s5373_s5  ;;  %v6120_v53 = vpop.f32.mrb[69].mxu1 }
 0x40c   :  { %6661 = vst [vmem:[#allocation31_spill] sm:$0xff] %v6120_v53  ;;  %1596 = vrot.lane.b32.xlu0 %v6056_v3, %s5373_s5 }
 0x40e   :  { %v6124_v31 = vpop.f32.mrb[70].mxu1 }
 0x40f   :  { %1602 = vrot.lane.b32.xlu1 %v6060_v4, %s5373_s5  ;;  %v6128_v32 = vpop.f32.mrb[71].mxu1 }
 0x410   :  { %1600 = vrot.lane.b32.xlu0 %v6064_v47, %s5373_s5 }
 0x412   :  { %v6132_v56 = vpop.f32.mrb[72].mxu1 }
 0x413   :  { %1606 = vrot.lane.b32.xlu1 %v6068_v6, %s5373_s5  ;;  %v6136_v60 = vpop.f32.mrb[73].mxu1 }
 0x414   :  { %1604 = vrot.lane.b32.xlu0 %v6072_v46, %s5373_s5 }
 0x416   :  { %v6140_v33 = vpop.f32.mrb[74].mxu1 }
 0x417   :  { %1610 = vrot.lane.b32.xlu1 %v6076_v7, %s5373_s5  ;;  %v6144_v17 = vpop.f32.mrb[75].mxu1 }
 0x418   :  { %1608 = vrot.lane.b32.xlu0 %v6080_v8, %s5373_s5 }
 0x41a   :  { %v6148_v63 = vpop.f32.mrb[76].mxu1 }
 0x41b   :  { %6662 = vst [vmem:[#allocation32_spill] sm:$0xff] %v6148_v63  ;;  %1886 = vrot.lane.b32.xlu1 %v6148_v63, %s5373_s5  ;;  %v6152_v5 = vpop.f32.mrb[77].mxu1 }
 0x41c   :  { %6663 = vst [vmem:[#allocation33_spill] sm:$0xff] %v6152_v5  ;;  %1884 = vrot.lane.b32.xlu0 %v6152_v5, %s5373_s5 }
 0x41e   :  { %v6156_v16 = vpop.f32.mrb[78].mxu1 }
 0x41f   :  { %6664 = vst [vmem:[#allocation34_spill] sm:$0xff] %v6156_v16  ;;  %1890 = vrot.lane.b32.xlu1 %v6156_v16, %s5373_s5  ;;  %v6160_v15 = vpop.f32.mrb[79].mxu1 }
 0x420   :  { %6665 = vst [vmem:[#allocation35_spill] sm:$0xff] %v6160_v15  ;;  %1888 = vrot.lane.b32.xlu0 %v6160_v15, %s5373_s5 }
 0x422   :  { %v6164_v14 = vpop.f32.mrb[80].mxu1 }
 0x423   :  { %6666 = vst [vmem:[#allocation36_spill] sm:$0xff] %v6164_v14  ;;  %1894 = vrot.lane.b32.xlu1 %v6164_v14, %s5373_s5  ;;  %v6168_v63 = vpop.f32.mrb[81].mxu1 }
 0x424   :  { %6667 = vst [vmem:[#allocation37_spill] sm:$0xff] %v6168_v63  ;;  %1892 = vrot.lane.b32.xlu0 %v6168_v63, %s5373_s5 }
 0x426   :  { %v6172_v5 = vpop.f32.mrb[82].mxu1 }
 0x427   :  { %6668 = vst [vmem:[#allocation38_spill] sm:$0xff] %v6172_v5  ;;  %1898 = vrot.lane.b32.xlu1 %v6172_v5, %s5373_s5  ;;  %v6176_v16 = vpop.f32.mrb[83].mxu1 }
 0x428   :  { %6669 = vst [vmem:[#allocation39_spill] sm:$0xff] %v6176_v16  ;;  %1896 = vrot.lane.b32.xlu0 %v6176_v16, %s5373_s5 }
 0x42a   :  { %v6180_v15 = vpop.f32.mrb[84].mxu1 }
 0x42b   :  { %1926 = vrot.lane.b32.xlu1 %v6116_v51, %s5373_s5  ;;  %v6184_v14 = vpop.f32.mrb[85].mxu1 }
 0x42c   :  { %1924 = vrot.lane.b32.xlu0 %v6120_v53, %s5373_s5 }
 0x42d   :  { %v903_v63 = vpop.permute.xlu1 %902 }
 0x42e   :  { %v925_v13 = vsub.f32 %v5930_v18, %v903_v63  ;;  %v901_v12 = vpop.permute.xlu0 %900  ;;  %v6189_v5 = vpop.f32.mrb[86].mxu1 }
 0x42f   :  { %v924_v48 = vsub.f32 %v5932_v19, %v901_v12  ;;  %1930 = vrot.lane.b32.xlu1 %v6124_v31, %s5373_s5  ;;  %v6194_v16 = vpop.f32.mrb[87].mxu1 }
 0x430   :  { %1928 = vrot.lane.b32.xlu0 %v6128_v32, %s5373_s5 }
 0x431   :  { %v4787_v51 = vpack.c.bf16 %v925_v13, %v924_v48  ;;  %v907_v11 = vpop.permute.xlu1 %906 }
 0x432   :  { %v927_v53 = vsub.f32 %v5938_v20, %v907_v11  ;;  %v905_v49 = vpop.permute.xlu0 %904  ;;  %v6199_v10 = vpop.f32.mrb[88].mxu1 }
 0x433   :  { %v926_v63 = vsub.f32 %v5940_v21, %v905_v49  ;;  %4788 = vmatprep.subr.bf16.mxu0 %v4787_v51  ;;  %1934 = vrot.lane.b32.xlu1 %v6132_v56, %s5373_s5  ;;  %v6204_v18 = vpop.f32.mrb[89].mxu1 }
 0x434   :  { %4790 = vmatpush3.bf16.msra.mxu0 %v4787_v51  ;;  %1932 = vrot.lane.b32.xlu0 %v6136_v60, %s5373_s5 }
 0x435   :  { %v4791_v19 = vpack.c.bf16 %v927_v53, %v926_v63  ;;  %v911_v48 = vpop.permute.xlu1 %910 }
 0x436   :  { %v929_v12 = vsub.f32 %v5946_v22, %v911_v48  ;;  %v909_v20 = vpop.permute.xlu0 %908  ;;  %v6209_v11 = vpop.f32.mrb[90].mxu1 }
 0x437   :  { %v928_v13 = vsub.f32 %v5948_v23, %v909_v20  ;;  %4792 = vmatprep.subr.bf16.mxu0 %v4791_v19  ;;  %1938 = vrot.lane.b32.xlu1 %v6140_v33, %s5373_s5  ;;  %v6214_v21 = vpop.f32.mrb[91].mxu1 }
 0x438   :  { %4794 = vmatpush3.bf16.msra.mxu0 %v4791_v19  ;;  %1936 = vrot.lane.b32.xlu0 %v6144_v17, %s5373_s5 }
 0x439   :  { %v4795_v49 = vpack.c.bf16 %v929_v12, %v928_v13  ;;  %v915_v51 = vpop.permute.xlu1 %914 }
 0x43a   :  { %v931_v53 = vsub.f32 %v5952_v24, %v915_v51  ;;  %v913_v22 = vpop.permute.xlu0 %912  ;;  %v6219_v63 = vpop.f32.mrb[92].mxu1 }
 0x43b   :  { %v930_v48 = vsub.f32 %v5954_v25, %v913_v22  ;;  %4796 = vmatprep.subr.bf16.mxu0 %v4795_v49  ;;  %2214 = vrot.lane.b32.xlu1 %v6219_v63, %s5373_s5  ;;  %v6224_v23 = vpop.f32.mrb[93].mxu1 }
 0x43c   :  { %4798 = vmatpush3.bf16.msra.mxu0 %v4795_v49  ;;  %2212 = vrot.lane.b32.xlu0 %v6224_v23, %s5373_s5 }
 0x43d   :  { %v4799_v19 = vpack.c.bf16 %v931_v53, %v930_v48  ;;  %v943_v12 = vpop.permute.xlu1 %942 }
 0x43e   :  { %v965_v20 = vadd.f32 %v5956_v26, %v943_v12  ;;  %v941_v24 = vpop.permute.xlu0 %940  ;;  %v6229_v13 = vpop.f32.mrb[94].mxu1 }
 0x43f   :  { %6670 = vst [vmem:[#allocation40_spill] sm:$0xff] %v6229_v13  ;;  %v964_v51 = vadd.f32 %v941_v24, %v5960_v27  ;;  %4800 = vmatprep.subr.bf16.mxu0 %v4799_v19  ;;  %2218 = vrot.lane.b32.xlu1 %v6229_v13, %s5373_s5  ;;  %v6234_v25 = vpop.f32.mrb[95].mxu1 }
 0x440   :  { %6671 = vst [vmem:[#allocation41_spill] sm:$0xff] %v6234_v25  ;;  %v973_v22 = vsub.f32 0.0, %v965_v20  ;;  %4802 = vmatpush3.bf16.msra.mxu0 %v4799_v19  ;;  %2216 = vrot.lane.b32.xlu0 %v6234_v25, %s5373_s5 }
 0x441   :  { %v972_v49 = vsub.f32 0.0, %v964_v51  ;;  %v947_v53 = vpop.permute.xlu1 %946 }
 0x442   :  { %v967_v26 = vadd.f32 %v5964_v28, %v947_v53  ;;  %v945_v48 = vpop.permute.xlu0 %944  ;;  %v6239_v12 = vpop.f32.mrb[96].mxu1 }
 0x443   :  { %v966_v27 = vadd.f32 %v945_v48, %v5968_v29  ;;  %2222 = vrot.lane.b32.xlu1 %v6239_v12, %s5373_s5  ;;  %v6244_v24 = vpop.f32.mrb[97].mxu1  ;;  %v4803_v13 = vpack.c.bf16 %v973_v22, %v972_v49 }
 0x444   :  { %v975_v20 = vsub.f32 0.0, %v967_v26  ;;  %2220 = vrot.lane.b32.xlu0 %v6244_v24, %s5373_s5 }
 0x445   :  { %v974_v19 = vsub.f32 0.0, %v966_v27  ;;  %v951_v51 = vpop.permute.xlu1 %950  ;;  %4804 = vmatprep.subr.bf16.mxu0 %v4803_v13 }
 0x446   :  { %v969_v28 = vadd.f32 %v5972_v2, %v951_v51  ;;  %4806 = vmatpush3.bf16.msra.mxu0 %v4803_v13  ;;  %v949_v53 = vpop.permute.xlu0 %948  ;;  %v6249_v25 = vpop.f32.mrb[98].mxu1 }
 0x447   :  { %v968_v29 = vadd.f32 %v949_v53, %v5976_v34  ;;  %2226 = vrot.lane.b32.xlu1 %v6249_v25, %s5373_s5  ;;  %v6254_v48 = vpop.f32.mrb[99].mxu1  ;;  %v4807_v22 = vpack.c.bf16 %v975_v20, %v974_v19 }
 0x448   :  { %v977_v49 = vsub.f32 0.0, %v969_v28  ;;  %2224 = vrot.lane.b32.xlu0 %v6254_v48, %s5373_s5 }
 0x449   :  { %v976_v26 = vsub.f32 0.0, %v968_v29  ;;  %v955_v27 = vpop.permute.xlu1 %954  ;;  %4808 = vmatprep.subr.bf16.mxu0 %v4807_v22 }
 0x44a   :  { %v971_v2 = vadd.f32 %v5980_v35, %v955_v27  ;;  %4810 = vmatpush3.bf16.msra.mxu0 %v4807_v22  ;;  %v953_v13 = vpop.permute.xlu0 %952  ;;  %v6259_v51 = vpop.f32.mrb[100].mxu1 }
 0x44b   :  { %v970_v34 = vadd.f32 %v953_v13, %v5984_v36  ;;  %2254 = vrot.lane.b32.xlu1 %v6180_v15, %s5373_s5  ;;  %v6264_v53 = vpop.f32.mrb[101].mxu1  ;;  %v4811_v20 = vpack.c.bf16 %v977_v49, %v976_v26 }
 0x44c   :  { %v979_v19 = vsub.f32 0.0, %v971_v2  ;;  %2252 = vrot.lane.b32.xlu0 %v6184_v14, %s5373_s5 }
 0x44d   :  { %v978_v28 = vsub.f32 0.0, %v970_v34  ;;  %4812 = vmatprep.subr.bf16.mxu0 %v4811_v20  ;;  %v1231_v29 = vpop.permute.xlu1 %1230 }
 0x44e   :  { %v1253_v35 = vsub.f32 %v5988_v37, %v1231_v29  ;;  %4814 = vmatpush3.bf16.msra.mxu0 %v4811_v20  ;;  %v1229_v22 = vpop.permute.xlu0 %1228  ;;  %v6269_v27 = vpop.f32.mrb[102].mxu1 }
 0x44f   :  { %v1252_v36 = vsub.f32 %v5992_v38, %v1229_v22  ;;  %2258 = vrot.lane.b32.xlu1 %v6189_v5, %s5373_s5  ;;  %v6274_v13 = vpop.f32.mrb[103].mxu1  ;;  %v4815_v49 = vpack.c.bf16 %v979_v19, %v978_v28 }
 0x450   :  { %2256 = vrot.lane.b32.xlu0 %v6194_v16, %s5373_s5 }
 0x451   :  { %v4823_v26 = vpack.c.bf16 %v1253_v35, %v1252_v36  ;;  %4816 = vmatprep.subr.bf16.mxu0 %v4815_v49  ;;  %v1235_v2 = vpop.permute.xlu1 %1234 }
 0x452   :  { %v1255_v37 = vsub.f32 %v5996_v39, %v1235_v2  ;;  %4818 = vmatpush3.bf16.msra.mxu0 %v4815_v49  ;;  %v1233_v34 = vpop.permute.xlu0 %1232  ;;  %v6279_v20 = vpop.f32.mrb[104].mxu1 }
 0x453   :  { %v1254_v38 = vsub.f32 %v6000_v40, %v1233_v34  ;;  %4824 = vmatprep.subr.bf16.mxu0 %v4823_v26  ;;  %2262 = vrot.lane.b32.xlu1 %v6199_v10, %s5373_s5  ;;  %v6284_v29 = vpop.f32.mrb[105].mxu1 }
 0x454   :  { %2260 = vrot.lane.b32.xlu0 %v6204_v18, %s5373_s5 }
 0x455   :  { %v4827_v19 = vpack.c.bf16 %v1255_v37, %v1254_v38  ;;  %4230 = vmatmul.mubr.f32.vlgmr.msra.gmra.mrb[16].mxu0 %v5679_v50  ;;  %v1239_v28 = vpop.permute.xlu1 %1238 }
 0x456   :  { %v1257_v39 = vsub.f32 %v6004_v41, %v1239_v28  ;;  %4826 = vmatpush3.bf16.msra.mxu0 %v4823_v26  ;;  %v1237_v35 = vpop.permute.xlu0 %1236  ;;  %v6290_v22 = vpop.f32.mrb[106].mxu1  ;;  %4232 = vmatprep.mubr.f32.mxu0 %v5682_v30 }
 0x457   :  { %v1256_v40 = vsub.f32 %v6008_v54, %v1237_v35  ;;  %4828 = vmatprep.subr.bf16.mxu0 %v4827_v19  ;;  %2266 = vrot.lane.b32.xlu1 %v6209_v11, %s5373_s5  ;;  %v6296_v36 = vpop.f32.mrb[107].mxu1 }
 0x458   :  { %2264 = vrot.lane.b32.xlu0 %v6214_v21, %s5373_s5 }
 0x459   :  { %v4831_v49 = vpack.c.bf16 %v1257_v39, %v1256_v40  ;;  %4233 = vmatmul.mubr.f32.gmra.mrb[18].mxu0 %v5687_v52  ;;  %v1243_v41 = vpop.permute.xlu1 %1242 }
 0x45a   :  { %v1259_v26 = vsub.f32 %v6012_v55, %v1243_v41  ;;  %4830 = vmatpush3.bf16.msra.mxu0 %v4827_v19  ;;  %v1241_v2 = vpop.permute.xlu0 %1240  ;;  %v6302_v37 = vpop.f32.mrb[108].mxu1  ;;  %4295 = vmatprep.mubr.f32.mxu0 %v5649_v57 }
 0x45b   :  { %v1258_v54 = vsub.f32 %v6016_v43, %v1241_v2  ;;  %4832 = vmatprep.subr.bf16.mxu0 %v4831_v49  ;;  %2542 = vrot.lane.b32.xlu1 %v6302_v37, %s5373_s5  ;;  %v6308_v34 = vpop.f32.mrb[109].mxu1 }
 0x45c   :  { %2540 = vrot.lane.b32.xlu0 %v6308_v34, %s5373_s5 }
 0x45d   :  { %v4835_v38 = vpack.c.bf16 %v1259_v26, %v1258_v54  ;;  %v1271_v28 = vpop.permute.xlu1 %1270 }
 0x45e   :  { %v1293_v55 = vadd.f32 %v6020_v42, %v1271_v28  ;;  %4834 = vmatpush3.bf16.msra.mxu0 %v4831_v49  ;;  %v1269_v19 = vpop.permute.xlu0 %1268  ;;  %v6313_v39 = vpop.f32.mrb[110].mxu1 }
 0x45f   :  { %v1292_v57 = vadd.f32 %v1269_v19, %v6024_v58  ;;  %4836 = vmatprep.subr.bf16.mxu0 %v4835_v38  ;;  %2546 = vrot.lane.b32.xlu1 %v6313_v39, %s5373_s5  ;;  %v6318_v43 = vpop.f32.mrb[111].mxu1 }
 0x460   :  { %v1301_v35 = vsub.f32 0.0, %v1293_v55  ;;  %2544 = vrot.lane.b32.xlu0 %v6318_v43, %s5373_s5 }
 0x461   :  { %v1300_v40 = vsub.f32 0.0, %v1292_v57  ;;  %v1275_v41 = vpop.permute.xlu1 %1274 }
 0x462   :  { %v1295_v42 = vadd.f32 %v6028_v59, %v1275_v41  ;;  %4838 = vmatpush3.bf16.msra.mxu0 %v4835_v38  ;;  %v1273_v49 = vpop.permute.xlu0 %1272  ;;  %v6323_v26 = vpop.f32.mrb[112].mxu1 }
 0x463   :  { %v4839_v2 = vpack.c.bf16 %v1301_v35, %v1300_v40  ;;  %v1294_v58 = vadd.f32 %v1273_v49, %v6032_v61  ;;  %2550 = vrot.lane.b32.xlu1 %v6323_v26, %s5373_s5  ;;  %v6328_v54 = vpop.f32.mrb[113].mxu1 }
 0x464   :  { %v1303_v28 = vsub.f32 0.0, %v1295_v42  ;;  %2548 = vrot.lane.b32.xlu0 %v6328_v54, %s5373_s5 }
 0x465   :  { %v1302_v55 = vsub.f32 0.0, %v1294_v58  ;;  %v1279_v19 = vpop.permute.xlu1 %1278  ;;  %4840 = vmatprep.subr.bf16.mxu0 %v4839_v2 }
 0x466   :  { %v1297_v59 = vadd.f32 %v6036_v62, %v1279_v19  ;;  %4842 = vmatpush3.bf16.msra.mxu0 %v4839_v2  ;;  %v1277_v38 = vpop.permute.xlu0 %1276  ;;  %v6333_v57 = vpop.f32.mrb[114].mxu1 }
 0x467   :  { %v4843_v35 = vpack.c.bf16 %v1303_v28, %v1302_v55  ;;  %v1296_v61 = vadd.f32 %v1277_v38, %v6040_v0  ;;  %2554 = vrot.lane.b32.xlu1 %v6333_v57, %s5373_s5  ;;  %v6338_v40 = vpop.f32.mrb[115].mxu1 }
 0x468   :  { %v1305_v41 = vsub.f32 0.0, %v1297_v59  ;;  %2552 = vrot.lane.b32.xlu0 %v6338_v40, %s5373_s5 }
 0x469   :  { %v1304_v42 = vsub.f32 0.0, %v1296_v61  ;;  %v1283_v49 = vpop.permute.xlu1 %1282  ;;  %4844 = vmatprep.subr.bf16.mxu0 %v4843_v35 }
 0x46a   :  { %v1299_v62 = vadd.f32 %v6044_v45, %v1283_v49  ;;  %4846 = vmatpush3.bf16.msra.mxu0 %v4843_v35  ;;  %v1281_v2 = vpop.permute.xlu0 %1280  ;;  %v6343_v58 = vpop.f32.mrb[116].mxu1  ;;  %v144_v49 = vld [vmem:[#allocation10] sm:$0xff] }
 0x46b   :  { %v4847_v28 = vpack.c.bf16 %v1305_v41, %v1304_v42  ;;  %v1298_v0 = vadd.f32 %v1281_v2, %v6048_v44  ;;  %2582 = vrot.lane.b32.xlu1 %v6259_v51, %s5373_s5  ;;  %v6348_v55 = vpop.f32.mrb[117].mxu1 }
 0x46c   :  { %v1307_v19 = vsub.f32 0.0, %v1299_v62  ;;  %2580 = vrot.lane.b32.xlu0 %v6264_v53, %s5373_s5  ;;  %v145_v62 = vld [vmem:[#allocation10 + $0x8] sm:$0xff] }
 0x46d   :  { %v1306_v59 = vsub.f32 0.0, %v1298_v0  ;;  %4848 = vmatprep.subr.bf16.mxu0 %v4847_v28  ;;  %v1559_v38 = vpop.permute.xlu1 %1558 }
 0x46e   :  { %v1581_v45 = vsub.f32 %v6052_v1, %v1559_v38  ;;  %4850 = vmatpush3.bf16.msra.mxu0 %v4847_v28  ;;  %v1557_v35 = vpop.permute.xlu0 %1556  ;;  %v6353_v61 = vpop.f32.mrb[118].mxu1  ;;  %v5035_v28 = vpack.c.bf16 %v145_v62, %v144_v49 }
 0x46f   :  { %v4851_v41 = vpack.c.bf16 %v1307_v19, %v1306_v59  ;;  %v1580_v44 = vsub.f32 %v6056_v3, %v1557_v35  ;;  %2586 = vrot.lane.b32.xlu1 %v6269_v27, %s5373_s5  ;;  %v6358_v42 = vpop.f32.mrb[119].mxu1  ;;  %v147_v35 = vld [vmem:[#allocation10 + $0x18] sm:$0xff] }
 0x470   :  { %2584 = vrot.lane.b32.xlu0 %v6274_v13, %s5373_s5  ;;  %5036 = vmatprep.subr.bf16.mxu1 %v5035_v28 }
 0x471   :  { %v4859_v2 = vpack.c.bf16 %v1581_v45, %v1580_v44  ;;  %4852 = vmatprep.subr.bf16.mxu0 %v4851_v41  ;;  %v1563_v1 = vpop.permute.xlu1 %1562  ;;  %v146_v45 = vld [vmem:[#allocation10 + $0x10] sm:$0xff]  ;;  %5038 = vmatpush3.bf16.msra.mxu1 %v5035_v28 }
 0x472   :  { %v1583_v0 = vsub.f32 %v6060_v4, %v1563_v1  ;;  %4854 = vmatpush3.bf16.msra.mxu0 %v4851_v41  ;;  %v1561_v19 = vpop.permute.xlu0 %1560  ;;  %v6363_v59 = vpop.f32.mrb[120].mxu1  ;;  %v5039_v41 = vpack.c.bf16 %v147_v35, %v146_v45  ;;  %v6388_v45 = vld [vmem:[#allocation8] sm:$0xff] }
 0x473   :  { %v1582_v3 = vsub.f32 %v6064_v47, %v1561_v19  ;;  %4860 = vmatprep.subr.bf16.mxu0 %v4859_v2  ;;  %2590 = vrot.lane.b32.xlu1 %v6279_v20, %s5373_s5  ;;  %v6368_v38 = vpop.f32.mrb[121].mxu1 }
 0x474   :  { %2588 = vrot.lane.b32.xlu0 %v6284_v29, %s5373_s5  ;;  %5040 = vmatprep.subr.bf16.mxu1 %v5039_v41 }
 0x475   :  { %v4863_v44 = vpack.c.bf16 %v1583_v0, %v1582_v3  ;;  %4296 = vmatmul.mubr.f32.vlgmr.msra.gmra.mrb[20].mxu0 %v5679_v50  ;;  %v1567_v4 = vpop.permute.xlu1 %1566  ;;  %v148_v50 = vld [vmem:[#allocation10 + $0x20] sm:$0xff]  ;;  %5042 = vmatpush3.bf16.msra.mxu1 %v5039_v41 }
 0x476   :  { %v1585_v47 = vsub.f32 %v6068_v6, %v1567_v4  ;;  %4862 = vmatpush3.bf16.msra.mxu0 %v4859_v2  ;;  %v1565_v49 = vpop.permute.xlu0 %1564  ;;  %v6374_v62 = vpop.f32.mrb[122].mxu1  ;;  %4298 = vmatprep.mubr.f32.mxu0 %v5682_v30  ;;  %v149_v6 = vld [vmem:[#allocation10 + $0x28] sm:$0xff] }
 0x477   :  { %v1584_v1 = vsub.f32 %v6072_v46, %v1565_v49  ;;  %4864 = vmatprep.subr.bf16.mxu0 %v4863_v44  ;;  %2594 = vrot.lane.b32.xlu1 %v6290_v22, %s5373_s5  ;;  %v6380_v0 = vpop.f32.mrb[123].mxu1  ;;  %v5043_v30 = vpack.c.bf16 %v149_v6, %v148_v50  ;;  %v6675_v50 = vld [vmem:[#allocation23_spill] sm:$0xff] }
 0x478   :  { %2592 = vrot.lane.b32.xlu0 %v6296_v36, %s5373_s5 }
 0x479   :  { %v4867_v2 = vpack.c.bf16 %v1585_v47, %v1584_v1  ;;  %4299 = vmatmul.mubr.f32.gmra.mrb[22].mxu0 %v5687_v52  ;;  %v1571_v28 = vpop.permute.xlu1 %1570  ;;  %5044 = vmatprep.subr.bf16.mxu1 %v5043_v30 }
 0x47a   :  { %v1587_v46 = vsub.f32 %v6076_v7, %v1571_v28  ;;  %4866 = vmatpush3.bf16.msra.mxu0 %v4863_v44  ;;  %v1569_v19 = vpop.permute.xlu0 %1568  ;;  %v6386_v3 = vpop.f32.mrb[124].mxu1  ;;  %4361 = vmatprep.mubr.f32.mxu0 %v6388_v45  ;;  %v150_v7 = vld [vmem:[#allocation10 + $0x30] sm:$0xff]  ;;  %v151_v44 = vld [vmem:[#allocation10 + $0x38] sm:$0xff] }
 0x47b   :  { %6672 = vst [vmem:[#allocation42_spill] sm:$0xff] %v6386_v3  ;;  %v1586_v35 = vsub.f32 %v6080_v8, %v1569_v19  ;;  %4868 = vmatprep.subr.bf16.mxu0 %v4867_v2  ;;  %2870 = vrot.lane.b32.xlu1 %v6386_v3, %s5373_s5  ;;  %v6394_v52 = vpop.f32.mrb[125].mxu1  ;;  %v5047_v47 = vpack.c.bf16 %v151_v44, %v150_v7  ;;  %v6677_v7 = vld [vmem:[#allocation24_spill] sm:$0xff] }
 0x47c   :  { %6673 = vst [vmem:[#allocation43_spill] sm:$0xff] %v6394_v52  ;;  %2868 = vrot.lane.b32.xlu0 %v6394_v52, %s5373_s5  ;;  %5046 = vmatpush3.bf16.msra.mxu1 %v5043_v30  ;;  %v152_v30 = vld [vmem:[#allocation10 + $0x40] sm:$0xff] }
 0x47d   :  { %v4871_v4 = vpack.c.bf16 %v1587_v46, %v1586_v35  ;;  %v1599_v41 = vpop.permute.xlu1 %1598  ;;  %5048 = vmatprep.subr.bf16.mxu1 %v5047_v47  ;;  %v153_v46 = vld [vmem:[#allocation10 + $0x48] sm:$0xff] }
 0x47e   :  { %v1621_v49 = vadd.f32 %v6084_v9, %v1599_v41  ;;  %4870 = vmatpush3.bf16.msra.mxu0 %v4867_v2  ;;  %v1597_v8 = vpop.permute.xlu0 %1596  ;;  %v6399_v1 = vpop.f32.mrb[126].mxu1  ;;  %v5051_v35 = vpack.c.bf16 %v153_v46, %v152_v30 }
 0x47f   :  { %6674 = vst [vmem:[#allocation44_spill] sm:$0xff] %v6399_v1  ;;  %v1620_v6 = vadd.f32 %v1597_v8, %v6675_v50  ;;  %4872 = vmatprep.subr.bf16.mxu0 %v4871_v4  ;;  %2874 = vrot.lane.b32.xlu1 %v6399_v1, %s5373_s5  ;;  %v6404_v28 = vpop.f32.mrb[127].mxu1  ;;  %v6679_v1 = vld [vmem:[#allocation25_spill] sm:$0xff] }
 0x480   :  { %6676 = vst [vmem:[#allocation23_spill] sm:$0xff] %v6404_v28  ;;  %v1629_v19 = vsub.f32 0.0, %v1621_v49  ;;  %2872 = vrot.lane.b32.xlu0 %v6404_v28, %s5373_s5  ;;  %5050 = vmatpush3.bf16.msra.mxu1 %v5047_v47  ;;  %v154_v47 = vld [vmem:[#allocation10 + $0x50] sm:$0xff] }
 0x481   :  { %v1628_v9 = vsub.f32 0.0, %v1620_v6  ;;  %v1603_v2 = vpop.permute.xlu1 %1602  ;;  %5052 = vmatprep.subr.bf16.mxu1 %v5051_v35  ;;  %v155_v6 = vld [vmem:[#allocation10 + $0x58] sm:$0xff] }
 0x482   :  { %v1623_v44 = vadd.f32 %v6677_v7, %v1603_v2  ;;  %4874 = vmatpush3.bf16.msra.mxu0 %v4871_v4  ;;  %v1601_v41 = vpop.permute.xlu0 %1600  ;;  %v6409_v8 = vpop.f32.mrb[128].mxu1  ;;  %v5055_v46 = vpack.c.bf16 %v155_v6, %v154_v47  ;;  %v157_v47 = vld [vmem:[#allocation10 + $0x68] sm:$0xff] }
 0x483   :  { %6678 = vst [vmem:[#allocation24_spill] sm:$0xff] %v6409_v8  ;;  %v4875_v50 = vpack.c.bf16 %v1629_v19, %v1628_v9  ;;  %v1622_v52 = vadd.f32 %v1601_v41, %v6679_v1  ;;  %2878 = vrot.lane.b32.xlu1 %v6409_v8, %s5373_s5  ;;  %v6414_v49 = vpop.f32.mrb[129].mxu1  ;;  %v6681_v19 = vld [vmem:[#allocation26_spill] sm:$0xff]  ;;  %v6683_v41 = vld [vmem:[#allocation27_spill] sm:$0xff] }
 0x484   :  { %6680 = vst [vmem:[#allocation25_spill] sm:$0xff] %v6414_v49  ;;  %v1631_v28 = vsub.f32 0.0, %v1623_v44  ;;  %2876 = vrot.lane.b32.xlu0 %v6414_v49, %s5373_s5  ;;  %5054 = vmatpush3.bf16.msra.mxu1 %v5051_v35  ;;  %v156_v35 = vld [vmem:[#allocation10 + $0x60] sm:$0xff] }
 0x485   :  { %v1630_v30 = vsub.f32 0.0, %v1622_v52  ;;  %v1607_v4 = vpop.permute.xlu1 %1606  ;;  %4876 = vmatprep.subr.bf16.mxu0 %v4875_v50  ;;  %5056 = vmatprep.subr.bf16.mxu1 %v5055_v46 }
 0x486   :  { %v1625_v9 = vadd.f32 %v6681_v19, %v1607_v4  ;;  %4878 = vmatpush3.bf16.msra.mxu0 %v4875_v50  ;;  %v1605_v1 = vpop.permute.xlu0 %1604  ;;  %v6419_v2 = vpop.f32.mrb[130].mxu1  ;;  %v5059_v4 = vpack.c.bf16 %v157_v47, %v156_v35 }
 0x487   :  { %6682 = vst [vmem:[#allocation26_spill] sm:$0xff] %v6419_v2  ;;  %v4879_v7 = vpack.c.bf16 %v1631_v28, %v1630_v30  ;;  %v1624_v8 = vadd.f32 %v1605_v1, %v6683_v41  ;;  %2882 = vrot.lane.b32.xlu1 %v6419_v2, %s5373_s5  ;;  %v6424_v44 = vpop.f32.mrb[131].mxu1  ;;  %v6685_v28 = vld [vmem:[#allocation28_spill] sm:$0xff]  ;;  %v6686_v41 = vld [vmem:[#allocation29_spill] sm:$0xff] }
 0x488   :  { %6684 = vst [vmem:[#allocation27_spill] sm:$0xff] %v6424_v44  ;;  %v1633_v52 = vsub.f32 0.0, %v1625_v9  ;;  %2880 = vrot.lane.b32.xlu0 %v6424_v44, %s5373_s5  ;;  %5058 = vmatpush3.bf16.msra.mxu1 %v5055_v46  ;;  %v159_v44 = vld [vmem:[#allocation10 + $0x78] sm:$0xff] }
 0x489   :  { %v1632_v6 = vsub.f32 0.0, %v1624_v8  ;;  %v1611_v50 = vpop.permute.xlu1 %1610  ;;  %4880 = vmatprep.subr.bf16.mxu0 %v4879_v7  ;;  %5060 = vmatprep.subr.bf16.mxu1 %v5059_v4  ;;  %v158_v8 = vld [vmem:[#allocation10 + $0x70] sm:$0xff] }
 0x48a   :  { %v1627_v30 = vadd.f32 %v6685_v28, %v1611_v50  ;;  %4882 = vmatpush3.bf16.msra.mxu0 %v4879_v7  ;;  %v1609_v19 = vpop.permute.xlu0 %1608  ;;  %v5063_v35 = vpack.c.bf16 %v159_v44, %v158_v8  ;;  %v6687_v7 = vld [vmem:[#allocation30_spill] sm:$0xff]  ;;  %v6688_v50 = vld [vmem:[#allocation31_spill] sm:$0xff]  ;;  %v6450_v8 = vld [vmem:[#allocation8 + $0x10] sm:$0xff] }
 0x48b   :  { %v4883_v1 = vpack.c.bf16 %v1633_v52, %v1632_v6  ;;  %v1626_v2 = vadd.f32 %v1609_v19, %v6686_v41  ;;  %2910 = vrot.lane.b32.xlu1 %v6343_v58, %s5373_s5 }
 0x48c   :  { %v1635_v9 = vsub.f32 0.0, %v1627_v30  ;;  %2908 = vrot.lane.b32.xlu0 %v6348_v55, %s5373_s5  ;;  %5062 = vmatpush3.bf16.msra.mxu1 %v5059_v4 }
 0x48d   :  { %v1634_v49 = vsub.f32 0.0, %v1626_v2  ;;  %4884 = vmatprep.subr.bf16.mxu0 %v4883_v1  ;;  %v1887_v46 = vpop.permute.xlu1 %1886  ;;  %5064 = vmatprep.subr.bf16.mxu1 %v5063_v35 }
 0x48e   :  { %v1909_v47 = vsub.f32 %v6687_v7, %v1887_v46  ;;  %4886 = vmatpush3.bf16.msra.mxu0 %v4883_v1  ;;  %v1885_v52 = vpop.permute.xlu0 %1884  ;;  %v6446_v1 = vld [vmem:[#allocation8 + $0x8] sm:$0xff] }
 0x48f   :  { %v4887_v6 = vpack.c.bf16 %v1635_v9, %v1634_v49  ;;  %v1908_v28 = vsub.f32 %v6688_v50, %v1885_v52  ;;  %2914 = vrot.lane.b32.xlu1 %v6353_v61, %s5373_s5  ;;  %v6689_v52 = vld [vmem:[#allocation21_spill] sm:$0xff] }
 0x490   :  { %2912 = vrot.lane.b32.xlu0 %v6358_v42, %s5373_s5  ;;  %5066 = vmatpush3.bf16.msra.mxu1 %v5063_v35  ;;  %v6458_v35 = vld [vmem:[#allocation8 + $0x18] sm:$0xff] }
 0x491   :  { %v4895_v30 = vpack.c.bf16 %v1909_v47, %v1908_v28  ;;  %4888 = vmatprep.subr.bf16.mxu0 %v4887_v6  ;;  %v1891_v2 = vpop.permute.xlu1 %1890 }
 0x492   :  { %v1911_v44 = vsub.f32 %v6124_v31, %v1891_v2  ;;  %4890 = vmatpush3.bf16.msra.mxu0 %v4887_v6  ;;  %v1889_v4 = vpop.permute.xlu0 %1888  ;;  %v6690_v6 = vld [vmem:[#allocation22_spill] sm:$0xff]  ;;  %v6692_v2 = vld [vmem:[#allocation32_spill] sm:$0xff] }
 0x493   :  { %v1910_v19 = vsub.f32 %v6128_v32, %v1889_v4  ;;  %4896 = vmatprep.subr.bf16.mxu0 %v4895_v30  ;;  %2918 = vrot.lane.b32.xlu1 %v6363_v59, %s5373_s5  ;;  %v6691_v50 = vpack.i.bf16 %v6689_v52, %v6690_v6 }
 0x494   :  { %2916 = vrot.lane.b32.xlu0 %v6368_v38, %s5373_s5 }
 0x495   :  { %v4899_v49 = vpack.c.bf16 %v1911_v44, %v1910_v19  ;;  %4362 = vmatmul.mubr.f32.vlgmr.msra.gmra.mrb[24].mxu0 %v6446_v1  ;;  %v1895_v41 = vpop.permute.xlu1 %1894  ;;  %v6693_v19 = vld [vmem:[#allocation33_spill] sm:$0xff] }
 0x496   :  { %v1913_v9 = vsub.f32 %v6132_v56, %v1895_v41  ;;  %4898 = vmatpush3.bf16.msra.mxu0 %v4895_v30  ;;  %v1893_v31 = vpop.permute.xlu0 %1892  ;;  %4364 = vmatprep.mubr.f32.mxu0 %v6450_v8 }
 0x497   :  { %v1912_v32 = vsub.f32 %v6136_v60, %v1893_v31  ;;  %4900 = vmatprep.subr.bf16.mxu0 %v4899_v49  ;;  %2922 = vrot.lane.b32.xlu1 %v6374_v62, %s5373_s5  ;;  %v6694_v31 = vld [vmem:[#allocation34_spill] sm:$0xff] }
 0x498   :  { %2920 = vrot.lane.b32.xlu0 %v6380_v0, %s5373_s5 }
 0x499   :  { %v4903_v46 = vpack.c.bf16 %v1913_v9, %v1912_v32  ;;  %4365 = vmatmul.mubr.f32.gmra.mrb[26].mxu0 %v6458_v35  ;;  %v1899_v56 = vpop.permute.xlu1 %1898 }
 0x49a   :  { %v1915_v7 = vsub.f32 %v6140_v33, %v1899_v56  ;;  %4902 = vmatpush3.bf16.msra.mxu0 %v4899_v49  ;;  %v1897_v47 = vpop.permute.xlu0 %1896  ;;  %4427 = vmatprep.mubr.f32.mxu0 %v6388_v45 }
 0x49b   :  { %v1914_v60 = vsub.f32 %v6144_v17, %v1897_v47  ;;  %4904 = vmatprep.subr.bf16.mxu0 %v4903_v46  ;;  %v6695_v47 = vld [vmem:[#allocation35_spill] sm:$0xff] }
 0x49c   :  { %5110 = vrot.lane.b32.xlu0 %v6691_v50, %s5373_s5  ;;  %v6696_v50 = vld [vmem:[#allocation36_spill] sm:$0xff] }
 0x49d   :  { %v4907_v28 = vpack.c.bf16 %v1915_v7, %v1914_v60  ;;  %v1927_v30 = vpop.permute.xlu1 %1926 }
 0x49e   :  { %v1949_v44 = vadd.f32 %v6692_v2, %v1927_v30  ;;  %4906 = vmatpush3.bf16.msra.mxu0 %v4903_v46  ;;  %v1925_v4 = vpop.permute.xlu0 %1924 }
 0x49f   :  { %v1948_v33 = vadd.f32 %v1925_v4, %v6693_v19  ;;  %4908 = vmatprep.subr.bf16.mxu0 %v4907_v28  ;;  %v6697_v4 = vld [vmem:[#allocation37_spill] sm:$0xff] }
 0x4a0   :  { %v1957_v49 = vsub.f32 0.0, %v1949_v44 }
 0x4a1   :  { %v1956_v41 = vsub.f32 0.0, %v1948_v33  ;;  %v1931_v9 = vpop.permute.xlu1 %1930 }
 0x4a2   :  { %v1951_v17 = vadd.f32 %v6694_v31, %v1931_v9  ;;  %4910 = vmatpush3.bf16.msra.mxu0 %v4907_v28  ;;  %v1929_v32 = vpop.permute.xlu0 %1928  ;;  %v6698_v28 = vld [vmem:[#allocation38_spill] sm:$0xff]  ;;  %v6699_v31 = vld [vmem:[#allocation39_spill] sm:$0xff] }
 0x4a3   :  { %v4911_v56 = vpack.c.bf16 %v1957_v49, %v1956_v41  ;;  %v1950_v52 = vadd.f32 %v1929_v32, %v6695_v47 }
 0x4a4   :  { %v1959_v6 = vsub.f32 0.0, %v1951_v17 }
 0x4a5   :  { %v1958_v7 = vsub.f32 0.0, %v1950_v52  ;;  %v1935_v60 = vpop.permute.xlu1 %1934  ;;  %4912 = vmatprep.subr.bf16.mxu0 %v4911_v56 }
 0x4a6   :  { %v1953_v46 = vadd.f32 %v6696_v50, %v1935_v60  ;;  %4914 = vmatpush3.bf16.msra.mxu0 %v4911_v56  ;;  %v1933_v30 = vpop.permute.xlu0 %1932 }
 0x4a7   :  { %v4915_v2 = vpack.c.bf16 %v1959_v6, %v1958_v7  ;;  %v1952_v44 = vadd.f32 %v1933_v30, %v6697_v4 }
 0x4a8   :  { %v1961_v19 = vsub.f32 0.0, %v1953_v46 }
 0x4a9   :  { %v1960_v33 = vsub.f32 0.0, %v1952_v44  ;;  %v1939_v3 = vpop.permute.xlu1 %1938  ;;  %4916 = vmatprep.subr.bf16.mxu0 %v4915_v2 }
 0x4aa   :  { %v1955_v9 = vadd.f32 %v6698_v28, %v1939_v3  ;;  %4918 = vmatpush3.bf16.msra.mxu0 %v4915_v2  ;;  %v1937_v49 = vpop.permute.xlu0 %1936 }
 0x4ab   :  { %v4919_v41 = vpack.c.bf16 %v1961_v19, %v1960_v33  ;;  %v1954_v17 = vadd.f32 %v1937_v49, %v6699_v31 }
 0x4ac   :  { %v1963_v32 = vsub.f32 0.0, %v1955_v9 }
 0x4ad   :  { %v1962_v47 = vsub.f32 0.0, %v1954_v17  ;;  %4920 = vmatprep.subr.bf16.mxu0 %v4919_v41  ;;  %v2215_v52 = vpop.permute.xlu1 %2214 }
 0x4ae   :  { %v2237_v56 = vsub.f32 %v6180_v15, %v2215_v52  ;;  %4922 = vmatpush3.bf16.msra.mxu0 %v4919_v41  ;;  %v2213_v6 = vpop.permute.xlu0 %2212 }
 0x4af   :  { %v4923_v7 = vpack.c.bf16 %v1963_v32, %v1962_v47  ;;  %v2236_v60 = vsub.f32 %v6184_v14, %v2213_v6 }
 0x4b1   :  { %v4931_v50 = vpack.c.bf16 %v2237_v56, %v2236_v60  ;;  %4924 = vmatprep.subr.bf16.mxu0 %v4923_v7  ;;  %v2219_v46 = vpop.permute.xlu1 %2218 }
 0x4b2   :  { %v2239_v3 = vsub.f32 %v6189_v5, %v2219_v46  ;;  %4926 = vmatpush3.bf16.msra.mxu0 %v4923_v7  ;;  %v2217_v30 = vpop.permute.xlu0 %2216  ;;  %v6701_v7 = vld [vmem:[#allocation41_spill] sm:$0xff] }
 0x4b3   :  { %v2238_v2 = vsub.f32 %v6194_v16, %v2217_v30  ;;  %4932 = vmatprep.subr.bf16.mxu0 %v4931_v50 }
 0x4b5   :  { %v4935_v4 = vpack.c.bf16 %v2239_v3, %v2238_v2  ;;  %4428 = vmatmul.mubr.f32.vlgmr.msra.gmra.mrb[28].mxu0 %v6446_v1  ;;  %v2223_v44 = vpop.permute.xlu1 %2222 }
 0x4b6   :  { %v2241_v15 = vsub.f32 %v6199_v10, %v2223_v44  ;;  %4934 = vmatpush3.bf16.msra.mxu0 %v4931_v50  ;;  %v2221_v19 = vpop.permute.xlu0 %2220  ;;  %4430 = vmatprep.mubr.f32.mxu0 %v6450_v8 }
 0x4b7   :  { %v2240_v14 = vsub.f32 %v6204_v18, %v2221_v19  ;;  %4936 = vmatprep.subr.bf16.mxu0 %v4935_v4 }
 0x4b9   :  { %v4939_v33 = vpack.c.bf16 %v2241_v15, %v2240_v14  ;;  %4431 = vmatmul.mubr.f32.gmra.mrb[30].mxu0 %v6458_v35  ;;  %v2227_v5 = vpop.permute.xlu1 %2226 }
 0x4ba   :  { %v2243_v16 = vsub.f32 %v6209_v11, %v2227_v5  ;;  %4938 = vmatpush3.bf16.msra.mxu0 %v4935_v4  ;;  %v2225_v28 = vpop.permute.xlu0 %2224  ;;  %4493 = vmatprep.mubr.f32.mxu0 %v6388_v45  ;;  %v6700_v11 = vld [vmem:[#allocation40_spill] sm:$0xff] }
 0x4bb   :  { %v2242_v9 = vsub.f32 %v6214_v21, %v2225_v28  ;;  %4940 = vmatprep.subr.bf16.mxu0 %v4939_v33 }
 0x4bd   :  { %v4943_v10 = vpack.c.bf16 %v2243_v16, %v2242_v9  ;;  %v2255_v49 = vpop.permute.xlu1 %2254 }
 0x4be   :  { %v2277_v41 = vadd.f32 %v6219_v63, %v2255_v49  ;;  %4942 = vmatpush3.bf16.msra.mxu0 %v4939_v33  ;;  %v2253_v18 = vpop.permute.xlu0 %2252 }
 0x4bf   :  { %v2276_v31 = vadd.f32 %v2253_v18, %v6224_v23  ;;  %4944 = vmatprep.subr.bf16.mxu0 %v4943_v10 }
 0x4c0   :  { %v2285_v17 = vsub.f32 0.0, %v2277_v41 }
 0x4c1   :  { %v2284_v32 = vsub.f32 0.0, %v2276_v31  ;;  %v2259_v47 = vpop.permute.xlu1 %2258 }
 0x4c2   :  { %v2279_v52 = vadd.f32 %v6700_v11, %v2259_v47  ;;  %4946 = vmatpush3.bf16.msra.mxu0 %v4943_v10  ;;  %v2257_v56 = vpop.permute.xlu0 %2256 }
 0x4c3   :  { %v4947_v6 = vpack.c.bf16 %v2285_v17, %v2284_v32  ;;  %v2278_v21 = vadd.f32 %v2257_v56, %v6701_v7 }
 0x4c4   :  { %v2287_v60 = vsub.f32 0.0, %v2279_v52 }
 0x4c5   :  { %v2286_v50 = vsub.f32 0.0, %v2278_v21  ;;  %v2263_v46 = vpop.permute.xlu1 %2262  ;;  %4948 = vmatprep.subr.bf16.mxu0 %v4947_v6 }
 0x4c6   :  { %v2281_v63 = vadd.f32 %v6239_v12, %v2263_v46  ;;  %4950 = vmatpush3.bf16.msra.mxu0 %v4947_v6  ;;  %v2261_v3 = vpop.permute.xlu0 %2260 }
 0x4c7   :  { %v4951_v23 = vpack.c.bf16 %v2287_v60, %v2286_v50  ;;  %v2280_v30 = vadd.f32 %v2261_v3, %v6244_v24 }
 0x4c8   :  { %v2289_v2 = vsub.f32 0.0, %v2281_v63 }
 0x4c9   :  { %v2288_v4 = vsub.f32 0.0, %v2280_v30  ;;  %v2267_v44 = vpop.permute.xlu1 %2266  ;;  %4952 = vmatprep.subr.bf16.mxu0 %v4951_v23 }
 0x4ca   :  { %v2283_v15 = vadd.f32 %v6249_v25, %v2267_v44  ;;  %4954 = vmatpush3.bf16.msra.mxu0 %v4951_v23  ;;  %v2265_v19 = vpop.permute.xlu0 %2264 }
 0x4cb   :  { %v4955_v14 = vpack.c.bf16 %v2289_v2, %v2288_v4  ;;  %v2282_v33 = vadd.f32 %v2265_v19, %v6254_v48 }
 0x4cc   :  { %v2291_v5 = vsub.f32 0.0, %v2283_v15 }
 0x4cd   :  { %v2290_v16 = vsub.f32 0.0, %v2282_v33  ;;  %4956 = vmatprep.subr.bf16.mxu0 %v4955_v14  ;;  %v2543_v12 = vpop.permute.xlu1 %2542 }
 0x4ce   :  { %v2565_v28 = vsub.f32 %v6259_v51, %v2543_v12  ;;  %4958 = vmatpush3.bf16.msra.mxu0 %v4955_v14  ;;  %v2541_v9 = vpop.permute.xlu0 %2540 }
 0x4cf   :  { %v4959_v24 = vpack.c.bf16 %v2291_v5, %v2290_v16  ;;  %v2564_v10 = vsub.f32 %v6264_v53, %v2541_v9 }
 0x4d1   :  { %v4967_v49 = vpack.c.bf16 %v2565_v28, %v2564_v10  ;;  %4960 = vmatprep.subr.bf16.mxu0 %v4959_v24  ;;  %v2547_v41 = vpop.permute.xlu1 %2546 }
 0x4d2   :  { %v2567_v25 = vsub.f32 %v6269_v27, %v2547_v41  ;;  %4962 = vmatpush3.bf16.msra.mxu0 %v4959_v24  ;;  %v2545_v18 = vpop.permute.xlu0 %2544 }
 0x4d3   :  { %v2566_v48 = vsub.f32 %v6274_v13, %v2545_v18  ;;  %4968 = vmatprep.subr.bf16.mxu0 %v4967_v49 }
 0x4d5   :  { %v4971_v31 = vpack.c.bf16 %v2567_v25, %v2566_v48  ;;  %4494 = vmatmul.mubr.f32.vlgmr.msra.gmra.mrb[32].mxu0 %v6446_v1  ;;  %v2551_v17 = vpop.permute.xlu1 %2550 }
 0x4d6   :  { %v2569_v51 = vsub.f32 %v6279_v20, %v2551_v17  ;;  %4970 = vmatpush3.bf16.msra.mxu0 %v4967_v49  ;;  %v2549_v32 = vpop.permute.xlu0 %2548  ;;  %4496 = vmatprep.mubr.f32.mxu0 %v6450_v8 }
 0x4d7   :  { %v2568_v53 = vsub.f32 %v6284_v29, %v2549_v32  ;;  %4972 = vmatprep.subr.bf16.mxu0 %v4971_v31  ;;  %v6702_v32 = vld [vmem:[#allocation42_spill] sm:$0xff] }
 0x4d9   :  { %v4975_v47 = vpack.c.bf16 %v2569_v51, %v2568_v53  ;;  %4497 = vmatmul.mubr.f32.gmra.mrb[34].mxu0 %v6458_v35  ;;  %v2555_v27 = vpop.permute.xlu1 %2554 }
 0x4da   :  { %v2571_v13 = vsub.f32 %v6290_v22, %v2555_v27  ;;  %4974 = vmatpush3.bf16.msra.mxu0 %v4971_v31  ;;  %v2553_v11 = vpop.permute.xlu0 %2552  ;;  %4559 = vmatprep.mubr.f32.mxu0 %v6388_v45 }
 0x4db   :  { %v2570_v52 = vsub.f32 %v6296_v36, %v2553_v11  ;;  %4976 = vmatprep.subr.bf16.mxu0 %v4975_v47 }
 0x4dd   :  { %v4979_v20 = vpack.c.bf16 %v2571_v13, %v2570_v52  ;;  %v2583_v56 = vpop.permute.xlu1 %2582 }
 0x4de   :  { %v2605_v6 = vadd.f32 %v6302_v37, %v2583_v56  ;;  %4978 = vmatpush3.bf16.msra.mxu0 %v4975_v47  ;;  %v2581_v29 = vpop.permute.xlu0 %2580  ;;  %v6703_v47 = vld [vmem:[#allocation43_spill] sm:$0xff] }
 0x4df   :  { %v2604_v7 = vadd.f32 %v2581_v29, %v6308_v34  ;;  %4980 = vmatprep.subr.bf16.mxu0 %v4979_v20 }
 0x4e0   :  { %v2613_v21 = vsub.f32 0.0, %v2605_v6  ;;  %v6705_v6 = vld [vmem:[#allocation23_spill] sm:$0xff] }
 0x4e1   :  { %v2612_v60 = vsub.f32 0.0, %v2604_v7  ;;  %v2587_v50 = vpop.permute.xlu1 %2586 }
 0x4e2   :  { %v2607_v22 = vadd.f32 %v6313_v39, %v2587_v50  ;;  %4982 = vmatpush3.bf16.msra.mxu0 %v4979_v20  ;;  %v2585_v46 = vpop.permute.xlu0 %2584 }
 0x4e3   :  { %v4983_v63 = vpack.c.bf16 %v2613_v21, %v2612_v60  ;;  %v2606_v36 = vadd.f32 %v2585_v46, %v6318_v43  ;;  %v6706_v60 = vld [vmem:[#allocation24_spill] sm:$0xff] }
 0x4e4   :  { %v2615_v3 = vsub.f32 0.0, %v2607_v22 }
 0x4e5   :  { %v2614_v23 = vsub.f32 0.0, %v2606_v36  ;;  %v2591_v30 = vpop.permute.xlu1 %2590  ;;  %4984 = vmatprep.subr.bf16.mxu0 %v4983_v63 }
 0x4e6   :  { %v2609_v37 = vadd.f32 %v6323_v26, %v2591_v30  ;;  %4986 = vmatpush3.bf16.msra.mxu0 %v4983_v63  ;;  %v2589_v2 = vpop.permute.xlu0 %2588  ;;  %v6707_v63 = vld [vmem:[#allocation25_spill] sm:$0xff] }
 0x4e7   :  { %v4987_v34 = vpack.c.bf16 %v2615_v3, %v2614_v23  ;;  %v2608_v4 = vadd.f32 %v2589_v2, %v6328_v54 }
 0x4e8   :  { %v2617_v44 = vsub.f32 0.0, %v2609_v37  ;;  %v6708_v37 = vld [vmem:[#allocation26_spill] sm:$0xff] }
 0x4e9   :  { %v2616_v15 = vsub.f32 0.0, %v2608_v4  ;;  %v2595_v19 = vpop.permute.xlu1 %2594  ;;  %4988 = vmatprep.subr.bf16.mxu0 %v4987_v34 }
 0x4ea   :  { %v2611_v39 = vadd.f32 %v6333_v57, %v2595_v19  ;;  %4990 = vmatpush3.bf16.msra.mxu0 %v4987_v34  ;;  %v2593_v14 = vpop.permute.xlu0 %2592 }
 0x4eb   :  { %v4991_v43 = vpack.c.bf16 %v2617_v44, %v2616_v15  ;;  %v2610_v33 = vadd.f32 %v2593_v14, %v6338_v40  ;;  %v6709_v44 = vld [vmem:[#allocation27_spill] sm:$0xff]  ;;  %v161_v14 = vld [vmem:[#allocation11 + $0x8] sm:$0xff] }
 0x4ec   :  { %v2619_v5 = vsub.f32 0.0, %v2611_v39  ;;  %v160_v39 = vld [vmem:[#allocation11] sm:$0xff] }
 0x4ed   :  { %v2618_v16 = vsub.f32 0.0, %v2610_v33  ;;  %4992 = vmatprep.subr.bf16.mxu0 %v4991_v43  ;;  %v2871_v26 = vpop.permute.xlu1 %2870 }
 0x4ee   :  { %v2893_v12 = vsub.f32 %v6343_v58, %v2871_v26  ;;  %4994 = vmatpush3.bf16.msra.mxu0 %v4991_v43  ;;  %v2869_v28 = vpop.permute.xlu0 %2868 }
 0x4ef   :  { %v4995_v54 = vpack.c.bf16 %v2619_v5, %v2618_v16  ;;  %v2892_v9 = vsub.f32 %v6348_v55, %v2869_v28  ;;  %v162_v28 = vld [vmem:[#allocation11 + $0x10] sm:$0xff] }
 0x4f1   :  { %v5003_v24 = vpack.c.bf16 %v2893_v12, %v2892_v9  ;;  %4996 = vmatprep.subr.bf16.mxu0 %v4995_v54  ;;  %v2875_v10 = vpop.permute.xlu1 %2874  ;;  %v5067_v12 = vpack.c.bf16 %v161_v14, %v160_v39  ;;  %v6710_v9 = vld [vmem:[#allocation20_spill] sm:$0xff] }
 0x4f2   :  { %v2895_v57 = vsub.f32 %v6353_v61, %v2875_v10  ;;  %4998 = vmatpush3.bf16.msra.mxu0 %v4995_v54  ;;  %v2873_v49 = vpop.permute.xlu0 %2872  ;;  %v163_v54 = vld [vmem:[#allocation11 + $0x18] sm:$0xff]  ;;  %v6711_v10 = vld [vmem:[#allocation19_spill] sm:$0xff] }
 0x4f3   :  { %v2894_v40 = vsub.f32 %v6358_v42, %v2873_v49  ;;  %5004 = vmatprep.subr.bf16.mxu0 %v5003_v24  ;;  %v5071_v49 = vpack.c.bf16 %v163_v54, %v162_v28 }
 0x4f5   :  { %v5007_v41 = vpack.c.bf16 %v2895_v57, %v2894_v40  ;;  %4560 = vmatmul.mubr.f32.vlgmr.msra.gmra.mrb[36].mxu0 %v6446_v1  ;;  %v2879_v25 = vpop.permute.xlu1 %2878  ;;  %v164_v40 = vld [vmem:[#allocation11 + $0x20] sm:$0xff] }
 0x4f6   :  { %v2897_v58 = vsub.f32 %v6363_v59, %v2879_v25  ;;  %5006 = vmatpush3.bf16.msra.mxu0 %v5003_v24  ;;  %v2877_v18 = vpop.permute.xlu0 %2876  ;;  %4562 = vmatprep.mubr.f32.mxu0 %v6450_v8 }
 0x4f7   :  { %v2896_v55 = vsub.f32 %v6368_v38, %v2877_v18  ;;  %5008 = vmatprep.subr.bf16.mxu0 %v5007_v41  ;;  %v167_v18 = vld [vmem:[#allocation11 + $0x38] sm:$0xff] }
 0x4f9   :  { %v5011_v48 = vpack.c.bf16 %v2897_v58, %v2896_v55  ;;  %4563 = vmatmul.mubr.f32.gmra.mrb[38].mxu0 %v6458_v35  ;;  %v2883_v61 = vpop.permute.xlu1 %2882  ;;  %v166_v58 = vld [vmem:[#allocation11 + $0x30] sm:$0xff] }
 0x4fa   :  { %v2899_v42 = vsub.f32 %v6374_v62, %v2883_v61  ;;  %5010 = vmatpush3.bf16.msra.mxu0 %v5007_v41  ;;  %v2881_v31 = vpop.permute.xlu0 %2880  ;;  %4625 = vmatprep.mubr.f32.mxu0 %v6388_v45  ;;  %v6704_v62 = vld [vmem:[#allocation44_spill] sm:$0xff]  ;;  %v5079_v55 = vpack.c.bf16 %v167_v18, %v166_v58 }
 0x4fb   :  { %v2898_v17 = vsub.f32 %v6380_v0, %v2881_v31  ;;  %5012 = vmatprep.subr.bf16.mxu0 %v5011_v48  ;;  %v165_v41 = vld [vmem:[#allocation11 + $0x28] sm:$0xff]  ;;  %v170_v31 = vld [vmem:[#allocation11 + $0x50] sm:$0xff] }
 0x4fc   :  { %v5075_v25 = vpack.c.bf16 %v165_v41, %v164_v40  ;;  %v169_v61 = vld [vmem:[#allocation11 + $0x48] sm:$0xff] }
 0x4fd   :  { %v5015_v59 = vpack.c.bf16 %v2899_v42, %v2898_v17  ;;  %v2911_v51 = vpop.permute.xlu1 %2910  ;;  %v172_v17 = vld [vmem:[#allocation11 + $0x60] sm:$0xff] }
 0x4fe   :  { %v2933_v53 = vadd.f32 %v6702_v32, %v2911_v51  ;;  %5014 = vmatpush3.bf16.msra.mxu0 %v5011_v48  ;;  %v2909_v38 = vpop.permute.xlu0 %2908  ;;  %v168_v48 = vld [vmem:[#allocation11 + $0x40] sm:$0xff]  ;;  %v174_v32 = vld [vmem:[#allocation11 + $0x70] sm:$0xff] }
 0x4ff   :  { %v2932_v27 = vadd.f32 %v2909_v38, %v6703_v47  ;;  %5016 = vmatprep.subr.bf16.mxu0 %v5015_v59  ;;  %v5083_v42 = vpack.c.bf16 %v169_v61, %v168_v48 }
 0x500   :  { %v2941_v13 = vsub.f32 0.0, %v2933_v53  ;;  %v175_v53 = vld [vmem:[#allocation11 + $0x78] sm:$0xff] }
 0x501   :  { %v2940_v11 = vsub.f32 0.0, %v2932_v27  ;;  %v2915_v52 = vpop.permute.xlu1 %2914  ;;  %v5095_v47 = vpack.c.bf16 %v175_v53, %v174_v32 }
 0x502   :  { %v2935_v20 = vadd.f32 %v6704_v62, %v2915_v52  ;;  %5018 = vmatpush3.bf16.msra.mxu0 %v5015_v59  ;;  %v2913_v56 = vpop.permute.xlu0 %2912  ;;  %v173_v59 = vld [vmem:[#allocation11 + $0x68] sm:$0xff] }
 0x503   :  { %v5019_v45 = vpack.c.bf16 %v2941_v13, %v2940_v11  ;;  %v2934_v0 = vadd.f32 %v2913_v56, %v6705_v6  ;;  %v5091_v51 = vpack.c.bf16 %v173_v59, %v172_v17  ;;  %v5186_v59 = vld [vmem:[#allocation2] sm:$0xff] }
 0x504   :  { %v2943_v29 = vsub.f32 0.0, %v2935_v20 }
 0x505   :  { %v2942_v7 = vsub.f32 0.0, %v2934_v0  ;;  %v2919_v21 = vpop.permute.xlu1 %2918  ;;  %5020 = vmatprep.subr.bf16.mxu0 %v5019_v45 }
 0x506   :  { %v2937_v50 = vadd.f32 %v6706_v60, %v2919_v21  ;;  %5022 = vmatpush3.bf16.msra.mxu0 %v5019_v45  ;;  %v2917_v22 = vpop.permute.xlu0 %2916 }
 0x507   :  { %v5023_v46 = vpack.c.bf16 %v2943_v29, %v2942_v7  ;;  %v2936_v36 = vadd.f32 %v2917_v22, %v6707_v63 }
 0x508   :  { %v2945_v3 = vsub.f32 0.0, %v2937_v50 }
 0x509   :  { %v2944_v23 = vsub.f32 0.0, %v2936_v36  ;;  %v2923_v30 = vpop.permute.xlu1 %2922  ;;  %5024 = vmatprep.subr.bf16.mxu0 %v5023_v46 }
 0x50a   :  { %v2939_v2 = vadd.f32 %v6708_v37, %v2923_v30  ;;  %5026 = vmatpush3.bf16.msra.mxu0 %v5023_v46  ;;  %v2921_v34 = vpop.permute.xlu0 %2920 }
 0x50b   :  { %v5027_v4 = vpack.c.bf16 %v2945_v3, %v2944_v23  ;;  %v2938_v15 = vadd.f32 %v2921_v34, %v6709_v44 }
 0x50c   :  { %v2947_v19 = vsub.f32 0.0, %v2939_v2 }
 0x50d   :  { %v2946_v43 = vsub.f32 0.0, %v2938_v15  ;;  %5028 = vmatprep.subr.bf16.mxu0 %v5027_v4 }
 0x50e   :  { %5030 = vmatpush3.bf16.msra.mxu0 %v5027_v4  ;;  %v5111_v33 = vpop.permute.xlu0 %5110 }
 0x50f   :  { %v5031_v5 = vpack.c.bf16 %v2947_v19, %v2946_v43  ;;  %v5113_v16 = vunpack.i.h.bf16 %v5111_v33  ;;  %v5112_v26 = vunpack.i.l.bf16 %v5111_v33 }
 0x511   :  { %5032 = vmatprep.subr.bf16.mxu0 %v5031_v5  ;;  %v745_v24 = vsel %vm744_vm1, %v6710_v9, %v5112_v26  ;;  %v746_v57 = vsel %vm744_vm1, %v6711_v10, %v5113_v16 }
 0x512   :  { %5034 = vmatpush3.bf16.msra.mxu0 %v5031_v5  ;;  %4663 = vmatprep.mubr.f32.mxu1 %v745_v24 }
 0x513   :  { %4664 = vmatmul.mubr.f32.vlgmr.msra.gmra.mrb[132].mxu1 %v746_v57  ;;  %5068 = vmatprep.subr.bf16.mxu0 %v5067_v12 }
 0x515   :  { %4626 = vmatmul.mubr.f32.vlgmr.msra.gmra.mrb[40].mxu0 %v6446_v1  ;;  %v171_v1 = vld [vmem:[#allocation11 + $0x58] sm:$0xff] }
 0x516   :  { %5070 = vmatpush3.bf16.msra.mxu0 %v5067_v12  ;;  %4628 = vmatprep.mubr.f32.mxu0 %v6450_v8  ;;  %v5087_v8 = vpack.c.bf16 %v171_v1, %v170_v31  ;;  %v5185_v31 = vld [vmem:[#allocation2 + $0x8] sm:$0xff] }
 0x517   :  { %5072 = vmatprep.subr.bf16.mxu0 %v5071_v49 }
 0x519   :  { %4629 = vmatmul.mubr.f32.gmra.mrb[42].mxu0 %v6458_v35 }
 0x51a   :  { %5074 = vmatpush3.bf16.msra.mxu0 %v5071_v49  ;;  %4719 = vmatprep.mubr.f32.mxu0 %v745_v24 }
 0x51b   :  { %5076 = vmatprep.subr.bf16.mxu0 %v5075_v25 }
 0x51e   :  { %5078 = vmatpush3.bf16.msra.mxu0 %v5075_v25 }
 0x51f   :  { %5080 = vmatprep.subr.bf16.mxu0 %v5079_v55 }
 0x522   :  { %5082 = vmatpush3.bf16.msra.mxu0 %v5079_v55 }
 0x523   :  { %5084 = vmatprep.subr.bf16.mxu0 %v5083_v42 }
 0x526   :  { %5086 = vmatpush3.bf16.msra.mxu0 %v5083_v42 }
 0x527   :  { %5088 = vmatprep.subr.bf16.mxu0 %v5087_v8 }
 0x528   :  { %v4231_v35 = vpop.f32.mrb[16].mxu0 }
 0x529   :  { %v1046_v38 = vpop.f32.mrb[17].mxu0 }
 0x52a   :  { %5090 = vmatpush3.bf16.msra.mxu0 %v5087_v8 }
 0x52b   :  { %5092 = vmatprep.subr.bf16.mxu0 %v5091_v51 }
 0x52c   :  { %v4234_v27 = vpop.f32.mrb[18].mxu0 }
 0x52d   :  { %v1056_v13 = vpop.f32.mrb[19].mxu0 }
 0x52e   :  { %v5114_v11 = vpack.i.bf16 %v4234_v27, %v1056_v13  ;;  %5094 = vmatpush3.bf16.msra.mxu0 %v5091_v51 }
 0x52f   :  { %5096 = vmatprep.subr.bf16.mxu0 %v5095_v47 }
 0x530   :  { %5115 = vrot.lane.b32.xlu1 %v5114_v11, %s5373_s5 }
 0x532   :  { %5098 = vmatpush3.bf16.msra.mxu0 %v5095_v47 }
 0x535   :  { %4720 = vmatmul.mubr.f32.vlgmr.msra.gmra.mrb[44].mxu0 %v746_v57 }
 0x548   :  { %v4297_v52 = vpop.f32.mrb[20].mxu0 }
 0x549   :  { %v1374_v62 = vpop.f32.mrb[21].mxu0 }
 0x54c   :  { %v4300_v20 = vpop.f32.mrb[22].mxu0 }
 0x54d   :  { %v1384_v56 = vpop.f32.mrb[23].mxu0 }
 0x54e   :  { %v5119_v45 = vpack.i.bf16 %v4300_v20, %v1384_v56 }
 0x550   :  { %5120 = vrot.lane.b32.xlu0 %v5119_v45, %s5373_s5 }
 0x568   :  { %v4363_v6 = vpop.f32.mrb[24].mxu0 }
 0x569   :  { %v1702_v0 = vpop.f32.mrb[25].mxu0 }
 0x56c   :  { %v4366_v29 = vpop.f32.mrb[26].mxu0 }
 0x56d   :  { %v1712_v7 = vpop.f32.mrb[27].mxu0 }
 0x56e   :  { %v5124_v21 = vpack.i.bf16 %v4366_v29, %v1712_v7 }
 0x570   :  { %5125 = vrot.lane.b32.xlu1 %v5124_v21, %s5373_s5 }
 0x588   :  { %v4429_v60 = vpop.f32.mrb[28].mxu0 }
 0x589   :  { %v2030_v50 = vpop.f32.mrb[29].mxu0 }
 0x58c   :  { %v4432_v22 = vpop.f32.mrb[30].mxu0 }
 0x58d   :  { %v2040_v46 = vpop.f32.mrb[31].mxu0 }
 0x58e   :  { %v5129_v63 = vpack.i.bf16 %v4432_v22, %v2040_v46 }
 0x590   :  { %5130 = vrot.lane.b32.xlu0 %v5129_v63, %s5373_s5 }
 0x5a2   :  { %v5116_v36 = vpop.permute.xlu1 %5115 }
 0x5a3   :  { %v5118_v3 = vunpack.i.h.bf16 %v5116_v36  ;;  %v5117_v23 = vunpack.i.l.bf16 %v5116_v36 }
 0x5a5   :  { %v1073_v30 = vsel %vm744_vm1, %v1046_v38, %v5117_v23  ;;  %v1074_v37 = vsel %vm744_vm1, %v4231_v35, %v5118_v3 }
 0x5a6   :  { %4666 = vmatprep.mubr.f32.mxu1 %v1073_v30  ;;  %4722 = vmatprep.mubr.f32.mxu0 %v1073_v30 }
 0x5a7   :  { %4667 = vmatmul.mubr.f32.gmra.mrb[134].mxu1 %v1074_v37  ;;  %4723 = vmatmul.mubr.f32.gmra.mrb[46].mxu0 %v1074_v37 }
 0x5a8   :  { %v6549_v2 = vpop.f32.mrb[32].mxu0 }
 0x5a9   :  { %v6551_v34 = vpop.f32.mrb[33].mxu0 }
 0x5ac   :  { %v4498_v4 = vpop.f32.mrb[34].mxu0 }
 0x5ad   :  { %v2368_v44 = vpop.f32.mrb[35].mxu0 }
 0x5ae   :  { %v5134_v15 = vpack.i.bf16 %v4498_v4, %v2368_v44 }
 0x5b0   :  { %5135 = vrot.lane.b32.xlu1 %v5134_v15, %s5373_s5 }
 0x5c2   :  { %v5121_v19 = vpop.permute.xlu0 %5120 }
 0x5c3   :  { %v5123_v39 = vunpack.i.h.bf16 %v5121_v19  ;;  %v5122_v14 = vunpack.i.l.bf16 %v5121_v19 }
 0x5c5   :  { %v1401_v43 = vsel %vm744_vm1, %v1374_v62, %v5122_v14  ;;  %v1402_v33 = vsel %vm744_vm1, %v4297_v52, %v5123_v39  ;;  %v5187_v14 = vld [vmem:[#allocation2 + $0x18] sm:$0xff] }
 0x5c6   :  { %4669 = vmatprep.mubr.f32.mxu1 %v1401_v43  ;;  %4725 = vmatprep.mubr.f32.mxu0 %v1401_v43 }
 0x5c7   :  { %4670 = vmatmul.mubr.f32.gmra.mrb[136].mxu1 %v1402_v33  ;;  %4726 = vmatmul.mubr.f32.gmra.mrb[48].mxu0 %v1402_v33 }
 0x5c8   :  { %v6556_v5 = vpop.f32.mrb[36].mxu0 }
 0x5c9   :  { %v6558_v16 = vpop.f32.mrb[37].mxu0 }
 0x5cc   :  { %v4564_v26 = vpop.f32.mrb[38].mxu0 }
 0x5cd   :  { %v2696_v12 = vpop.f32.mrb[39].mxu0 }
 0x5ce   :  { %v5139_v28 = vpack.i.bf16 %v4564_v26, %v2696_v12 }
 0x5d0   :  { %5140 = vrot.lane.b32.xlu0 %v5139_v28, %s5373_s5 }
 0x5e2   :  { %v5126_v54 = vpop.permute.xlu1 %5125 }
 0x5e3   :  { %v5128_v9 = vunpack.i.h.bf16 %v5126_v54  ;;  %v5127_v24 = vunpack.i.l.bf16 %v5126_v54 }
 0x5e5   :  { %v1729_v10 = vsel %vm744_vm1, %v1702_v0, %v5127_v24  ;;  %v1730_v57 = vsel %vm744_vm1, %v4363_v6, %v5128_v9 }
 0x5e6   :  { %v4665_v49 = vpop.f32.mrb[132].mxu1  ;;  %4672 = vmatprep.mubr.f32.mxu1 %v1729_v10  ;;  %4728 = vmatprep.mubr.f32.mxu0 %v1729_v10 }
 0x5e7   :  { %v3109_v40 = vpop.f32.mrb[133].mxu1  ;;  %4673 = vmatmul.mubr.f32.gmra.mrb[138].mxu1 %v1730_v57  ;;  %4729 = vmatmul.mubr.f32.gmra.mrb[50].mxu0 %v1730_v57  ;;  %v3334_v1 = vsub.f32 %v5185_v31, %v4665_v49 }
 0x5e8   :  { %v6563_v41 = vpop.f32.mrb[40].mxu0  ;;  %v3333_v51 = vsub.f32 %v5186_v59, %v3109_v40 }
 0x5e9   :  { %v6565_v25 = vpop.f32.mrb[41].mxu0  ;;  %v3350_v32 = vmul.f32 %v3334_v1, %v3334_v1  ;;  %v5189_v1 = vld [vmem:[#allocation2 + $0x28] sm:$0xff] }
 0x5ea   :  { %v3349_v47 = vmul.f32 %v3333_v51, %v3333_v51  ;;  %v5190_v51 = vld [vmem:[#allocation2 + $0x20] sm:$0xff] }
 0x5ec   :  { %v4630_v58 = vpop.f32.mrb[42].mxu0 }
 0x5ed   :  { %v3024_v18 = vpop.f32.mrb[43].mxu0 }
 0x5ee   :  { %v5144_v55 = vpack.i.bf16 %v4630_v58, %v3024_v18 }
 0x5f0   :  { %5145 = vrot.lane.b32.xlu1 %v5144_v55, %s5373_s5 }
 0x602   :  { %v5131_v48 = vpop.permute.xlu0 %5130 }
 0x603   :  { %v5133_v61 = vunpack.i.h.bf16 %v5131_v48  ;;  %v5132_v42 = vunpack.i.l.bf16 %v5131_v48 }
 0x605   :  { %v2057_v8 = vsel %vm744_vm1, %v2030_v50, %v5132_v42  ;;  %v2058_v17 = vsel %vm744_vm1, %v4429_v60, %v5133_v61 }
 0x606   :  { %4675 = vmatprep.mubr.f32.mxu1 %v2057_v8  ;;  %4731 = vmatprep.mubr.f32.mxu0 %v2057_v8 }
 0x607   :  { %4676 = vmatmul.mubr.f32.gmra.mrb[140].mxu1 %v2058_v17  ;;  %4732 = vmatmul.mubr.f32.gmra.mrb[52].mxu0 %v2058_v17 }
 0x608   :  { %v4721_v35 = vpop.f32.mrb[44].mxu0 }
 0x609   :  { %v3366_v53 = vmul.f32 %v4721_v35, %v4721_v35  ;;  %v3254_v38 = vpop.f32.mrb[45].mxu0 }
 0x60a   :  { %v3365_v27 = vmul.f32 %v3254_v38, %v3254_v38 }
 0x60b   :  { %v3382_v13 = vadd.f32 %v3366_v53, %v3350_v32 }
 0x60c   :  { %v3381_v11 = vadd.f32 %v3365_v27, %v3349_v47 }
 0x60d   :  { %5149 = vrsqrt.f32 %v3382_v13  ;;  %vm3406_vm2 = vcmp.eq.f32.partialorder %v3382_v13, inf  ;;  %v3409_v56 = vand.u32 2147483648, %v3382_v13  ;;  %vm3408_vm3 = vcmp.eq.f32.partialorder %v3382_v13, 0.0 }
 0x60e   :  { %5151 = vrsqrt.f32 %v3381_v11  ;;  %vm3399_vm4 = vcmp.eq.f32.partialorder %v3381_v11, inf  ;;  %v3402_v0 = vand.u32 2147483648, %v3381_v11  ;;  %vm3401_vm5 = vcmp.eq.f32.partialorder %v3381_v11, 0.0 }
 0x617   :  { %v5150_v52 = vpop.eup %5149 }
 0x618   :  { %v5152_v62 = vpop.eup %5151  ;;  %v3405_v20 = vmul.f32 %v5150_v52, %v3382_v13 }
 0x619   :  { %v3398_v45 = vmul.f32 %v5152_v62, %v3381_v11 }
 0x61a   :  { %v3407_v6 = vsel %vm3406_vm2, %v3382_v13, %v3405_v20 }
 0x61b   :  { %v3410_v29 = vsel %vm3408_vm3, %v3409_v56, %v3407_v6  ;;  %v3400_v7 = vsel %vm3399_vm4, %v3381_v11, %v3398_v45 }
 0x61c   :  { %3510 = vst.msk [vmem:[#allocation13 + $0x8] sm:$0xff] %vm176_vm0, %v3410_v29  ;;  %v3403_v21 = vsel %vm3401_vm5, %v3402_v0, %v3400_v7 }
 0x61d   :  { %3509 = vst.msk [vmem:[#allocation13] sm:$0xff] %vm176_vm0, %v3403_v21 }
 0x622   :  { %v5136_v60 = vpop.permute.xlu1 %5135 }
 0x623   :  { %v5138_v50 = vunpack.i.h.bf16 %v5136_v60  ;;  %v5137_v22 = vunpack.i.l.bf16 %v5136_v60 }
 0x625   :  { %v2385_v46 = vsel %vm744_vm1, %v6551_v34, %v5137_v22  ;;  %v2386_v63 = vsel %vm744_vm1, %v6549_v2, %v5138_v50  ;;  %v5191_v50 = vld [vmem:[#allocation2 + $0x38] sm:$0xff] }
 0x626   :  { %4678 = vmatprep.mubr.f32.mxu1 %v2385_v46  ;;  %4734 = vmatprep.mubr.f32.mxu0 %v2385_v46 }
 0x627   :  { %4679 = vmatmul.mubr.f32.gmra.mrb[142].mxu1 %v2386_v63  ;;  %4735 = vmatmul.mubr.f32.gmra.mrb[54].mxu0 %v2386_v63 }
 0x642   :  { %v5141_v36 = vpop.permute.xlu0 %5140 }
 0x643   :  { %v5143_v3 = vunpack.i.h.bf16 %v5141_v36  ;;  %v5142_v23 = vunpack.i.l.bf16 %v5141_v36  ;;  %v5192_v36 = vld [vmem:[#allocation2 + $0x30] sm:$0xff] }
 0x645   :  { %v2713_v30 = vsel %vm744_vm1, %v6558_v16, %v5142_v23  ;;  %v2714_v37 = vsel %vm744_vm1, %v6556_v5, %v5143_v3  ;;  %v5188_v16 = vld [vmem:[#allocation2 + $0x10] sm:$0xff] }
 0x646   :  { %4681 = vmatprep.mubr.f32.mxu1 %v2713_v30  ;;  %4737 = vmatprep.mubr.f32.mxu0 %v2713_v30 }
 0x647   :  { %4682 = vmatmul.mubr.f32.gmra.mrb[144].mxu1 %v2714_v37  ;;  %4738 = vmatmul.mubr.f32.gmra.mrb[56].mxu0 %v2714_v37 }
 0x662   :  { %v5146_v34 = vpop.permute.xlu1 %5145 }
 0x663   :  { %v5148_v4 = vunpack.i.h.bf16 %v5146_v34  ;;  %v5147_v2 = vunpack.i.l.bf16 %v5146_v34 }
 0x665   :  { %v3041_v44 = vsel %vm744_vm1, %v6565_v25, %v5147_v2  ;;  %v3042_v15 = vsel %vm744_vm1, %v6563_v41, %v5148_v4 }
 0x666   :  { %4684 = vmatprep.mubr.f32.mxu1 %v3041_v44  ;;  %4740 = vmatprep.mubr.f32.mxu0 %v3041_v44 }
 0x667   :  { %4685 = vmatmul.mubr.f32.gmra.mrb[146].mxu1 %v3042_v15  ;;  %4741 = vmatmul.mubr.f32.gmra.mrb[58].mxu0 %v3042_v15 }
 0x67a   :  { %v4668_v19 = vpop.f32.mrb[134].mxu1  ;;  %v4724_v39 = vpop.f32.mrb[46].mxu0 }
 0x67b   :  { %v3336_v43 = vsub.f32 %v5187_v14, %v4668_v19  ;;  %v3119_v33 = vpop.f32.mrb[135].mxu1  ;;  %v3264_v5 = vpop.f32.mrb[47].mxu0  ;;  %v3368_v28 = vmul.f32 %v4724_v39, %v4724_v39 }
 0x67c   :  { %v3335_v26 = vsub.f32 %v5188_v16, %v3119_v33  ;;  %v3367_v9 = vmul.f32 %v3264_v5, %v3264_v5 }
 0x67d   :  { %v3352_v12 = vmul.f32 %v3336_v43, %v3336_v43 }
 0x67e   :  { %v3351_v54 = vmul.f32 %v3335_v26, %v3335_v26 }
 0x67f   :  { %v3384_v24 = vadd.f32 %v3368_v28, %v3352_v12 }
 0x680   :  { %v3383_v10 = vadd.f32 %v3367_v9, %v3351_v54  ;;  %v5193_v54 = vld [vmem:[#allocation2 + $0x48] sm:$0xff] }
 0x681   :  { %5153 = vrsqrt.f32 %v3384_v24  ;;  %vm3420_vm6 = vcmp.eq.f32.partialorder %v3384_v24, inf  ;;  %v3423_v41 = vand.u32 2147483648, %v3384_v24  ;;  %vm3422_vm7 = vcmp.eq.f32.partialorder %v3384_v24, 0.0 }
 0x682   :  { %5155 = vrsqrt.f32 %v3383_v10  ;;  %vm3413_vm8 = vcmp.eq.f32.partialorder %v3383_v10, inf  ;;  %v3416_v18 = vand.u32 2147483648, %v3383_v10  ;;  %vm3415_vm9 = vcmp.eq.f32.partialorder %v3383_v10, 0.0 }
 0x68b   :  { %v5154_v57 = vpop.eup %5153 }
 0x68c   :  { %v5156_v49 = vpop.eup %5155  ;;  %v3419_v40 = vmul.f32 %v5154_v57, %v3384_v24  ;;  %v5194_v57 = vld [vmem:[#allocation2 + $0x40] sm:$0xff] }
 0x68d   :  { %v3412_v25 = vmul.f32 %v5156_v49, %v3383_v10 }
 0x68e   :  { %v3421_v58 = vsel %vm3420_vm6, %v3384_v24, %v3419_v40 }
 0x68f   :  { %v3424_v55 = vsel %vm3422_vm7, %v3423_v41, %v3421_v58  ;;  %v3414_v48 = vsel %vm3413_vm8, %v3383_v10, %v3412_v25 }
 0x690   :  { %3512 = vst.msk [vmem:[#allocation13 + $0x18] sm:$0xff] %vm176_vm0, %v3424_v55  ;;  %v3417_v61 = vsel %vm3415_vm9, %v3416_v18, %v3414_v48 }
 0x691   :  { %3511 = vst.msk [vmem:[#allocation13 + $0x10] sm:$0xff] %vm176_vm0, %v3417_v61 }
 0x69a   :  { %v4671_v42 = vpop.f32.mrb[136].mxu1  ;;  %v4727_v31 = vpop.f32.mrb[48].mxu0 }
 0x69b   :  { %v3338_v8 = vsub.f32 %v5189_v1, %v4671_v42  ;;  %v3129_v17 = vpop.f32.mrb[137].mxu1  ;;  %v3274_v59 = vpop.f32.mrb[49].mxu0  ;;  %v3370_v53 = vmul.f32 %v4727_v31, %v4727_v31 }
 0x69c   :  { %v3337_v35 = vsub.f32 %v5190_v51, %v3129_v17  ;;  %v3369_v47 = vmul.f32 %v3274_v59, %v3274_v59 }
 0x69d   :  { %v3354_v32 = vmul.f32 %v3338_v8, %v3338_v8 }
 0x69e   :  { %v3353_v38 = vmul.f32 %v3337_v35, %v3337_v35 }
 0x69f   :  { %v3386_v27 = vadd.f32 %v3370_v53, %v3354_v32 }
 0x6a0   :  { %v3385_v13 = vadd.f32 %v3369_v47, %v3353_v38  ;;  %v5195_v38 = vld [vmem:[#allocation2 + $0x58] sm:$0xff] }
 0x6a1   :  { %5157 = vrsqrt.f32 %v3386_v27  ;;  %vm3434_vm10 = vcmp.eq.f32.partialorder %v3386_v27, inf  ;;  %v3437_v20 = vand.u32 2147483648, %v3386_v27  ;;  %vm3436_vm11 = vcmp.eq.f32.partialorder %v3386_v27, 0.0 }
 0x6a2   :  { %5159 = vrsqrt.f32 %v3385_v13  ;;  %vm3427_vm12 = vcmp.eq.f32.partialorder %v3385_v13, inf  ;;  %v3430_v6 = vand.u32 2147483648, %v3385_v13  ;;  %vm3429_vm13 = vcmp.eq.f32.partialorder %v3385_v13, 0.0 }
 0x6ab   :  { %v5158_v11 = vpop.eup %5157 }
 0x6ac   :  { %v5160_v52 = vpop.eup %5159  ;;  %v3433_v62 = vmul.f32 %v5158_v11, %v3386_v27  ;;  %v5196_v11 = vld [vmem:[#allocation2 + $0x50] sm:$0xff] }
 0x6ad   :  { %v3426_v56 = vmul.f32 %v5160_v52, %v3385_v13 }
 0x6ae   :  { %v3435_v45 = vsel %vm3434_vm10, %v3386_v27, %v3433_v62 }
 0x6af   :  { %v3438_v0 = vsel %vm3436_vm11, %v3437_v20, %v3435_v45  ;;  %v3428_v29 = vsel %vm3427_vm12, %v3385_v13, %v3426_v56 }
 0x6b0   :  { %3514 = vst.msk [vmem:[#allocation13 + $0x28] sm:$0xff] %vm176_vm0, %v3438_v0  ;;  %v3431_v7 = vsel %vm3429_vm13, %v3430_v6, %v3428_v29 }
 0x6b1   :  { %3513 = vst.msk [vmem:[#allocation13 + $0x20] sm:$0xff] %vm176_vm0, %v3431_v7 }
 0x6ba   :  { %v4674_v21 = vpop.f32.mrb[138].mxu1  ;;  %v4730_v60 = vpop.f32.mrb[50].mxu0 }
 0x6bb   :  { %v3340_v22 = vsub.f32 %v5191_v50, %v4674_v21  ;;  %v3139_v46 = vpop.f32.mrb[139].mxu1  ;;  %v3284_v63 = vpop.f32.mrb[51].mxu0  ;;  %v3372_v30 = vmul.f32 %v4730_v60, %v4730_v60 }
 0x6bc   :  { %v3339_v3 = vsub.f32 %v5192_v36, %v3139_v46  ;;  %v3371_v34 = vmul.f32 %v3284_v63, %v3284_v63 }
 0x6bd   :  { %v3356_v23 = vmul.f32 %v3340_v22, %v3340_v22 }
 0x6be   :  { %v3355_v37 = vmul.f32 %v3339_v3, %v3339_v3 }
 0x6bf   :  { %v3388_v4 = vadd.f32 %v3372_v30, %v3356_v23 }
 0x6c0   :  { %v3387_v2 = vadd.f32 %v3371_v34, %v3355_v37  ;;  %v5197_v37 = vld [vmem:[#allocation2 + $0x68] sm:$0xff] }
 0x6c1   :  { %5161 = vrsqrt.f32 %v3388_v4  ;;  %vm3448_vm14 = vcmp.eq.f32.partialorder %v3388_v4, inf  ;;  %v3451_v39 = vand.u32 2147483648, %v3388_v4  ;;  %vm3450_vm15 = vcmp.eq.f32.partialorder %v3388_v4, 0.0 }
 0x6c2   :  { %5163 = vrsqrt.f32 %v3387_v2  ;;  %vm3441_vm1 = vcmp.eq.f32.partialorder %v3387_v2, inf  ;;  %v3444_v33 = vand.u32 2147483648, %v3387_v2  ;;  %vm3443_vm2 = vcmp.eq.f32.partialorder %v3387_v2, 0.0 }
 0x6cb   :  { %v5162_v44 = vpop.eup %5161 }
 0x6cc   :  { %v5164_v15 = vpop.eup %5163  ;;  %v3447_v19 = vmul.f32 %v5162_v44, %v3388_v4  ;;  %v5198_v44 = vld [vmem:[#allocation2 + $0x60] sm:$0xff] }
 0x6cd   :  { %v3440_v14 = vmul.f32 %v5164_v15, %v3387_v2 }
 0x6ce   :  { %v3449_v43 = vsel %vm3448_vm14, %v3388_v4, %v3447_v19 }
 0x6cf   :  { %v3452_v5 = vsel %vm3450_vm15, %v3451_v39, %v3449_v43  ;;  %v3442_v16 = vsel %vm3441_vm1, %v3387_v2, %v3440_v14 }
 0x6d0   :  { %3516 = vst.msk [vmem:[#allocation13 + $0x38] sm:$0xff] %vm176_vm0, %v3452_v5  ;;  %v3445_v26 = vsel %vm3443_vm2, %v3444_v33, %v3442_v16 }
 0x6d1   :  { %3515 = vst.msk [vmem:[#allocation13 + $0x30] sm:$0xff] %vm176_vm0, %v3445_v26 }
 0x6da   :  { %v4677_v12 = vpop.f32.mrb[140].mxu1  ;;  %v4733_v28 = vpop.f32.mrb[52].mxu0 }
 0x6db   :  { %v3342_v9 = vsub.f32 %v5193_v54, %v4677_v12  ;;  %v3149_v24 = vpop.f32.mrb[141].mxu1  ;;  %v3294_v10 = vpop.f32.mrb[53].mxu0  ;;  %v3374_v41 = vmul.f32 %v4733_v28, %v4733_v28 }
 0x6dc   :  { %v3341_v49 = vsub.f32 %v5194_v57, %v3149_v24  ;;  %v3373_v58 = vmul.f32 %v3294_v10, %v3294_v10 }
 0x6dd   :  { %v3358_v40 = vmul.f32 %v3342_v9, %v3342_v9 }
 0x6de   :  { %v3357_v25 = vmul.f32 %v3341_v49, %v3341_v49 }
 0x6df   :  { %v3390_v18 = vadd.f32 %v3374_v41, %v3358_v40 }
 0x6e0   :  { %v3389_v55 = vadd.f32 %v3373_v58, %v3357_v25  ;;  %v5199_v25 = vld [vmem:[#allocation2 + $0x78] sm:$0xff] }
 0x6e1   :  { %5165 = vrsqrt.f32 %v3390_v18  ;;  %vm3462_vm3 = vcmp.eq.f32.partialorder %v3390_v18, inf  ;;  %v3465_v31 = vand.u32 2147483648, %v3390_v18  ;;  %vm3464_vm4 = vcmp.eq.f32.partialorder %v3390_v18, 0.0 }
 0x6e2   :  { %5167 = vrsqrt.f32 %v3389_v55  ;;  %vm3455_vm5 = vcmp.eq.f32.partialorder %v3389_v55, inf  ;;  %v3458_v17 = vand.u32 2147483648, %v3389_v55  ;;  %vm3457_vm6 = vcmp.eq.f32.partialorder %v3389_v55, 0.0 }
 0x6eb   :  { %v5166_v48 = vpop.eup %5165 }
 0x6ec   :  { %v5168_v61 = vpop.eup %5167  ;;  %v3461_v42 = vmul.f32 %v5166_v48, %v3390_v18  ;;  %v5200_v48 = vld [vmem:[#allocation2 + $0x70] sm:$0xff] }
 0x6ed   :  { %v3454_v1 = vmul.f32 %v5168_v61, %v3389_v55 }
 0x6ee   :  { %v3463_v8 = vsel %vm3462_vm3, %v3390_v18, %v3461_v42 }
 0x6ef   :  { %v3466_v59 = vsel %vm3464_vm4, %v3465_v31, %v3463_v8  ;;  %v3456_v51 = vsel %vm3455_vm5, %v3389_v55, %v3454_v1 }
 0x6f0   :  { %3518 = vst.msk [vmem:[#allocation13 + $0x48] sm:$0xff] %vm176_vm0, %v3466_v59  ;;  %v3459_v35 = vsel %vm3457_vm6, %v3458_v17, %v3456_v51 }
 0x6f1   :  { %3517 = vst.msk [vmem:[#allocation13 + $0x40] sm:$0xff] %vm176_vm0, %v3459_v35 }
 0x6fa   :  { %v4680_v32 = vpop.f32.mrb[142].mxu1  ;;  %v4736_v53 = vpop.f32.mrb[54].mxu0 }
 0x6fb   :  { %v3344_v47 = vsub.f32 %v5195_v38, %v4680_v32  ;;  %v3159_v27 = vpop.f32.mrb[143].mxu1  ;;  %v3304_v13 = vpop.f32.mrb[55].mxu0  ;;  %v3376_v20 = vmul.f32 %v4736_v53, %v4736_v53 }
 0x6fc   :  { %v3343_v52 = vsub.f32 %v5196_v11, %v3159_v27  ;;  %v3375_v45 = vmul.f32 %v3304_v13, %v3304_v13 }
 0x6fd   :  { %v3360_v62 = vmul.f32 %v3344_v47, %v3344_v47 }
 0x6fe   :  { %v3359_v56 = vmul.f32 %v3343_v52, %v3343_v52 }
 0x6ff   :  { %v3392_v6 = vadd.f32 %v3376_v20, %v3360_v62 }
 0x700   :  { %v3391_v0 = vadd.f32 %v3375_v45, %v3359_v56 }
 0x701   :  { %5169 = vrsqrt.f32 %v3392_v6  ;;  %vm3476_vm7 = vcmp.eq.f32.partialorder %v3392_v6, inf  ;;  %v3479_v60 = vand.u32 2147483648, %v3392_v6  ;;  %vm3478_vm8 = vcmp.eq.f32.partialorder %v3392_v6, 0.0 }
 0x702   :  { %5171 = vrsqrt.f32 %v3391_v0  ;;  %vm3469_vm9 = vcmp.eq.f32.partialorder %v3391_v0, inf  ;;  %v3472_v46 = vand.u32 2147483648, %v3391_v0  ;;  %vm3471_vm10 = vcmp.eq.f32.partialorder %v3391_v0, 0.0 }
 0x70b   :  { %v5170_v29 = vpop.eup %5169 }
 0x70c   :  { %v5172_v7 = vpop.eup %5171  ;;  %v3475_v21 = vmul.f32 %v5170_v29, %v3392_v6 }
 0x70d   :  { %v3468_v50 = vmul.f32 %v5172_v7, %v3391_v0 }
 0x70e   :  { %v3477_v22 = vsel %vm3476_vm7, %v3392_v6, %v3475_v21 }
 0x70f   :  { %v3480_v63 = vsel %vm3478_vm8, %v3479_v60, %v3477_v22  ;;  %v3470_v36 = vsel %vm3469_vm9, %v3391_v0, %v3468_v50 }
 0x710   :  { %3520 = vst.msk [vmem:[#allocation13 + $0x58] sm:$0xff] %vm176_vm0, %v3480_v63  ;;  %v3473_v3 = vsel %vm3471_vm10, %v3472_v46, %v3470_v36 }
 0x711   :  { %3519 = vst.msk [vmem:[#allocation13 + $0x50] sm:$0xff] %vm176_vm0, %v3473_v3 }
 0x71a   :  { %v4683_v23 = vpop.f32.mrb[144].mxu1  ;;  %v4739_v30 = vpop.f32.mrb[56].mxu0 }
 0x71b   :  { %v3346_v34 = vsub.f32 %v5197_v37, %v4683_v23  ;;  %v3169_v4 = vpop.f32.mrb[145].mxu1  ;;  %v3314_v2 = vpop.f32.mrb[57].mxu0  ;;  %v3378_v39 = vmul.f32 %v4739_v30, %v4739_v30 }
 0x71c   :  { %v3345_v15 = vsub.f32 %v5198_v44, %v3169_v4  ;;  %v3377_v43 = vmul.f32 %v3314_v2, %v3314_v2 }
 0x71d   :  { %v3362_v19 = vmul.f32 %v3346_v34, %v3346_v34 }
 0x71e   :  { %v3361_v14 = vmul.f32 %v3345_v15, %v3345_v15 }
 0x71f   :  { %v3394_v33 = vadd.f32 %v3378_v39, %v3362_v19 }
 0x720   :  { %v3393_v5 = vadd.f32 %v3377_v43, %v3361_v14 }
 0x721   :  { %5173 = vrsqrt.f32 %v3394_v33  ;;  %vm3490_vm11 = vcmp.eq.f32.partialorder %v3394_v33, inf  ;;  %v3493_v28 = vand.u32 2147483648, %v3394_v33  ;;  %vm3492_vm12 = vcmp.eq.f32.partialorder %v3394_v33, 0.0 }
 0x722   :  { %5175 = vrsqrt.f32 %v3393_v5  ;;  %vm3483_vm13 = vcmp.eq.f32.partialorder %v3393_v5, inf  ;;  %v3486_v24 = vand.u32 2147483648, %v3393_v5  ;;  %vm3485_vm14 = vcmp.eq.f32.partialorder %v3393_v5, 0.0 }
 0x72b   :  { %v5174_v16 = vpop.eup %5173 }
 0x72c   :  { %v5176_v26 = vpop.eup %5175  ;;  %v3489_v12 = vmul.f32 %v5174_v16, %v3394_v33 }
 0x72d   :  { %v3482_v54 = vmul.f32 %v5176_v26, %v3393_v5 }
 0x72e   :  { %v3491_v9 = vsel %vm3490_vm11, %v3394_v33, %v3489_v12 }
 0x72f   :  { %v3494_v10 = vsel %vm3492_vm12, %v3493_v28, %v3491_v9  ;;  %v3484_v57 = vsel %vm3483_vm13, %v3393_v5, %v3482_v54 }
 0x730   :  { %3522 = vst.msk [vmem:[#allocation13 + $0x68] sm:$0xff] %vm176_vm0, %v3494_v10  ;;  %v3487_v49 = vsel %vm3485_vm14, %v3486_v24, %v3484_v57 }
 0x731   :  { %3521 = vst.msk [vmem:[#allocation13 + $0x60] sm:$0xff] %vm176_vm0, %v3487_v49 }
 0x73a   :  { %v4686_v40 = vpop.f32.mrb[146].mxu1  ;;  %v4742_v41 = vpop.f32.mrb[58].mxu0 }
 0x73b   :  { %v3348_v58 = vsub.f32 %v5199_v25, %v4686_v40  ;;  %v3179_v18 = vpop.f32.mrb[147].mxu1  ;;  %v3324_v55 = vpop.f32.mrb[59].mxu0  ;;  %v3380_v31 = vmul.f32 %v4742_v41, %v4742_v41 }
 0x73c   :  { %v3347_v61 = vsub.f32 %v5200_v48, %v3179_v18  ;;  %v3379_v8 = vmul.f32 %v3324_v55, %v3324_v55 }
 0x73d   :  { %v3364_v42 = vmul.f32 %v3348_v58, %v3348_v58 }
 0x73e   :  { %v3363_v1 = vmul.f32 %v3347_v61, %v3347_v61 }
 0x73f   :  { %v3396_v17 = vadd.f32 %v3380_v31, %v3364_v42 }
 0x740   :  { %v3395_v59 = vadd.f32 %v3379_v8, %v3363_v1 }
 0x741   :  { %5177 = vrsqrt.f32 %v3396_v17  ;;  %vm3504_vm15 = vcmp.eq.f32.partialorder %v3396_v17, inf  ;;  %v3507_v53 = vand.u32 2147483648, %v3396_v17  ;;  %vm3506_vm1 = vcmp.eq.f32.partialorder %v3396_v17, 0.0 }
 0x742   :  { %5179 = vrsqrt.f32 %v3395_v59  ;;  %vm3497_vm2 = vcmp.eq.f32.partialorder %v3395_v59, inf  ;;  %v3500_v27 = vand.u32 2147483648, %v3395_v59  ;;  %vm3499_vm3 = vcmp.eq.f32.partialorder %v3395_v59, 0.0 }
 0x74b   :  { %v5178_v51 = vpop.eup %5177 }
 0x74c   :  { %v5180_v35 = vpop.eup %5179  ;;  %v3503_v32 = vmul.f32 %v5178_v51, %v3396_v17 }
 0x74d   :  { %v3496_v38 = vmul.f32 %v5180_v35, %v3395_v59 }
 0x74e   :  { %v3505_v47 = vsel %vm3504_vm15, %v3396_v17, %v3503_v32 }
 0x74f   :  { %v3508_v13 = vsel %vm3506_vm1, %v3507_v53, %v3505_v47  ;;  %v3498_v11 = vsel %vm3497_vm2, %v3395_v59, %v3496_v38 }
 0x750   :  { %3524 = vst.msk [vmem:[#allocation13 + $0x78] sm:$0xff] %vm176_vm0, %v3508_v13  ;;  %v3501_v52 = vsel %vm3499_vm3, %v3500_v27, %v3498_v11 }
 0x751   :  { %3523 = vst.msk [vmem:[#allocation13 + $0x70] sm:$0xff] %vm176_vm0, %v3501_v52 }
 0x752   :  { %5344 = shalt.err (!%p5341_p10)
}
 0x753   :  { %s5345_s23 = scalar_lea.hbm %s6619_s6, 2048 }
 0x754   :  { %p5346_p11 = scmp.ne.s32.totalorder %s6619_s6, %s5345_s23  ;;  %p5349_p12 = scmp.lt.u32.totalorder %s5345_s23, %s6619_s6 }
 0x756   :  { %p5351_p13 = pnand %p5349_p12, %p5346_p11 }
 0x758   :  { %5354 = shalt.err (!%p5351_p13)
}
 0x759   :  { %3536 = dma.vmem_to_hbm [thread:$0]  %s3531_s0, 2048, %s6619_s6, [#allocation4], %s5367_s9, %s5367_s9, %s5368_s10  }
 0x75a   :  { %5363 = dma.done.wait [#allocation4], 2048  }
 0x75b   :  { %5364 = vsyncadd [#allocation4], 4294965248 }
 0x75c   :  { %3540 = vsyncpa [#allocation3], 1 }
 0x75d   :  { %3541 = vsyncpa [#allocation6], 1 }
 0x75e   :  { %3542 = vsyncpa [#allocation9], 1 }
 0x75f   :  { %3543 = vsyncpa [#allocation12], 1 }
 0x760   :  { %3544 = vsyncpa [#allocation4], 1 }

</bundles_post_ra>
